<compile_context>
chip_gen: v7x
topology: tpu7x:2x2x1
jax: 0.10.0
libtpu: 0.0.40
codegen_flags: <defaults>
</compile_context>

<pallas_src>
import jax
import jax.numpy as jnp
from jax.experimental import pallas as pl
from jax.experimental.pallas import tpu as pltpu

STATE_DIM = 16          # state_dim
FEATURE_DIM = 8         # feature_dim
N_ADJ = 4
KSIZE = 2 * N_ADJ + 1   # 9
RES_DILATIONS = (1, 1, 1, 2, 2, 4, 4)
NUM_RES = len(RES_DILATIONS)
FUSION_DIM = 256
CAT_DIM = STATE_DIM * (NUM_RES + 1)     # 128
PRED_IN = CAT_DIM + FUSION_DIM          # 384
BN_EPS = 1e-5


def _snake_block(x, w2, bias, gamma, beta, dilation, B, N):
    """DilatedCircularConv -> ReLU -> BatchNorm1d (training-mode batch stats).

    x:     (Cin, B*N) f32, lane-batched channel-first (batch b on lanes [b*N,(b+1)*N))
    w2:    (Cout, KSIZE*Cin) bf16 im2col weight; column index = k*Cin + ci
    bias / gamma / beta: (Cout, 1) f32
    Returns (Cout, B*N) f32.
    """
    Cout = w2.shape[0]

    # im2col taps per batch half: tap k needs x[..., (t + (k - N_ADJ)*dilation) mod N],
    # i.e. a roll by the negated offset (static shift -> cheap XLU lane rotation).
    halves = []
    for b in range(B):
        xb = x[:, b * N:(b + 1) * N]                           # (Cin, N) static slice
        taps = []
        for k in range(KSIZE):
            shift = (-(k - N_ADJ) * dilation) % N
            taps.append(xb if shift == 0 else pltpu.roll(xb, shift, axis=1))
        halves.append(jnp.concatenate(taps, axis=0))           # (K*Cin, N)
    rhs = jnp.concatenate(halves, axis=1)                      # (K*Cin, B*N)

    # ONE lane-batched MXU matmul per block: bf16 operands, f32 accumulation.
    y = jnp.dot(w2, rhs.astype(jnp.bfloat16),
                preferred_element_type=jnp.float32) + bias     # (Cout, B*N)
    y = jnp.maximum(y, 0.0)                                    # ReLU before the norm

    # BatchNorm over (B, N) == all B*N lanes: single merged [y, y^2] reduction,
    # one-pass var = E[y^2] - mean^2, folded scale/shift.
    inv_cnt = 1.0 / float(B * N)
    stk = jnp.concatenate([y, y * y], axis=0)                  # (2*Cout, B*N)
    s = jnp.sum(stk, axis=1, keepdims=True) * inv_cnt          # (2*Cout, 1)
    mean = s[:Cout]
    var = jnp.maximum(s[Cout:] - mean * mean, 0.0)             # biased var (PyTorch BN)
    scale = gamma * jax.lax.rsqrt(var + BN_EPS)
    shift = beta - mean * scale
    # TODO(synk): BatchNorm running-stat updates (a training side effect) are not modeled.
    return y * scale + shift


def _snake_kernel(x_ref,
                  w_head_ref, b_head_ref, g_head_ref, be_head_ref,
                  w_res_ref, b_res_ref, g_res_ref, be_res_ref,
                  w_fus_ref, b_fus_ref,
                  w_p0g_ref, w_p0s_ref, b_p0_ref,
                  w_p1_ref, b_p1_ref, w_p2_ref, b_p2_ref,
                  out_ref, state_ref):
    B, _, N = x_ref.shape

    # Assemble the lane-batched (C, B*N) layout once at the start.
    x = jnp.concatenate([x_ref[b] for b in range(B)], axis=1).astype(jnp.float32)

    # Head block + 7 residual SnakeBlocks (trunk).  Each block's state goes
    # straight into the VMEM scratch (bounded live ranges, no final concat).
    x = _snake_block(x, w_head_ref[...], b_head_ref[...],
                     g_head_ref[...], be_head_ref[...], 1, B, N)
    state_ref[pl.ds(0, STATE_DIM), :] = x
    for i, d in enumerate(RES_DILATIONS):
        y = _snake_block(x, w_res_ref[i], b_res_ref[i],
                         g_res_ref[i], be_res_ref[i], d, B, N)
        x = x + y
        state_ref[pl.ds((i + 1) * STATE_DIM, STATE_DIM), :] = x

    state = state_ref[...].astype(jnp.bfloat16)                # (CAT_DIM, B*N)

    # Fusion 1x1 conv (one matmul for the whole batch) + per-batch global max
    # over the contour dimension via static 128-lane slices.
    fused = jnp.dot(w_fus_ref[...], state,
                    preferred_element_type=jnp.float32) + b_fus_ref[...]
    gmax = jnp.concatenate(
        [jnp.max(fused[:, b * N:(b + 1) * N], axis=1, keepdims=True)
         for b in range(B)], axis=1)                           # (FUSION_DIM, B)

    # Prediction head; w_p0 is split so the global part is ONE (256,256)@(256,B)
    # matmul instead of broadcasting + concatenating 384 channels over all N points.
    hg = jnp.dot(w_p0g_ref[...], gmax.astype(jnp.bfloat16),
                 preferred_element_type=jnp.float32)           # (256, B)
    hg_full = jnp.concatenate(
        [jnp.broadcast_to(hg[:, b:b + 1], (hg.shape[0], N)) for b in range(B)],
        axis=1)                                                # (256, B*N)
    h = jnp.dot(w_p0s_ref[...], state,
                preferred_element_type=jnp.float32) + hg_full + b_p0_ref[...]
    h = jnp.maximum(h, 0.0)
    h = jnp.dot(w_p1_ref[...], h.astype(jnp.bfloat16),
                preferred_element_type=jnp.float32) + b_p1_ref[...]
    h = jnp.maximum(h, 0.0)
    # Single lane-dense (2, B*N) store for the whole batch.
    out_ref[...] = jnp.dot(w_p2_ref[...], h.astype(jnp.bfloat16),
                           preferred_element_type=jnp.float32) + b_p2_ref[...]


def init_params(key):
    """Deterministic synthetic parameters in PyTorch layouts.

    Dilated conv weights: (Cout, Cin, K); 1x1 conv weights: (Cout, Cin);
    biases / BN affine params: (C,).
    """
    keys = jax.random.split(key, 24)
    it = iter(keys)
    n = lambda shape, scale=0.05: scale * jax.random.normal(next(it), shape, jnp.float32)
    return {
        "w_head": n((STATE_DIM, FEATURE_DIM, KSIZE)),
        "b_head": n((STATE_DIM,)),
        "g_head": 1.0 + n((STATE_DIM,)),
        "be_head": n((STATE_DIM,)),
        "w_res": n((NUM_RES, STATE_DIM, STATE_DIM, KSIZE)),
        "b_res": n((NUM_RES, STATE_DIM)),
        "g_res": 1.0 + n((NUM_RES, STATE_DIM)),
        "be_res": n((NUM_RES, STATE_DIM)),
        "w_fus": n((FUSION_DIM, CAT_DIM)),
        "b_fus": n((FUSION_DIM,)),
        "w_p0": n((256, PRED_IN)),   # input-channel order: [global(256), state(128)]
        "b_p0": n((256,)),
        "w_p1": n((64, 256)),
        "b_p1": n((64,)),
        "w_p2": n((2, 64)),
        "b_p2": n((2,)),
    }


@jax.jit
def snake_net(x_ncl, params):
    """x_ncl: (B, FEATURE_DIM, N) float32 (PyTorch NCL). Returns (B, 2, N) float32."""
    B, C, N = x_ncl.shape
    assert C == FEATURE_DIM

    addc = lambda v: v[..., None]                 # (..., C) -> (..., C, 1) channel column
    bf16 = lambda v: v.astype(jnp.bfloat16)       # matmul weights -> bf16 (f32 accumulation)

    # im2col weight layout: w2[co, k*Cin + ci] = w[co, ci, k]
    w_head2 = bf16(jnp.transpose(params["w_head"], (0, 2, 1)).reshape(
        STATE_DIM, KSIZE * FEATURE_DIM))
    w_res2 = bf16(jnp.transpose(params["w_res"], (0, 1, 3, 2)).reshape(
        NUM_RES, STATE_DIM, KSIZE * STATE_DIM))

    args = [
        x_ncl,
        w_head2, addc(params["b_head"]), addc(params["g_head"]), addc(params["be_head"]),
        w_res2, addc(params["b_res"]), addc(params["g_res"]), addc(params["be_res"]),
        bf16(params["w_fus"]), addc(params["b_fus"]),
        bf16(params["w_p0"][:, :FUSION_DIM]),   # (256, 256) multiplies the global feature
        bf16(params["w_p0"][:, FUSION_DIM:]),   # (256, 128) multiplies the per-point state
        addc(params["b_p0"]),
        bf16(params["w_p1"]), addc(params["b_p1"]),
        bf16(params["w_p2"]), addc(params["b_p2"]),
    ]

    vmem = pl.BlockSpec(memory_space=pltpu.MemorySpace.VMEM)
    # Gridless single block: total VMEM footprint is well under 1 MiB, so
    # everything lives in VMEM with no vmem_limit override.
    # TODO(synk): for production batch sizes (B >> 2) add a ("parallel",) grid over
    # batch shards to use both v7x TensorCores (needs a cross-shard BN reduction).
    out = pl.pallas_call(
        _snake_kernel,
        out_shape=jax.ShapeDtypeStruct((2, B * N), jnp.float32),
        in_specs=[vmem] * len(args),
        out_specs=vmem,
        scratch_shapes=[pltpu.VMEM((CAT_DIM, B * N), jnp.float32)],
    )(*args)
    # lane-batched (2, B*N) -> PyTorch NCL (B, 2, N); layout plumbing only.
    return jnp.transpose(out.reshape(2, B, N), (1, 0, 2))


if __name__ == "__main__":
    key = jax.random.PRNGKey(0)
    k_param, k_x = jax.random.split(key)
    params = init_params(k_param)

    B, N = 2, 128                       # N >= n_adj * max(dilation) * 2 wrap range
    x = jax.random.normal(k_x, (B, FEATURE_DIM, N), jnp.float32)

    out = snake_net(x, params)
    jax.block_until_ready(out)
    assert out.shape == (B, 2, N), out.shape
    print("KERNEL_OK")
</pallas_src>

<mosaic_0001>
module attributes {stable_mosaic.version = 11 : i64} {
  func.func @_snake_kernel(%arg0: memref<2x8x128xf32, #tpu.memory_space<vmem>>, %arg1: memref<16x72xbf16, #tpu.memory_space<vmem>>, %arg2: memref<16x1xf32, #tpu.memory_space<vmem>>, %arg3: memref<16x1xf32, #tpu.memory_space<vmem>>, %arg4: memref<16x1xf32, #tpu.memory_space<vmem>>, %arg5: memref<7x16x144xbf16, #tpu.memory_space<vmem>>, %arg6: memref<7x16x1xf32, #tpu.memory_space<vmem>>, %arg7: memref<7x16x1xf32, #tpu.memory_space<vmem>>, %arg8: memref<7x16x1xf32, #tpu.memory_space<vmem>>, %arg9: memref<256x128xbf16, #tpu.memory_space<vmem>>, %arg10: memref<256x1xf32, #tpu.memory_space<vmem>>, %arg11: memref<256x256xbf16, #tpu.memory_space<vmem>>, %arg12: memref<256x128xbf16, #tpu.memory_space<vmem>>, %arg13: memref<256x1xf32, #tpu.memory_space<vmem>>, %arg14: memref<64x256xbf16, #tpu.memory_space<vmem>>, %arg15: memref<64x1xf32, #tpu.memory_space<vmem>>, %arg16: memref<2x64xbf16, #tpu.memory_space<vmem>>, %arg17: memref<2x1xf32, #tpu.memory_space<vmem>>, %arg18: memref<2x256xf32, #tpu.memory_space<vmem>>, %arg19: memref<128x256xf32, #tpu.memory_space<vmem>>) attributes {dimension_semantics = [], scalar_prefetch = 0 : i64, scratch_operands = 1 : i64, tpu.core_type = #tpu.core_type<tc>} {
    %c0 = arith.constant 0 : index
    %c0_0 = arith.constant 0 : index
    %c0_1 = arith.constant 0 : index
    %0 = vector.load %arg0[%c0, %c0_0, %c0_1] : memref<2x8x128xf32, #tpu.memory_space<vmem>>, vector<1x8x128xf32>
    %1 = vector.shape_cast %0 : vector<1x8x128xf32> to vector<8x128xf32>
    %c1 = arith.constant 1 : index
    %c0_2 = arith.constant 0 : index
    %c0_3 = arith.constant 0 : index
    %2 = vector.load %arg0[%c1, %c0_2, %c0_3] : memref<2x8x128xf32, #tpu.memory_space<vmem>>, vector<1x8x128xf32>
    %3 = vector.shape_cast %2 : vector<1x8x128xf32> to vector<8x128xf32>
    %4 = tpu.concatenate %1, %3 in 1 : vector<8x128xf32>, vector<8x128xf32> -> vector<8x256xf32>
    %c0_4 = arith.constant 0 : index
    %c0_5 = arith.constant 0 : index
    %5 = vector.load %arg1[%c0_4, %c0_5] : memref<16x72xbf16, #tpu.memory_space<vmem>>, vector<16x72xbf16>
    %c0_6 = arith.constant 0 : index
    %c0_7 = arith.constant 0 : index
    %6 = vector.load %arg2[%c0_6, %c0_7] : memref<16x1xf32, #tpu.memory_space<vmem>>, vector<16x1xf32>
    %c0_8 = arith.constant 0 : index
    %c0_9 = arith.constant 0 : index
    %7 = vector.load %arg3[%c0_8, %c0_9] : memref<16x1xf32, #tpu.memory_space<vmem>>, vector<16x1xf32>
    %c0_10 = arith.constant 0 : index
    %c0_11 = arith.constant 0 : index
    %8 = vector.load %arg4[%c0_10, %c0_11] : memref<16x1xf32, #tpu.memory_space<vmem>>, vector<16x1xf32>
    %9 = vector.extract_strided_slice %4 {offsets = [0, 0], sizes = [8, 128], strides = [1, 1]} : vector<8x256xf32> to vector<8x128xf32>
    %c4_i32 = arith.constant 4 : i32
    %10 = tpu.dynamic_rotate %9 by %c4_i32 dim 1 : vector<8x128xf32>, i32 -> vector<8x128xf32>
    %c3_i32 = arith.constant 3 : i32
    %11 = tpu.dynamic_rotate %9 by %c3_i32 dim 1 : vector<8x128xf32>, i32 -> vector<8x128xf32>
    %c2_i32 = arith.constant 2 : i32
    %12 = tpu.dynamic_rotate %9 by %c2_i32 dim 1 : vector<8x128xf32>, i32 -> vector<8x128xf32>
    %c1_i32 = arith.constant 1 : i32
    %13 = tpu.dynamic_rotate %9 by %c1_i32 dim 1 : vector<8x128xf32>, i32 -> vector<8x128xf32>
    %c127_i32 = arith.constant 127 : i32
    %14 = tpu.dynamic_rotate %9 by %c127_i32 dim 1 : vector<8x128xf32>, i32 -> vector<8x128xf32>
    %c126_i32 = arith.constant 126 : i32
    %15 = tpu.dynamic_rotate %9 by %c126_i32 dim 1 : vector<8x128xf32>, i32 -> vector<8x128xf32>
    %c125_i32 = arith.constant 125 : i32
    %16 = tpu.dynamic_rotate %9 by %c125_i32 dim 1 : vector<8x128xf32>, i32 -> vector<8x128xf32>
    %c124_i32 = arith.constant 124 : i32
    %17 = tpu.dynamic_rotate %9 by %c124_i32 dim 1 : vector<8x128xf32>, i32 -> vector<8x128xf32>
    %18 = tpu.concatenate %10, %11, %12, %13, %9, %14, %15, %16, %17 in 0 : vector<8x128xf32>, vector<8x128xf32>, vector<8x128xf32>, vector<8x128xf32>, vector<8x128xf32>, vector<8x128xf32>, vector<8x128xf32>, vector<8x128xf32>, vector<8x128xf32> -> vector<72x128xf32>
    %19 = vector.extract_strided_slice %4 {offsets = [0, 128], sizes = [8, 128], strides = [1, 1]} : vector<8x256xf32> to vector<8x128xf32>
    %c4_i32_12 = arith.constant 4 : i32
    %20 = tpu.dynamic_rotate %19 by %c4_i32_12 dim 1 : vector<8x128xf32>, i32 -> vector<8x128xf32>
    %c3_i32_13 = arith.constant 3 : i32
    %21 = tpu.dynamic_rotate %19 by %c3_i32_13 dim 1 : vector<8x128xf32>, i32 -> vector<8x128xf32>
    %c2_i32_14 = arith.constant 2 : i32
    %22 = tpu.dynamic_rotate %19 by %c2_i32_14 dim 1 : vector<8x128xf32>, i32 -> vector<8x128xf32>
    %c1_i32_15 = arith.constant 1 : i32
    %23 = tpu.dynamic_rotate %19 by %c1_i32_15 dim 1 : vector<8x128xf32>, i32 -> vector<8x128xf32>
    %c127_i32_16 = arith.constant 127 : i32
    %24 = tpu.dynamic_rotate %19 by %c127_i32_16 dim 1 : vector<8x128xf32>, i32 -> vector<8x128xf32>
    %c126_i32_17 = arith.constant 126 : i32
    %25 = tpu.dynamic_rotate %19 by %c126_i32_17 dim 1 : vector<8x128xf32>, i32 -> vector<8x128xf32>
    %c125_i32_18 = arith.constant 125 : i32
    %26 = tpu.dynamic_rotate %19 by %c125_i32_18 dim 1 : vector<8x128xf32>, i32 -> vector<8x128xf32>
    %c124_i32_19 = arith.constant 124 : i32
    %27 = tpu.dynamic_rotate %19 by %c124_i32_19 dim 1 : vector<8x128xf32>, i32 -> vector<8x128xf32>
    %28 = tpu.concatenate %20, %21, %22, %23, %19, %24, %25, %26, %27 in 0 : vector<8x128xf32>, vector<8x128xf32>, vector<8x128xf32>, vector<8x128xf32>, vector<8x128xf32>, vector<8x128xf32>, vector<8x128xf32>, vector<8x128xf32>, vector<8x128xf32> -> vector<72x128xf32>
    %29 = tpu.concatenate %18, %28 in 1 : vector<72x128xf32>, vector<72x128xf32> -> vector<72x256xf32>
    %30 = arith.truncf %29 : vector<72x256xf32> to vector<72x256xbf16>
    %cst = arith.constant dense<0.000000e+00> : vector<16x256xf32>
    %31 = tpu.matmul %5, %30, %cst {dimension_numbers = #tpu.dot_dimension_numbers<[1], [0], [0], [1], [0, 0, 1, 1], [], []>} : vector<16x72xbf16>, vector<72x256xbf16>, vector<16x256xf32> -> vector<16x256xf32>
    %32 = vector.broadcast %6 : vector<16x1xf32> to vector<16x256xf32>
    %33 = arith.addf %31, %32 : vector<16x256xf32>
    %cst_20 = arith.constant 0.000000e+00 : f32
    %34 = vector.broadcast %cst_20 : f32 to vector<16x256xf32>
    %35 = arith.maximumf %33, %34 : vector<16x256xf32>
    %36 = arith.mulf %35, %35 : vector<16x256xf32>
    %37 = tpu.concatenate %35, %36 in 0 : vector<16x256xf32>, vector<16x256xf32> -> vector<32x256xf32>
    %cst_21 = arith.constant dense<0.000000e+00> : vector<32xf32>
    %38 = vector.multi_reduction <add>, %37, %cst_21 [1] : vector<32x256xf32> to vector<32xf32>
    %39 = vector.shape_cast %38 : vector<32xf32> to vector<32x1xf32>
    %cst_22 = arith.constant 3.906250e-03 : f32
    %40 = vector.broadcast %cst_22 : f32 to vector<32x1xf32>
    %41 = arith.mulf %39, %40 : vector<32x1xf32>
    %42 = vector.extract_strided_slice %41 {offsets = [0, 0], sizes = [16, 1], strides = [1, 1]} : vector<32x1xf32> to vector<16x1xf32>
    %43 = vector.extract_strided_slice %41 {offsets = [16, 0], sizes = [16, 1], strides = [1, 1]} : vector<32x1xf32> to vector<16x1xf32>
    %44 = arith.mulf %42, %42 : vector<16x1xf32>
    %45 = arith.subf %43, %44 : vector<16x1xf32>
    %cst_23 = arith.constant 0.000000e+00 : f32
    %46 = vector.broadcast %cst_23 : f32 to vector<16x1xf32>
    %47 = arith.maximumf %45, %46 : vector<16x1xf32>
    %cst_24 = arith.constant 9.99999974E-6 : f32
    %48 = vector.broadcast %cst_24 : f32 to vector<16x1xf32>
    %49 = arith.addf %47, %48 : vector<16x1xf32>
    %50 = math.rsqrt %49 : vector<16x1xf32>
    %51 = arith.mulf %7, %50 : vector<16x1xf32>
    %52 = arith.mulf %42, %51 : vector<16x1xf32>
    %53 = arith.subf %8, %52 : vector<16x1xf32>
    %54 = vector.broadcast %51 : vector<16x1xf32> to vector<16x256xf32>
    %55 = arith.mulf %35, %54 : vector<16x256xf32>
    %56 = vector.broadcast %53 : vector<16x1xf32> to vector<16x256xf32>
    %57 = arith.addf %55, %56 : vector<16x256xf32>
    %c0_25 = arith.constant 0 : index
    %c0_26 = arith.constant 0 : index
    %58 = vector.load %arg19[%c0_25, %c0_26] : memref<128x256xf32, #tpu.memory_space<vmem>>, vector<16x256xf32>
    tpu.vector_store %arg19[%c0_25, %c0_26], %57 {strides = array<i32>} : memref<128x256xf32, #tpu.memory_space<vmem>>, vector<16x256xf32>,
    %c0_27 = arith.constant 0 : index
    %c0_28 = arith.constant 0 : index
    %c0_29 = arith.constant 0 : index
    %59 = vector.load %arg5[%c0_27, %c0_28, %c0_29] : memref<7x16x144xbf16, #tpu.memory_space<vmem>>, vector<1x16x144xbf16>
    %60 = vector.shape_cast %59 : vector<1x16x144xbf16> to vector<16x144xbf16>
    %c0_30 = arith.constant 0 : index
    %c0_31 = arith.constant 0 : index
    %c0_32 = arith.constant 0 : index
    %61 = vector.load %arg6[%c0_30, %c0_31, %c0_32] : memref<7x16x1xf32, #tpu.memory_space<vmem>>, vector<1x16x1xf32>
    %62 = vector.shape_cast %61 : vector<1x16x1xf32> to vector<16x1xf32>
    %c0_33 = arith.constant 0 : index
    %c0_34 = arith.constant 0 : index
    %c0_35 = arith.constant 0 : index
    %63 = vector.load %arg7[%c0_33, %c0_34, %c0_35] : memref<7x16x1xf32, #tpu.memory_space<vmem>>, vector<1x16x1xf32>
    %64 = vector.shape_cast %63 : vector<1x16x1xf32> to vector<16x1xf32>
    %c0_36 = arith.constant 0 : index
    %c0_37 = arith.constant 0 : index
    %c0_38 = arith.constant 0 : index
    %65 = vector.load %arg8[%c0_36, %c0_37, %c0_38] : memref<7x16x1xf32, #tpu.memory_space<vmem>>, vector<1x16x1xf32>
    %66 = vector.shape_cast %65 : vector<1x16x1xf32> to vector<16x1xf32>
    %67 = vector.extract_strided_slice %57 {offsets = [0, 0], sizes = [16, 128], strides = [1, 1]} : vector<16x256xf32> to vector<16x128xf32>
    %c4_i32_39 = arith.constant 4 : i32
    %68 = tpu.dynamic_rotate %67 by %c4_i32_39 dim 1 : vector<16x128xf32>, i32 -> vector<16x128xf32>
    %c3_i32_40 = arith.constant 3 : i32
    %69 = tpu.dynamic_rotate %67 by %c3_i32_40 dim 1 : vector<16x128xf32>, i32 -> vector<16x128xf32>
    %c2_i32_41 = arith.constant 2 : i32
    %70 = tpu.dynamic_rotate %67 by %c2_i32_41 dim 1 : vector<16x128xf32>, i32 -> vector<16x128xf32>
    %c1_i32_42 = arith.constant 1 : i32
    %71 = tpu.dynamic_rotate %67 by %c1_i32_42 dim 1 : vector<16x128xf32>, i32 -> vector<16x128xf32>
    %c127_i32_43 = arith.constant 127 : i32
    %72 = tpu.dynamic_rotate %67 by %c127_i32_43 dim 1 : vector<16x128xf32>, i32 -> vector<16x128xf32>
    %c126_i32_44 = arith.constant 126 : i32
    %73 = tpu.dynamic_rotate %67 by %c126_i32_44 dim 1 : vector<16x128xf32>, i32 -> vector<16x128xf32>
    %c125_i32_45 = arith.constant 125 : i32
    %74 = tpu.dynamic_rotate %67 by %c125_i32_45 dim 1 : vector<16x128xf32>, i32 -> vector<16x128xf32>
    %c124_i32_46 = arith.constant 124 : i32
    %75 = tpu.dynamic_rotate %67 by %c124_i32_46 dim 1 : vector<16x128xf32>, i32 -> vector<16x128xf32>
    %76 = tpu.concatenate %68, %69, %70, %71, %67, %72, %73, %74, %75 in 0 : vector<16x128xf32>, vector<16x128xf32>, vector<16x128xf32>, vector<16x128xf32>, vector<16x128xf32>, vector<16x128xf32>, vector<16x128xf32>, vector<16x128xf32>, vector<16x128xf32> -> vector<144x128xf32>
    %77 = vector.extract_strided_slice %57 {offsets = [0, 128], sizes = [16, 128], strides = [1, 1]} : vector<16x256xf32> to vector<16x128xf32>
    %c4_i32_47 = arith.constant 4 : i32
    %78 = tpu.dynamic_rotate %77 by %c4_i32_47 dim 1 : vector<16x128xf32>, i32 -> vector<16x128xf32>
    %c3_i32_48 = arith.constant 3 : i32
    %79 = tpu.dynamic_rotate %77 by %c3_i32_48 dim 1 : vector<16x128xf32>, i32 -> vector<16x128xf32>
    %c2_i32_49 = arith.constant 2 : i32
    %80 = tpu.dynamic_rotate %77 by %c2_i32_49 dim 1 : vector<16x128xf32>, i32 -> vector<16x128xf32>
    %c1_i32_50 = arith.constant 1 : i32
    %81 = tpu.dynamic_rotate %77 by %c1_i32_50 dim 1 : vector<16x128xf32>, i32 -> vector<16x128xf32>
    %c127_i32_51 = arith.constant 127 : i32
    %82 = tpu.dynamic_rotate %77 by %c127_i32_51 dim 1 : vector<16x128xf32>, i32 -> vector<16x128xf32>
    %c126_i32_52 = arith.constant 126 : i32
    %83 = tpu.dynamic_rotate %77 by %c126_i32_52 dim 1 : vector<16x128xf32>, i32 -> vector<16x128xf32>
    %c125_i32_53 = arith.constant 125 : i32
    %84 = tpu.dynamic_rotate %77 by %c125_i32_53 dim 1 : vector<16x128xf32>, i32 -> vector<16x128xf32>
    %c124_i32_54 = arith.constant 124 : i32
    %85 = tpu.dynamic_rotate %77 by %c124_i32_54 dim 1 : vector<16x128xf32>, i32 -> vector<16x128xf32>
    %86 = tpu.concatenate %78, %79, %80, %81, %77, %82, %83, %84, %85 in 0 : vector<16x128xf32>, vector<16x128xf32>, vector<16x128xf32>, vector<16x128xf32>, vector<16x128xf32>, vector<16x128xf32>, vector<16x128xf32>, vector<16x128xf32>, vector<16x128xf32> -> vector<144x128xf32>
    %87 = tpu.concatenate %76, %86 in 1 : vector<144x128xf32>, vector<144x128xf32> -> vector<144x256xf32>
    %88 = arith.truncf %87 : vector<144x256xf32> to vector<144x256xbf16>
    %cst_55 = arith.constant dense<0.000000e+00> : vector<16x256xf32>
    %89 = tpu.matmul %60, %88, %cst_55 {dimension_numbers = #tpu.dot_dimension_numbers<[1], [0], [0], [1], [0, 0, 1, 1], [], []>} : vector<16x144xbf16>, vector<144x256xbf16>, vector<16x256xf32> -> vector<16x256xf32>
    %90 = vector.broadcast %62 : vector<16x1xf32> to vector<16x256xf32>
    %91 = arith.addf %89, %90 : vector<16x256xf32>
    %cst_56 = arith.constant 0.000000e+00 : f32
    %92 = vector.broadcast %cst_56 : f32 to vector<16x256xf32>
    %93 = arith.maximumf %91, %92 : vector<16x256xf32>
    %94 = arith.mulf %93, %93 : vector<16x256xf32>
    %95 = tpu.concatenate %93, %94 in 0 : vector<16x256xf32>, vector<16x256xf32> -> vector<32x256xf32>
    %cst_57 = arith.constant dense<0.000000e+00> : vector<32xf32>
    %96 = vector.multi_reduction <add>, %95, %cst_57 [1] : vector<32x256xf32> to vector<32xf32>
    %97 = vector.shape_cast %96 : vector<32xf32> to vector<32x1xf32>
    %cst_58 = arith.constant 3.906250e-03 : f32
    %98 = vector.broadcast %cst_58 : f32 to vector<32x1xf32>
    %99 = arith.mulf %97, %98 : vector<32x1xf32>
    %100 = vector.extract_strided_slice %99 {offsets = [0, 0], sizes = [16, 1], strides = [1, 1]} : vector<32x1xf32> to vector<16x1xf32>
    %101 = vector.extract_strided_slice %99 {offsets = [16, 0], sizes = [16, 1], strides = [1, 1]} : vector<32x1xf32> to vector<16x1xf32>
    %102 = arith.mulf %100, %100 : vector<16x1xf32>
    %103 = arith.subf %101, %102 : vector<16x1xf32>
    %cst_59 = arith.constant 0.000000e+00 : f32
    %104 = vector.broadcast %cst_59 : f32 to vector<16x1xf32>
    %105 = arith.maximumf %103, %104 : vector<16x1xf32>
    %cst_60 = arith.constant 9.99999974E-6 : f32
    %106 = vector.broadcast %cst_60 : f32 to vector<16x1xf32>
    %107 = arith.addf %105, %106 : vector<16x1xf32>
    %108 = math.rsqrt %107 : vector<16x1xf32>
    %109 = arith.mulf %64, %108 : vector<16x1xf32>
    %110 = arith.mulf %100, %109 : vector<16x1xf32>
    %111 = arith.subf %66, %110 : vector<16x1xf32>
    %112 = vector.broadcast %109 : vector<16x1xf32> to vector<16x256xf32>
    %113 = arith.mulf %93, %112 : vector<16x256xf32>
    %114 = vector.broadcast %111 : vector<16x1xf32> to vector<16x256xf32>
    %115 = arith.addf %113, %114 : vector<16x256xf32>
    %116 = arith.addf %57, %115 : vector<16x256xf32>
    %c16 = arith.constant 16 : index
    %c0_61 = arith.constant 0 : index
    %117 = vector.load %arg19[%c16, %c0_61] : memref<128x256xf32, #tpu.memory_space<vmem>>, vector<16x256xf32>
    tpu.vector_store %arg19[%c16, %c0_61], %116 {strides = array<i32>} : memref<128x256xf32, #tpu.memory_space<vmem>>, vector<16x256xf32>,
    %c1_62 = arith.constant 1 : index
    %c0_63 = arith.constant 0 : index
    %c0_64 = arith.constant 0 : index
    %118 = vector.load %arg5[%c1_62, %c0_63, %c0_64] : memref<7x16x144xbf16, #tpu.memory_space<vmem>>, vector<1x16x144xbf16>
    %119 = vector.shape_cast %118 : vector<1x16x144xbf16> to vector<16x144xbf16>
    %c1_65 = arith.constant 1 : index
    %c0_66 = arith.constant 0 : index
    %c0_67 = arith.constant 0 : index
    %120 = vector.load %arg6[%c1_65, %c0_66, %c0_67] : memref<7x16x1xf32, #tpu.memory_space<vmem>>, vector<1x16x1xf32>
    %121 = vector.shape_cast %120 : vector<1x16x1xf32> to vector<16x1xf32>
    %c1_68 = arith.constant 1 : index
    %c0_69 = arith.constant 0 : index
    %c0_70 = arith.constant 0 : index
    %122 = vector.load %arg7[%c1_68, %c0_69, %c0_70] : memref<7x16x1xf32, #tpu.memory_space<vmem>>, vector<1x16x1xf32>
    %123 = vector.shape_cast %122 : vector<1x16x1xf32> to vector<16x1xf32>
    %c1_71 = arith.constant 1 : index
    %c0_72 = arith.constant 0 : index
    %c0_73 = arith.constant 0 : index
    %124 = vector.load %arg8[%c1_71, %c0_72, %c0_73] : memref<7x16x1xf32, #tpu.memory_space<vmem>>, vector<1x16x1xf32>
    %125 = vector.shape_cast %124 : vector<1x16x1xf32> to vector<16x1xf32>
    %126 = vector.extract_strided_slice %116 {offsets = [0, 0], sizes = [16, 128], strides = [1, 1]} : vector<16x256xf32> to vector<16x128xf32>
    %c4_i32_74 = arith.constant 4 : i32
    %127 = tpu.dynamic_rotate %126 by %c4_i32_74 dim 1 : vector<16x128xf32>, i32 -> vector<16x128xf32>
    %c3_i32_75 = arith.constant 3 : i32
    %128 = tpu.dynamic_rotate %126 by %c3_i32_75 dim 1 : vector<16x128xf32>, i32 -> vector<16x128xf32>
    %c2_i32_76 = arith.constant 2 : i32
    %129 = tpu.dynamic_rotate %126 by %c2_i32_76 dim 1 : vector<16x128xf32>, i32 -> vector<16x128xf32>
    %c1_i32_77 = arith.constant 1 : i32
    %130 = tpu.dynamic_rotate %126 by %c1_i32_77 dim 1 : vector<16x128xf32>, i32 -> vector<16x128xf32>
    %c127_i32_78 = arith.constant 127 : i32
    %131 = tpu.dynamic_rotate %126 by %c127_i32_78 dim 1 : vector<16x128xf32>, i32 -> vector<16x128xf32>
    %c126_i32_79 = arith.constant 126 : i32
    %132 = tpu.dynamic_rotate %126 by %c126_i32_79 dim 1 : vector<16x128xf32>, i32 -> vector<16x128xf32>
    %c125_i32_80 = arith.constant 125 : i32
    %133 = tpu.dynamic_rotate %126 by %c125_i32_80 dim 1 : vector<16x128xf32>, i32 -> vector<16x128xf32>
    %c124_i32_81 = arith.constant 124 : i32
    %134 = tpu.dynamic_rotate %126 by %c124_i32_81 dim 1 : vector<16x128xf32>, i32 -> vector<16x128xf32>
    %135 = tpu.concatenate %127, %128, %129, %130, %126, %131, %132, %133, %134 in 0 : vector<16x128xf32>, vector<16x128xf32>, vector<16x128xf32>, vector<16x128xf32>, vector<16x128xf32>, vector<16x128xf32>, vector<16x128xf32>, vector<16x128xf32>, vector<16x128xf32> -> vector<144x128xf32>
    %136 = vector.extract_strided_slice %116 {offsets = [0, 128], sizes = [16, 128], strides = [1, 1]} : vector<16x256xf32> to vector<16x128xf32>
    %c4_i32_82 = arith.constant 4 : i32
    %137 = tpu.dynamic_rotate %136 by %c4_i32_82 dim 1 : vector<16x128xf32>, i32 -> vector<16x128xf32>
    %c3_i32_83 = arith.constant 3 : i32
    %138 = tpu.dynamic_rotate %136 by %c3_i32_83 dim 1 : vector<16x128xf32>, i32 -> vector<16x128xf32>
    %c2_i32_84 = arith.constant 2 : i32
    %139 = tpu.dynamic_rotate %136 by %c2_i32_84 dim 1 : vector<16x128xf32>, i32 -> vector<16x128xf32>
    %c1_i32_85 = arith.constant 1 : i32
    %140 = tpu.dynamic_rotate %136 by %c1_i32_85 dim 1 : vector<16x128xf32>, i32 -> vector<16x128xf32>
    %c127_i32_86 = arith.constant 127 : i32
    %141 = tpu.dynamic_rotate %136 by %c127_i32_86 dim 1 : vector<16x128xf32>, i32 -> vector<16x128xf32>
    %c126_i32_87 = arith.constant 126 : i32
    %142 = tpu.dynamic_rotate %136 by %c126_i32_87 dim 1 : vector<16x128xf32>, i32 -> vector<16x128xf32>
    %c125_i32_88 = arith.constant 125 : i32
    %143 = tpu.dynamic_rotate %136 by %c125_i32_88 dim 1 : vector<16x128xf32>, i32 -> vector<16x128xf32>
    %c124_i32_89 = arith.constant 124 : i32
    %144 = tpu.dynamic_rotate %136 by %c124_i32_89 dim 1 : vector<16x128xf32>, i32 -> vector<16x128xf32>
    %145 = tpu.concatenate %137, %138, %139, %140, %136, %141, %142, %143, %144 in 0 : vector<16x128xf32>, vector<16x128xf32>, vector<16x128xf32>, vector<16x128xf32>, vector<16x128xf32>, vector<16x128xf32>, vector<16x128xf32>, vector<16x128xf32>, vector<16x128xf32> -> vector<144x128xf32>
    %146 = tpu.concatenate %135, %145 in 1 : vector<144x128xf32>, vector<144x128xf32> -> vector<144x256xf32>
    %147 = arith.truncf %146 : vector<144x256xf32> to vector<144x256xbf16>
    %cst_90 = arith.constant dense<0.000000e+00> : vector<16x256xf32>
    %148 = tpu.matmul %119, %147, %cst_90 {dimension_numbers = #tpu.dot_dimension_numbers<[1], [0], [0], [1], [0, 0, 1, 1], [], []>} : vector<16x144xbf16>, vector<144x256xbf16>, vector<16x256xf32> -> vector<16x256xf32>
    %149 = vector.broadcast %121 : vector<16x1xf32> to vector<16x256xf32>
    %150 = arith.addf %148, %149 : vector<16x256xf32>
    %cst_91 = arith.constant 0.000000e+00 : f32
    %151 = vector.broadcast %cst_91 : f32 to vector<16x256xf32>
    %152 = arith.maximumf %150, %151 : vector<16x256xf32>
    %153 = arith.mulf %152, %152 : vector<16x256xf32>
    %154 = tpu.concatenate %152, %153 in 0 : vector<16x256xf32>, vector<16x256xf32> -> vector<32x256xf32>
    %cst_92 = arith.constant dense<0.000000e+00> : vector<32xf32>
    %155 = vector.multi_reduction <add>, %154, %cst_92 [1] : vector<32x256xf32> to vector<32xf32>
    %156 = vector.shape_cast %155 : vector<32xf32> to vector<32x1xf32>
    %cst_93 = arith.constant 3.906250e-03 : f32
    %157 = vector.broadcast %cst_93 : f32 to vector<32x1xf32>
    %158 = arith.mulf %156, %157 : vector<32x1xf32>
    %159 = vector.extract_strided_slice %158 {offsets = [0, 0], sizes = [16, 1], strides = [1, 1]} : vector<32x1xf32> to vector<16x1xf32>
    %160 = vector.extract_strided_slice %158 {offsets = [16, 0], sizes = [16, 1], strides = [1, 1]} : vector<32x1xf32> to vector<16x1xf32>
    %161 = arith.mulf %159, %159 : vector<16x1xf32>
    %162 = arith.subf %160, %161 : vector<16x1xf32>
    %cst_94 = arith.constant 0.000000e+00 : f32
    %163 = vector.broadcast %cst_94 : f32 to vector<16x1xf32>
    %164 = arith.maximumf %162, %163 : vector<16x1xf32>
    %cst_95 = arith.constant 9.99999974E-6 : f32
    %165 = vector.broadcast %cst_95 : f32 to vector<16x1xf32>
    %166 = arith.addf %164, %165 : vector<16x1xf32>
    %167 = math.rsqrt %166 : vector<16x1xf32>
    %168 = arith.mulf %123, %167 : vector<16x1xf32>
    %169 = arith.mulf %159, %168 : vector<16x1xf32>
    %170 = arith.subf %125, %169 : vector<16x1xf32>
    %171 = vector.broadcast %168 : vector<16x1xf32> to vector<16x256xf32>
    %172 = arith.mulf %152, %171 : vector<16x256xf32>
    %173 = vector.broadcast %170 : vector<16x1xf32> to vector<16x256xf32>
    %174 = arith.addf %172, %173 : vector<16x256xf32>
    %175 = arith.addf %116, %174 : vector<16x256xf32>
    %c32 = arith.constant 32 : index
    %c0_96 = arith.constant 0 : index
    %176 = vector.load %arg19[%c32, %c0_96] : memref<128x256xf32, #tpu.memory_space<vmem>>, vector<16x256xf32>
    tpu.vector_store %arg19[%c32, %c0_96], %175 {strides = array<i32>} : memref<128x256xf32, #tpu.memory_space<vmem>>, vector<16x256xf32>,
    %c2 = arith.constant 2 : index
    %c0_97 = arith.constant 0 : index
    %c0_98 = arith.constant 0 : index
    %177 = vector.load %arg5[%c2, %c0_97, %c0_98] : memref<7x16x144xbf16, #tpu.memory_space<vmem>>, vector<1x16x144xbf16>
    %178 = vector.shape_cast %177 : vector<1x16x144xbf16> to vector<16x144xbf16>
    %c2_99 = arith.constant 2 : index
    %c0_100 = arith.constant 0 : index
    %c0_101 = arith.constant 0 : index
    %179 = vector.load %arg6[%c2_99, %c0_100, %c0_101] : memref<7x16x1xf32, #tpu.memory_space<vmem>>, vector<1x16x1xf32>
    %180 = vector.shape_cast %179 : vector<1x16x1xf32> to vector<16x1xf32>
    %c2_102 = arith.constant 2 : index
    %c0_103 = arith.constant 0 : index
    %c0_104 = arith.constant 0 : index
    %181 = vector.load %arg7[%c2_102, %c0_103, %c0_104] : memref<7x16x1xf32, #tpu.memory_space<vmem>>, vector<1x16x1xf32>
    %182 = vector.shape_cast %181 : vector<1x16x1xf32> to vector<16x1xf32>
    %c2_105 = arith.constant 2 : index
    %c0_106 = arith.constant 0 : index
    %c0_107 = arith.constant 0 : index
    %183 = vector.load %arg8[%c2_105, %c0_106, %c0_107] : memref<7x16x1xf32, #tpu.memory_space<vmem>>, vector<1x16x1xf32>
    %184 = vector.shape_cast %183 : vector<1x16x1xf32> to vector<16x1xf32>
    %185 = vector.extract_strided_slice %175 {offsets = [0, 0], sizes = [16, 128], strides = [1, 1]} : vector<16x256xf32> to vector<16x128xf32>
    %c4_i32_108 = arith.constant 4 : i32
    %186 = tpu.dynamic_rotate %185 by %c4_i32_108 dim 1 : vector<16x128xf32>, i32 -> vector<16x128xf32>
    %c3_i32_109 = arith.constant 3 : i32
    %187 = tpu.dynamic_rotate %185 by %c3_i32_109 dim 1 : vector<16x128xf32>, i32 -> vector<16x128xf32>
    %c2_i32_110 = arith.constant 2 : i32
    %188 = tpu.dynamic_rotate %185 by %c2_i32_110 dim 1 : vector<16x128xf32>, i32 -> vector<16x128xf32>
    %c1_i32_111 = arith.constant 1 : i32
    %189 = tpu.dynamic_rotate %185 by %c1_i32_111 dim 1 : vector<16x128xf32>, i32 -> vector<16x128xf32>
    %c127_i32_112 = arith.constant 127 : i32
    %190 = tpu.dynamic_rotate %185 by %c127_i32_112 dim 1 : vector<16x128xf32>, i32 -> vector<16x128xf32>
    %c126_i32_113 = arith.constant 126 : i32
    %191 = tpu.dynamic_rotate %185 by %c126_i32_113 dim 1 : vector<16x128xf32>, i32 -> vector<16x128xf32>
    %c125_i32_114 = arith.constant 125 : i32
    %192 = tpu.dynamic_rotate %185 by %c125_i32_114 dim 1 : vector<16x128xf32>, i32 -> vector<16x128xf32>
    %c124_i32_115 = arith.constant 124 : i32
    %193 = tpu.dynamic_rotate %185 by %c124_i32_115 dim 1 : vector<16x128xf32>, i32 -> vector<16x128xf32>
    %194 = tpu.concatenate %186, %187, %188, %189, %185, %190, %191, %192, %193 in 0 : vector<16x128xf32>, vector<16x128xf32>, vector<16x128xf32>, vector<16x128xf32>, vector<16x128xf32>, vector<16x128xf32>, vector<16x128xf32>, vector<16x128xf32>, vector<16x128xf32> -> vector<144x128xf32>
    %195 = vector.extract_strided_slice %175 {offsets = [0, 128], sizes = [16, 128], strides = [1, 1]} : vector<16x256xf32> to vector<16x128xf32>
    %c4_i32_116 = arith.constant 4 : i32
    %196 = tpu.dynamic_rotate %195 by %c4_i32_116 dim 1 : vector<16x128xf32>, i32 -> vector<16x128xf32>
    %c3_i32_117 = arith.constant 3 : i32
    %197 = tpu.dynamic_rotate %195 by %c3_i32_117 dim 1 : vector<16x128xf32>, i32 -> vector<16x128xf32>
    %c2_i32_118 = arith.constant 2 : i32
    %198 = tpu.dynamic_rotate %195 by %c2_i32_118 dim 1 : vector<16x128xf32>, i32 -> vector<16x128xf32>
    %c1_i32_119 = arith.constant 1 : i32
    %199 = tpu.dynamic_rotate %195 by %c1_i32_119 dim 1 : vector<16x128xf32>, i32 -> vector<16x128xf32>
    %c127_i32_120 = arith.constant 127 : i32
    %200 = tpu.dynamic_rotate %195 by %c127_i32_120 dim 1 : vector<16x128xf32>, i32 -> vector<16x128xf32>
    %c126_i32_121 = arith.constant 126 : i32
    %201 = tpu.dynamic_rotate %195 by %c126_i32_121 dim 1 : vector<16x128xf32>, i32 -> vector<16x128xf32>
    %c125_i32_122 = arith.constant 125 : i32
    %202 = tpu.dynamic_rotate %195 by %c125_i32_122 dim 1 : vector<16x128xf32>, i32 -> vector<16x128xf32>
    %c124_i32_123 = arith.constant 124 : i32
    %203 = tpu.dynamic_rotate %195 by %c124_i32_123 dim 1 : vector<16x128xf32>, i32 -> vector<16x128xf32>
    %204 = tpu.concatenate %196, %197, %198, %199, %195, %200, %201, %202, %203 in 0 : vector<16x128xf32>, vector<16x128xf32>, vector<16x128xf32>, vector<16x128xf32>, vector<16x128xf32>, vector<16x128xf32>, vector<16x128xf32>, vector<16x128xf32>, vector<16x128xf32> -> vector<144x128xf32>
    %205 = tpu.concatenate %194, %204 in 1 : vector<144x128xf32>, vector<144x128xf32> -> vector<144x256xf32>
    %206 = arith.truncf %205 : vector<144x256xf32> to vector<144x256xbf16>
    %cst_124 = arith.constant dense<0.000000e+00> : vector<16x256xf32>
    %207 = tpu.matmul %178, %206, %cst_124 {dimension_numbers = #tpu.dot_dimension_numbers<[1], [0], [0], [1], [0, 0, 1, 1], [], []>} : vector<16x144xbf16>, vector<144x256xbf16>, vector<16x256xf32> -> vector<16x256xf32>
    %208 = vector.broadcast %180 : vector<16x1xf32> to vector<16x256xf32>
    %209 = arith.addf %207, %208 : vector<16x256xf32>
    %cst_125 = arith.constant 0.000000e+00 : f32
    %210 = vector.broadcast %cst_125 : f32 to vector<16x256xf32>
    %211 = arith.maximumf %209, %210 : vector<16x256xf32>
    %212 = arith.mulf %211, %211 : vector<16x256xf32>
    %213 = tpu.concatenate %211, %212 in 0 : vector<16x256xf32>, vector<16x256xf32> -> vector<32x256xf32>
    %cst_126 = arith.constant dense<0.000000e+00> : vector<32xf32>
    %214 = vector.multi_reduction <add>, %213, %cst_126 [1] : vector<32x256xf32> to vector<32xf32>
    %215 = vector.shape_cast %214 : vector<32xf32> to vector<32x1xf32>
    %cst_127 = arith.constant 3.906250e-03 : f32
    %216 = vector.broadcast %cst_127 : f32 to vector<32x1xf32>
    %217 = arith.mulf %215, %216 : vector<32x1xf32>
    %218 = vector.extract_strided_slice %217 {offsets = [0, 0], sizes = [16, 1], strides = [1, 1]} : vector<32x1xf32> to vector<16x1xf32>
    %219 = vector.extract_strided_slice %217 {offsets = [16, 0], sizes = [16, 1], strides = [1, 1]} : vector<32x1xf32> to vector<16x1xf32>
    %220 = arith.mulf %218, %218 : vector<16x1xf32>
    %221 = arith.subf %219, %220 : vector<16x1xf32>
    %cst_128 = arith.constant 0.000000e+00 : f32
    %222 = vector.broadcast %cst_128 : f32 to vector<16x1xf32>
    %223 = arith.maximumf %221, %222 : vector<16x1xf32>
    %cst_129 = arith.constant 9.99999974E-6 : f32
    %224 = vector.broadcast %cst_129 : f32 to vector<16x1xf32>
    %225 = arith.addf %223, %224 : vector<16x1xf32>
    %226 = math.rsqrt %225 : vector<16x1xf32>
    %227 = arith.mulf %182, %226 : vector<16x1xf32>
    %228 = arith.mulf %218, %227 : vector<16x1xf32>
    %229 = arith.subf %184, %228 : vector<16x1xf32>
    %230 = vector.broadcast %227 : vector<16x1xf32> to vector<16x256xf32>
    %231 = arith.mulf %211, %230 : vector<16x256xf32>
    %232 = vector.broadcast %229 : vector<16x1xf32> to vector<16x256xf32>
    %233 = arith.addf %231, %232 : vector<16x256xf32>
    %234 = arith.addf %175, %233 : vector<16x256xf32>
    %c48 = arith.constant 48 : index
    %c0_130 = arith.constant 0 : index
    %235 = vector.load %arg19[%c48, %c0_130] : memref<128x256xf32, #tpu.memory_space<vmem>>, vector<16x256xf32>
    tpu.vector_store %arg19[%c48, %c0_130], %234 {strides = array<i32>} : memref<128x256xf32, #tpu.memory_space<vmem>>, vector<16x256xf32>,
    %c3 = arith.constant 3 : index
    %c0_131 = arith.constant 0 : index
    %c0_132 = arith.constant 0 : index
    %236 = vector.load %arg5[%c3, %c0_131, %c0_132] : memref<7x16x144xbf16, #tpu.memory_space<vmem>>, vector<1x16x144xbf16>
    %237 = vector.shape_cast %236 : vector<1x16x144xbf16> to vector<16x144xbf16>
    %c3_133 = arith.constant 3 : index
    %c0_134 = arith.constant 0 : index
    %c0_135 = arith.constant 0 : index
    %238 = vector.load %arg6[%c3_133, %c0_134, %c0_135] : memref<7x16x1xf32, #tpu.memory_space<vmem>>, vector<1x16x1xf32>
    %239 = vector.shape_cast %238 : vector<1x16x1xf32> to vector<16x1xf32>
    %c3_136 = arith.constant 3 : index
    %c0_137 = arith.constant 0 : index
    %c0_138 = arith.constant 0 : index
    %240 = vector.load %arg7[%c3_136, %c0_137, %c0_138] : memref<7x16x1xf32, #tpu.memory_space<vmem>>, vector<1x16x1xf32>
    %241 = vector.shape_cast %240 : vector<1x16x1xf32> to vector<16x1xf32>
    %c3_139 = arith.constant 3 : index
    %c0_140 = arith.constant 0 : index
    %c0_141 = arith.constant 0 : index
    %242 = vector.load %arg8[%c3_139, %c0_140, %c0_141] : memref<7x16x1xf32, #tpu.memory_space<vmem>>, vector<1x16x1xf32>
    %243 = vector.shape_cast %242 : vector<1x16x1xf32> to vector<16x1xf32>
    %244 = vector.extract_strided_slice %234 {offsets = [0, 0], sizes = [16, 128], strides = [1, 1]} : vector<16x256xf32> to vector<16x128xf32>
    %c8_i32 = arith.constant 8 : i32
    %245 = tpu.dynamic_rotate %244 by %c8_i32 dim 1 : vector<16x128xf32>, i32 -> vector<16x128xf32>
    %c6_i32 = arith.constant 6 : i32
    %246 = tpu.dynamic_rotate %244 by %c6_i32 dim 1 : vector<16x128xf32>, i32 -> vector<16x128xf32>
    %c4_i32_142 = arith.constant 4 : i32
    %247 = tpu.dynamic_rotate %244 by %c4_i32_142 dim 1 : vector<16x128xf32>, i32 -> vector<16x128xf32>
    %c2_i32_143 = arith.constant 2 : i32
    %248 = tpu.dynamic_rotate %244 by %c2_i32_143 dim 1 : vector<16x128xf32>, i32 -> vector<16x128xf32>
    %c126_i32_144 = arith.constant 126 : i32
    %249 = tpu.dynamic_rotate %244 by %c126_i32_144 dim 1 : vector<16x128xf32>, i32 -> vector<16x128xf32>
    %c124_i32_145 = arith.constant 124 : i32
    %250 = tpu.dynamic_rotate %244 by %c124_i32_145 dim 1 : vector<16x128xf32>, i32 -> vector<16x128xf32>
    %c122_i32 = arith.constant 122 : i32
    %251 = tpu.dynamic_rotate %244 by %c122_i32 dim 1 : vector<16x128xf32>, i32 -> vector<16x128xf32>
    %c120_i32 = arith.constant 120 : i32
    %252 = tpu.dynamic_rotate %244 by %c120_i32 dim 1 : vector<16x128xf32>, i32 -> vector<16x128xf32>
    %253 = tpu.concatenate %245, %246, %247, %248, %244, %249, %250, %251, %252 in 0 : vector<16x128xf32>, vector<16x128xf32>, vector<16x128xf32>, vector<16x128xf32>, vector<16x128xf32>, vector<16x128xf32>, vector<16x128xf32>, vector<16x128xf32>, vector<16x128xf32> -> vector<144x128xf32>
    %254 = vector.extract_strided_slice %234 {offsets = [0, 128], sizes = [16, 128], strides = [1, 1]} : vector<16x256xf32> to vector<16x128xf32>
    %c8_i32_146 = arith.constant 8 : i32
    %255 = tpu.dynamic_rotate %254 by %c8_i32_146 dim 1 : vector<16x128xf32>, i32 -> vector<16x128xf32>
    %c6_i32_147 = arith.constant 6 : i32
    %256 = tpu.dynamic_rotate %254 by %c6_i32_147 dim 1 : vector<16x128xf32>, i32 -> vector<16x128xf32>
    %c4_i32_148 = arith.constant 4 : i32
    %257 = tpu.dynamic_rotate %254 by %c4_i32_148 dim 1 : vector<16x128xf32>, i32 -> vector<16x128xf32>
    %c2_i32_149 = arith.constant 2 : i32
    %258 = tpu.dynamic_rotate %254 by %c2_i32_149 dim 1 : vector<16x128xf32>, i32 -> vector<16x128xf32>
    %c126_i32_150 = arith.constant 126 : i32
    %259 = tpu.dynamic_rotate %254 by %c126_i32_150 dim 1 : vector<16x128xf32>, i32 -> vector<16x128xf32>
    %c124_i32_151 = arith.constant 124 : i32
    %260 = tpu.dynamic_rotate %254 by %c124_i32_151 dim 1 : vector<16x128xf32>, i32 -> vector<16x128xf32>
    %c122_i32_152 = arith.constant 122 : i32
    %261 = tpu.dynamic_rotate %254 by %c122_i32_152 dim 1 : vector<16x128xf32>, i32 -> vector<16x128xf32>
    %c120_i32_153 = arith.constant 120 : i32
    %262 = tpu.dynamic_rotate %254 by %c120_i32_153 dim 1 : vector<16x128xf32>, i32 -> vector<16x128xf32>
    %263 = tpu.concatenate %255, %256, %257, %258, %254, %259, %260, %261, %262 in 0 : vector<16x128xf32>, vector<16x128xf32>, vector<16x128xf32>, vector<16x128xf32>, vector<16x128xf32>, vector<16x128xf32>, vector<16x128xf32>, vector<16x128xf32>, vector<16x128xf32> -> vector<144x128xf32>
    %264 = tpu.concatenate %253, %263 in 1 : vector<144x128xf32>, vector<144x128xf32> -> vector<144x256xf32>
    %265 = arith.truncf %264 : vector<144x256xf32> to vector<144x256xbf16>
    %cst_154 = arith.constant dense<0.000000e+00> : vector<16x256xf32>
    %266 = tpu.matmul %237, %265, %cst_154 {dimension_numbers = #tpu.dot_dimension_numbers<[1], [0], [0], [1], [0, 0, 1, 1], [], []>} : vector<16x144xbf16>, vector<144x256xbf16>, vector<16x256xf32> -> vector<16x256xf32>
    %267 = vector.broadcast %239 : vector<16x1xf32> to vector<16x256xf32>
    %268 = arith.addf %266, %267 : vector<16x256xf32>
    %cst_155 = arith.constant 0.000000e+00 : f32
    %269 = vector.broadcast %cst_155 : f32 to vector<16x256xf32>
    %270 = arith.maximumf %268, %269 : vector<16x256xf32>
    %271 = arith.mulf %270, %270 : vector<16x256xf32>
    %272 = tpu.concatenate %270, %271 in 0 : vector<16x256xf32>, vector<16x256xf32> -> vector<32x256xf32>
    %cst_156 = arith.constant dense<0.000000e+00> : vector<32xf32>
    %273 = vector.multi_reduction <add>, %272, %cst_156 [1] : vector<32x256xf32> to vector<32xf32>
    %274 = vector.shape_cast %273 : vector<32xf32> to vector<32x1xf32>
    %cst_157 = arith.constant 3.906250e-03 : f32
    %275 = vector.broadcast %cst_157 : f32 to vector<32x1xf32>
    %276 = arith.mulf %274, %275 : vector<32x1xf32>
    %277 = vector.extract_strided_slice %276 {offsets = [0, 0], sizes = [16, 1], strides = [1, 1]} : vector<32x1xf32> to vector<16x1xf32>
    %278 = vector.extract_strided_slice %276 {offsets = [16, 0], sizes = [16, 1], strides = [1, 1]} : vector<32x1xf32> to vector<16x1xf32>
    %279 = arith.mulf %277, %277 : vector<16x1xf32>
    %280 = arith.subf %278, %279 : vector<16x1xf32>
    %cst_158 = arith.constant 0.000000e+00 : f32
    %281 = vector.broadcast %cst_158 : f32 to vector<16x1xf32>
    %282 = arith.maximumf %280, %281 : vector<16x1xf32>
    %cst_159 = arith.constant 9.99999974E-6 : f32
    %283 = vector.broadcast %cst_159 : f32 to vector<16x1xf32>
    %284 = arith.addf %282, %283 : vector<16x1xf32>
    %285 = math.rsqrt %284 : vector<16x1xf32>
    %286 = arith.mulf %241, %285 : vector<16x1xf32>
    %287 = arith.mulf %277, %286 : vector<16x1xf32>
    %288 = arith.subf %243, %287 : vector<16x1xf32>
    %289 = vector.broadcast %286 : vector<16x1xf32> to vector<16x256xf32>
    %290 = arith.mulf %270, %289 : vector<16x256xf32>
    %291 = vector.broadcast %288 : vector<16x1xf32> to vector<16x256xf32>
    %292 = arith.addf %290, %291 : vector<16x256xf32>
    %293 = arith.addf %234, %292 : vector<16x256xf32>
    %c64 = arith.constant 64 : index
    %c0_160 = arith.constant 0 : index
    %294 = vector.load %arg19[%c64, %c0_160] : memref<128x256xf32, #tpu.memory_space<vmem>>, vector<16x256xf32>
    tpu.vector_store %arg19[%c64, %c0_160], %293 {strides = array<i32>} : memref<128x256xf32, #tpu.memory_space<vmem>>, vector<16x256xf32>,
    %c4 = arith.constant 4 : index
    %c0_161 = arith.constant 0 : index
    %c0_162 = arith.constant 0 : index
    %295 = vector.load %arg5[%c4, %c0_161, %c0_162] : memref<7x16x144xbf16, #tpu.memory_space<vmem>>, vector<1x16x144xbf16>
    %296 = vector.shape_cast %295 : vector<1x16x144xbf16> to vector<16x144xbf16>
    %c4_163 = arith.constant 4 : index
    %c0_164 = arith.constant 0 : index
    %c0_165 = arith.constant 0 : index
    %297 = vector.load %arg6[%c4_163, %c0_164, %c0_165] : memref<7x16x1xf32, #tpu.memory_space<vmem>>, vector<1x16x1xf32>
    %298 = vector.shape_cast %297 : vector<1x16x1xf32> to vector<16x1xf32>
    %c4_166 = arith.constant 4 : index
    %c0_167 = arith.constant 0 : index
    %c0_168 = arith.constant 0 : index
    %299 = vector.load %arg7[%c4_166, %c0_167, %c0_168] : memref<7x16x1xf32, #tpu.memory_space<vmem>>, vector<1x16x1xf32>
    %300 = vector.shape_cast %299 : vector<1x16x1xf32> to vector<16x1xf32>
    %c4_169 = arith.constant 4 : index
    %c0_170 = arith.constant 0 : index
    %c0_171 = arith.constant 0 : index
    %301 = vector.load %arg8[%c4_169, %c0_170, %c0_171] : memref<7x16x1xf32, #tpu.memory_space<vmem>>, vector<1x16x1xf32>
    %302 = vector.shape_cast %301 : vector<1x16x1xf32> to vector<16x1xf32>
    %303 = vector.extract_strided_slice %293 {offsets = [0, 0], sizes = [16, 128], strides = [1, 1]} : vector<16x256xf32> to vector<16x128xf32>
    %c8_i32_172 = arith.constant 8 : i32
    %304 = tpu.dynamic_rotate %303 by %c8_i32_172 dim 1 : vector<16x128xf32>, i32 -> vector<16x128xf32>
    %c6_i32_173 = arith.constant 6 : i32
    %305 = tpu.dynamic_rotate %303 by %c6_i32_173 dim 1 : vector<16x128xf32>, i32 -> vector<16x128xf32>
    %c4_i32_174 = arith.constant 4 : i32
    %306 = tpu.dynamic_rotate %303 by %c4_i32_174 dim 1 : vector<16x128xf32>, i32 -> vector<16x128xf32>
    %c2_i32_175 = arith.constant 2 : i32
    %307 = tpu.dynamic_rotate %303 by %c2_i32_175 dim 1 : vector<16x128xf32>, i32 -> vector<16x128xf32>
    %c126_i32_176 = arith.constant 126 : i32
    %308 = tpu.dynamic_rotate %303 by %c126_i32_176 dim 1 : vector<16x128xf32>, i32 -> vector<16x128xf32>
    %c124_i32_177 = arith.constant 124 : i32
    %309 = tpu.dynamic_rotate %303 by %c124_i32_177 dim 1 : vector<16x128xf32>, i32 -> vector<16x128xf32>
    %c122_i32_178 = arith.constant 122 : i32
    %310 = tpu.dynamic_rotate %303 by %c122_i32_178 dim 1 : vector<16x128xf32>, i32 -> vector<16x128xf32>
    %c120_i32_179 = arith.constant 120 : i32
    %311 = tpu.dynamic_rotate %303 by %c120_i32_179 dim 1 : vector<16x128xf32>, i32 -> vector<16x128xf32>
    %312 = tpu.concatenate %304, %305, %306, %307, %303, %308, %309, %310, %311 in 0 : vector<16x128xf32>, vector<16x128xf32>, vector<16x128xf32>, vector<16x128xf32>, vector<16x128xf32>, vector<16x128xf32>, vector<16x128xf32>, vector<16x128xf32>, vector<16x128xf32> -> vector<144x128xf32>
    %313 = vector.extract_strided_slice %293 {offsets = [0, 128], sizes = [16, 128], strides = [1, 1]} : vector<16x256xf32> to vector<16x128xf32>
    %c8_i32_180 = arith.constant 8 : i32
    %314 = tpu.dynamic_rotate %313 by %c8_i32_180 dim 1 : vector<16x128xf32>, i32 -> vector<16x128xf32>
    %c6_i32_181 = arith.constant 6 : i32
    %315 = tpu.dynamic_rotate %313 by %c6_i32_181 dim 1 : vector<16x128xf32>, i32 -> vector<16x128xf32>
    %c4_i32_182 = arith.constant 4 : i32
    %316 = tpu.dynamic_rotate %313 by %c4_i32_182 dim 1 : vector<16x128xf32>, i32 -> vector<16x128xf32>
    %c2_i32_183 = arith.constant 2 : i32
    %317 = tpu.dynamic_rotate %313 by %c2_i32_183 dim 1 : vector<16x128xf32>, i32 -> vector<16x128xf32>
    %c126_i32_184 = arith.constant 126 : i32
    %318 = tpu.dynamic_rotate %313 by %c126_i32_184 dim 1 : vector<16x128xf32>, i32 -> vector<16x128xf32>
    %c124_i32_185 = arith.constant 124 : i32
    %319 = tpu.dynamic_rotate %313 by %c124_i32_185 dim 1 : vector<16x128xf32>, i32 -> vector<16x128xf32>
    %c122_i32_186 = arith.constant 122 : i32
    %320 = tpu.dynamic_rotate %313 by %c122_i32_186 dim 1 : vector<16x128xf32>, i32 -> vector<16x128xf32>
    %c120_i32_187 = arith.constant 120 : i32
    %321 = tpu.dynamic_rotate %313 by %c120_i32_187 dim 1 : vector<16x128xf32>, i32 -> vector<16x128xf32>
    %322 = tpu.concatenate %314, %315, %316, %317, %313, %318, %319, %320, %321 in 0 : vector<16x128xf32>, vector<16x128xf32>, vector<16x128xf32>, vector<16x128xf32>, vector<16x128xf32>, vector<16x128xf32>, vector<16x128xf32>, vector<16x128xf32>, vector<16x128xf32> -> vector<144x128xf32>
    %323 = tpu.concatenate %312, %322 in 1 : vector<144x128xf32>, vector<144x128xf32> -> vector<144x256xf32>
    %324 = arith.truncf %323 : vector<144x256xf32> to vector<144x256xbf16>
    %cst_188 = arith.constant dense<0.000000e+00> : vector<16x256xf32>
    %325 = tpu.matmul %296, %324, %cst_188 {dimension_numbers = #tpu.dot_dimension_numbers<[1], [0], [0], [1], [0, 0, 1, 1], [], []>} : vector<16x144xbf16>, vector<144x256xbf16>, vector<16x256xf32> -> vector<16x256xf32>
    %326 = vector.broadcast %298 : vector<16x1xf32> to vector<16x256xf32>
    %327 = arith.addf %325, %326 : vector<16x256xf32>
    %cst_189 = arith.constant 0.000000e+00 : f32
    %328 = vector.broadcast %cst_189 : f32 to vector<16x256xf32>
    %329 = arith.maximumf %327, %328 : vector<16x256xf32>
    %330 = arith.mulf %329, %329 : vector<16x256xf32>
    %331 = tpu.concatenate %329, %330 in 0 : vector<16x256xf32>, vector<16x256xf32> -> vector<32x256xf32>
    %cst_190 = arith.constant dense<0.000000e+00> : vector<32xf32>
    %332 = vector.multi_reduction <add>, %331, %cst_190 [1] : vector<32x256xf32> to vector<32xf32>
    %333 = vector.shape_cast %332 : vector<32xf32> to vector<32x1xf32>
    %cst_191 = arith.constant 3.906250e-03 : f32
    %334 = vector.broadcast %cst_191 : f32 to vector<32x1xf32>
    %335 = arith.mulf %333, %334 : vector<32x1xf32>
    %336 = vector.extract_strided_slice %335 {offsets = [0, 0], sizes = [16, 1], strides = [1, 1]} : vector<32x1xf32> to vector<16x1xf32>
    %337 = vector.extract_strided_slice %335 {offsets = [16, 0], sizes = [16, 1], strides = [1, 1]} : vector<32x1xf32> to vector<16x1xf32>
    %338 = arith.mulf %336, %336 : vector<16x1xf32>
    %339 = arith.subf %337, %338 : vector<16x1xf32>
    %cst_192 = arith.constant 0.000000e+00 : f32
    %340 = vector.broadcast %cst_192 : f32 to vector<16x1xf32>
    %341 = arith.maximumf %339, %340 : vector<16x1xf32>
    %cst_193 = arith.constant 9.99999974E-6 : f32
    %342 = vector.broadcast %cst_193 : f32 to vector<16x1xf32>
    %343 = arith.addf %341, %342 : vector<16x1xf32>
    %344 = math.rsqrt %343 : vector<16x1xf32>
    %345 = arith.mulf %300, %344 : vector<16x1xf32>
    %346 = arith.mulf %336, %345 : vector<16x1xf32>
    %347 = arith.subf %302, %346 : vector<16x1xf32>
    %348 = vector.broadcast %345 : vector<16x1xf32> to vector<16x256xf32>
    %349 = arith.mulf %329, %348 : vector<16x256xf32>
    %350 = vector.broadcast %347 : vector<16x1xf32> to vector<16x256xf32>
    %351 = arith.addf %349, %350 : vector<16x256xf32>
    %352 = arith.addf %293, %351 : vector<16x256xf32>
    %c80 = arith.constant 80 : index
    %c0_194 = arith.constant 0 : index
    %353 = vector.load %arg19[%c80, %c0_194] : memref<128x256xf32, #tpu.memory_space<vmem>>, vector<16x256xf32>
    tpu.vector_store %arg19[%c80, %c0_194], %352 {strides = array<i32>} : memref<128x256xf32, #tpu.memory_space<vmem>>, vector<16x256xf32>,
    %c5 = arith.constant 5 : index
    %c0_195 = arith.constant 0 : index
    %c0_196 = arith.constant 0 : index
    %354 = vector.load %arg5[%c5, %c0_195, %c0_196] : memref<7x16x144xbf16, #tpu.memory_space<vmem>>, vector<1x16x144xbf16>
    %355 = vector.shape_cast %354 : vector<1x16x144xbf16> to vector<16x144xbf16>
    %c5_197 = arith.constant 5 : index
    %c0_198 = arith.constant 0 : index
    %c0_199 = arith.constant 0 : index
    %356 = vector.load %arg6[%c5_197, %c0_198, %c0_199] : memref<7x16x1xf32, #tpu.memory_space<vmem>>, vector<1x16x1xf32>
    %357 = vector.shape_cast %356 : vector<1x16x1xf32> to vector<16x1xf32>
    %c5_200 = arith.constant 5 : index
    %c0_201 = arith.constant 0 : index
    %c0_202 = arith.constant 0 : index
    %358 = vector.load %arg7[%c5_200, %c0_201, %c0_202] : memref<7x16x1xf32, #tpu.memory_space<vmem>>, vector<1x16x1xf32>
    %359 = vector.shape_cast %358 : vector<1x16x1xf32> to vector<16x1xf32>
    %c5_203 = arith.constant 5 : index
    %c0_204 = arith.constant 0 : index
    %c0_205 = arith.constant 0 : index
    %360 = vector.load %arg8[%c5_203, %c0_204, %c0_205] : memref<7x16x1xf32, #tpu.memory_space<vmem>>, vector<1x16x1xf32>
    %361 = vector.shape_cast %360 : vector<1x16x1xf32> to vector<16x1xf32>
    %362 = vector.extract_strided_slice %352 {offsets = [0, 0], sizes = [16, 128], strides = [1, 1]} : vector<16x256xf32> to vector<16x128xf32>
    %c16_i32 = arith.constant 16 : i32
    %363 = tpu.dynamic_rotate %362 by %c16_i32 dim 1 : vector<16x128xf32>, i32 -> vector<16x128xf32>
    %c12_i32 = arith.constant 12 : i32
    %364 = tpu.dynamic_rotate %362 by %c12_i32 dim 1 : vector<16x128xf32>, i32 -> vector<16x128xf32>
    %c8_i32_206 = arith.constant 8 : i32
    %365 = tpu.dynamic_rotate %362 by %c8_i32_206 dim 1 : vector<16x128xf32>, i32 -> vector<16x128xf32>
    %c4_i32_207 = arith.constant 4 : i32
    %366 = tpu.dynamic_rotate %362 by %c4_i32_207 dim 1 : vector<16x128xf32>, i32 -> vector<16x128xf32>
    %c124_i32_208 = arith.constant 124 : i32
    %367 = tpu.dynamic_rotate %362 by %c124_i32_208 dim 1 : vector<16x128xf32>, i32 -> vector<16x128xf32>
    %c120_i32_209 = arith.constant 120 : i32
    %368 = tpu.dynamic_rotate %362 by %c120_i32_209 dim 1 : vector<16x128xf32>, i32 -> vector<16x128xf32>
    %c116_i32 = arith.constant 116 : i32
    %369 = tpu.dynamic_rotate %362 by %c116_i32 dim 1 : vector<16x128xf32>, i32 -> vector<16x128xf32>
    %c112_i32 = arith.constant 112 : i32
    %370 = tpu.dynamic_rotate %362 by %c112_i32 dim 1 : vector<16x128xf32>, i32 -> vector<16x128xf32>
    %371 = tpu.concatenate %363, %364, %365, %366, %362, %367, %368, %369, %370 in 0 : vector<16x128xf32>, vector<16x128xf32>, vector<16x128xf32>, vector<16x128xf32>, vector<16x128xf32>, vector<16x128xf32>, vector<16x128xf32>, vector<16x128xf32>, vector<16x128xf32> -> vector<144x128xf32>
    %372 = vector.extract_strided_slice %352 {offsets = [0, 128], sizes = [16, 128], strides = [1, 1]} : vector<16x256xf32> to vector<16x128xf32>
    %c16_i32_210 = arith.constant 16 : i32
    %373 = tpu.dynamic_rotate %372 by %c16_i32_210 dim 1 : vector<16x128xf32>, i32 -> vector<16x128xf32>
    %c12_i32_211 = arith.constant 12 : i32
    %374 = tpu.dynamic_rotate %372 by %c12_i32_211 dim 1 : vector<16x128xf32>, i32 -> vector<16x128xf32>
    %c8_i32_212 = arith.constant 8 : i32
    %375 = tpu.dynamic_rotate %372 by %c8_i32_212 dim 1 : vector<16x128xf32>, i32 -> vector<16x128xf32>
    %c4_i32_213 = arith.constant 4 : i32
    %376 = tpu.dynamic_rotate %372 by %c4_i32_213 dim 1 : vector<16x128xf32>, i32 -> vector<16x128xf32>
    %c124_i32_214 = arith.constant 124 : i32
    %377 = tpu.dynamic_rotate %372 by %c124_i32_214 dim 1 : vector<16x128xf32>, i32 -> vector<16x128xf32>
    %c120_i32_215 = arith.constant 120 : i32
    %378 = tpu.dynamic_rotate %372 by %c120_i32_215 dim 1 : vector<16x128xf32>, i32 -> vector<16x128xf32>
    %c116_i32_216 = arith.constant 116 : i32
    %379 = tpu.dynamic_rotate %372 by %c116_i32_216 dim 1 : vector<16x128xf32>, i32 -> vector<16x128xf32>
    %c112_i32_217 = arith.constant 112 : i32
    %380 = tpu.dynamic_rotate %372 by %c112_i32_217 dim 1 : vector<16x128xf32>, i32 -> vector<16x128xf32>
    %381 = tpu.concatenate %373, %374, %375, %376, %372, %377, %378, %379, %380 in 0 : vector<16x128xf32>, vector<16x128xf32>, vector<16x128xf32>, vector<16x128xf32>, vector<16x128xf32>, vector<16x128xf32>, vector<16x128xf32>, vector<16x128xf32>, vector<16x128xf32> -> vector<144x128xf32>
    %382 = tpu.concatenate %371, %381 in 1 : vector<144x128xf32>, vector<144x128xf32> -> vector<144x256xf32>
    %383 = arith.truncf %382 : vector<144x256xf32> to vector<144x256xbf16>
    %cst_218 = arith.constant dense<0.000000e+00> : vector<16x256xf32>
    %384 = tpu.matmul %355, %383, %cst_218 {dimension_numbers = #tpu.dot_dimension_numbers<[1], [0], [0], [1], [0, 0, 1, 1], [], []>} : vector<16x144xbf16>, vector<144x256xbf16>, vector<16x256xf32> -> vector<16x256xf32>
    %385 = vector.broadcast %357 : vector<16x1xf32> to vector<16x256xf32>
    %386 = arith.addf %384, %385 : vector<16x256xf32>
    %cst_219 = arith.constant 0.000000e+00 : f32
    %387 = vector.broadcast %cst_219 : f32 to vector<16x256xf32>
    %388 = arith.maximumf %386, %387 : vector<16x256xf32>
    %389 = arith.mulf %388, %388 : vector<16x256xf32>
    %390 = tpu.concatenate %388, %389 in 0 : vector<16x256xf32>, vector<16x256xf32> -> vector<32x256xf32>
    %cst_220 = arith.constant dense<0.000000e+00> : vector<32xf32>
    %391 = vector.multi_reduction <add>, %390, %cst_220 [1] : vector<32x256xf32> to vector<32xf32>
    %392 = vector.shape_cast %391 : vector<32xf32> to vector<32x1xf32>
    %cst_221 = arith.constant 3.906250e-03 : f32
    %393 = vector.broadcast %cst_221 : f32 to vector<32x1xf32>
    %394 = arith.mulf %392, %393 : vector<32x1xf32>
    %395 = vector.extract_strided_slice %394 {offsets = [0, 0], sizes = [16, 1], strides = [1, 1]} : vector<32x1xf32> to vector<16x1xf32>
    %396 = vector.extract_strided_slice %394 {offsets = [16, 0], sizes = [16, 1], strides = [1, 1]} : vector<32x1xf32> to vector<16x1xf32>
    %397 = arith.mulf %395, %395 : vector<16x1xf32>
    %398 = arith.subf %396, %397 : vector<16x1xf32>
    %cst_222 = arith.constant 0.000000e+00 : f32
    %399 = vector.broadcast %cst_222 : f32 to vector<16x1xf32>
    %400 = arith.maximumf %398, %399 : vector<16x1xf32>
    %cst_223 = arith.constant 9.99999974E-6 : f32
    %401 = vector.broadcast %cst_223 : f32 to vector<16x1xf32>
    %402 = arith.addf %400, %401 : vector<16x1xf32>
    %403 = math.rsqrt %402 : vector<16x1xf32>
    %404 = arith.mulf %359, %403 : vector<16x1xf32>
    %405 = arith.mulf %395, %404 : vector<16x1xf32>
    %406 = arith.subf %361, %405 : vector<16x1xf32>
    %407 = vector.broadcast %404 : vector<16x1xf32> to vector<16x256xf32>
    %408 = arith.mulf %388, %407 : vector<16x256xf32>
    %409 = vector.broadcast %406 : vector<16x1xf32> to vector<16x256xf32>
    %410 = arith.addf %408, %409 : vector<16x256xf32>
    %411 = arith.addf %352, %410 : vector<16x256xf32>
    %c96 = arith.constant 96 : index
    %c0_224 = arith.constant 0 : index
    %412 = vector.load %arg19[%c96, %c0_224] : memref<128x256xf32, #tpu.memory_space<vmem>>, vector<16x256xf32>
    tpu.vector_store %arg19[%c96, %c0_224], %411 {strides = array<i32>} : memref<128x256xf32, #tpu.memory_space<vmem>>, vector<16x256xf32>,
    %c6 = arith.constant 6 : index
    %c0_225 = arith.constant 0 : index
    %c0_226 = arith.constant 0 : index
    %413 = vector.load %arg5[%c6, %c0_225, %c0_226] : memref<7x16x144xbf16, #tpu.memory_space<vmem>>, vector<1x16x144xbf16>
    %414 = vector.shape_cast %413 : vector<1x16x144xbf16> to vector<16x144xbf16>
    %c6_227 = arith.constant 6 : index
    %c0_228 = arith.constant 0 : index
    %c0_229 = arith.constant 0 : index
    %415 = vector.load %arg6[%c6_227, %c0_228, %c0_229] : memref<7x16x1xf32, #tpu.memory_space<vmem>>, vector<1x16x1xf32>
    %416 = vector.shape_cast %415 : vector<1x16x1xf32> to vector<16x1xf32>
    %c6_230 = arith.constant 6 : index
    %c0_231 = arith.constant 0 : index
    %c0_232 = arith.constant 0 : index
    %417 = vector.load %arg7[%c6_230, %c0_231, %c0_232] : memref<7x16x1xf32, #tpu.memory_space<vmem>>, vector<1x16x1xf32>
    %418 = vector.shape_cast %417 : vector<1x16x1xf32> to vector<16x1xf32>
    %c6_233 = arith.constant 6 : index
    %c0_234 = arith.constant 0 : index
    %c0_235 = arith.constant 0 : index
    %419 = vector.load %arg8[%c6_233, %c0_234, %c0_235] : memref<7x16x1xf32, #tpu.memory_space<vmem>>, vector<1x16x1xf32>
    %420 = vector.shape_cast %419 : vector<1x16x1xf32> to vector<16x1xf32>
    %421 = vector.extract_strided_slice %411 {offsets = [0, 0], sizes = [16, 128], strides = [1, 1]} : vector<16x256xf32> to vector<16x128xf32>
    %c16_i32_236 = arith.constant 16 : i32
    %422 = tpu.dynamic_rotate %421 by %c16_i32_236 dim 1 : vector<16x128xf32>, i32 -> vector<16x128xf32>
    %c12_i32_237 = arith.constant 12 : i32
    %423 = tpu.dynamic_rotate %421 by %c12_i32_237 dim 1 : vector<16x128xf32>, i32 -> vector<16x128xf32>
    %c8_i32_238 = arith.constant 8 : i32
    %424 = tpu.dynamic_rotate %421 by %c8_i32_238 dim 1 : vector<16x128xf32>, i32 -> vector<16x128xf32>
    %c4_i32_239 = arith.constant 4 : i32
    %425 = tpu.dynamic_rotate %421 by %c4_i32_239 dim 1 : vector<16x128xf32>, i32 -> vector<16x128xf32>
    %c124_i32_240 = arith.constant 124 : i32
    %426 = tpu.dynamic_rotate %421 by %c124_i32_240 dim 1 : vector<16x128xf32>, i32 -> vector<16x128xf32>
    %c120_i32_241 = arith.constant 120 : i32
    %427 = tpu.dynamic_rotate %421 by %c120_i32_241 dim 1 : vector<16x128xf32>, i32 -> vector<16x128xf32>
    %c116_i32_242 = arith.constant 116 : i32
    %428 = tpu.dynamic_rotate %421 by %c116_i32_242 dim 1 : vector<16x128xf32>, i32 -> vector<16x128xf32>
    %c112_i32_243 = arith.constant 112 : i32
    %429 = tpu.dynamic_rotate %421 by %c112_i32_243 dim 1 : vector<16x128xf32>, i32 -> vector<16x128xf32>
    %430 = tpu.concatenate %422, %423, %424, %425, %421, %426, %427, %428, %429 in 0 : vector<16x128xf32>, vector<16x128xf32>, vector<16x128xf32>, vector<16x128xf32>, vector<16x128xf32>, vector<16x128xf32>, vector<16x128xf32>, vector<16x128xf32>, vector<16x128xf32> -> vector<144x128xf32>
    %431 = vector.extract_strided_slice %411 {offsets = [0, 128], sizes = [16, 128], strides = [1, 1]} : vector<16x256xf32> to vector<16x128xf32>
    %c16_i32_244 = arith.constant 16 : i32
    %432 = tpu.dynamic_rotate %431 by %c16_i32_244 dim 1 : vector<16x128xf32>, i32 -> vector<16x128xf32>
    %c12_i32_245 = arith.constant 12 : i32
    %433 = tpu.dynamic_rotate %431 by %c12_i32_245 dim 1 : vector<16x128xf32>, i32 -> vector<16x128xf32>
    %c8_i32_246 = arith.constant 8 : i32
    %434 = tpu.dynamic_rotate %431 by %c8_i32_246 dim 1 : vector<16x128xf32>, i32 -> vector<16x128xf32>
    %c4_i32_247 = arith.constant 4 : i32
    %435 = tpu.dynamic_rotate %431 by %c4_i32_247 dim 1 : vector<16x128xf32>, i32 -> vector<16x128xf32>
    %c124_i32_248 = arith.constant 124 : i32
    %436 = tpu.dynamic_rotate %431 by %c124_i32_248 dim 1 : vector<16x128xf32>, i32 -> vector<16x128xf32>
    %c120_i32_249 = arith.constant 120 : i32
    %437 = tpu.dynamic_rotate %431 by %c120_i32_249 dim 1 : vector<16x128xf32>, i32 -> vector<16x128xf32>
    %c116_i32_250 = arith.constant 116 : i32
    %438 = tpu.dynamic_rotate %431 by %c116_i32_250 dim 1 : vector<16x128xf32>, i32 -> vector<16x128xf32>
    %c112_i32_251 = arith.constant 112 : i32
    %439 = tpu.dynamic_rotate %431 by %c112_i32_251 dim 1 : vector<16x128xf32>, i32 -> vector<16x128xf32>
    %440 = tpu.concatenate %432, %433, %434, %435, %431, %436, %437, %438, %439 in 0 : vector<16x128xf32>, vector<16x128xf32>, vector<16x128xf32>, vector<16x128xf32>, vector<16x128xf32>, vector<16x128xf32>, vector<16x128xf32>, vector<16x128xf32>, vector<16x128xf32> -> vector<144x128xf32>
    %441 = tpu.concatenate %430, %440 in 1 : vector<144x128xf32>, vector<144x128xf32> -> vector<144x256xf32>
    %442 = arith.truncf %441 : vector<144x256xf32> to vector<144x256xbf16>
    %cst_252 = arith.constant dense<0.000000e+00> : vector<16x256xf32>
    %443 = tpu.matmul %414, %442, %cst_252 {dimension_numbers = #tpu.dot_dimension_numbers<[1], [0], [0], [1], [0, 0, 1, 1], [], []>} : vector<16x144xbf16>, vector<144x256xbf16>, vector<16x256xf32> -> vector<16x256xf32>
    %444 = vector.broadcast %416 : vector<16x1xf32> to vector<16x256xf32>
    %445 = arith.addf %443, %444 : vector<16x256xf32>
    %cst_253 = arith.constant 0.000000e+00 : f32
    %446 = vector.broadcast %cst_253 : f32 to vector<16x256xf32>
    %447 = arith.maximumf %445, %446 : vector<16x256xf32>
    %448 = arith.mulf %447, %447 : vector<16x256xf32>
    %449 = tpu.concatenate %447, %448 in 0 : vector<16x256xf32>, vector<16x256xf32> -> vector<32x256xf32>
    %cst_254 = arith.constant dense<0.000000e+00> : vector<32xf32>
    %450 = vector.multi_reduction <add>, %449, %cst_254 [1] : vector<32x256xf32> to vector<32xf32>
    %451 = vector.shape_cast %450 : vector<32xf32> to vector<32x1xf32>
    %cst_255 = arith.constant 3.906250e-03 : f32
    %452 = vector.broadcast %cst_255 : f32 to vector<32x1xf32>
    %453 = arith.mulf %451, %452 : vector<32x1xf32>
    %454 = vector.extract_strided_slice %453 {offsets = [0, 0], sizes = [16, 1], strides = [1, 1]} : vector<32x1xf32> to vector<16x1xf32>
    %455 = vector.extract_strided_slice %453 {offsets = [16, 0], sizes = [16, 1], strides = [1, 1]} : vector<32x1xf32> to vector<16x1xf32>
    %456 = arith.mulf %454, %454 : vector<16x1xf32>
    %457 = arith.subf %455, %456 : vector<16x1xf32>
    %cst_256 = arith.constant 0.000000e+00 : f32
    %458 = vector.broadcast %cst_256 : f32 to vector<16x1xf32>
    %459 = arith.maximumf %457, %458 : vector<16x1xf32>
    %cst_257 = arith.constant 9.99999974E-6 : f32
    %460 = vector.broadcast %cst_257 : f32 to vector<16x1xf32>
    %461 = arith.addf %459, %460 : vector<16x1xf32>
    %462 = math.rsqrt %461 : vector<16x1xf32>
    %463 = arith.mulf %418, %462 : vector<16x1xf32>
    %464 = arith.mulf %454, %463 : vector<16x1xf32>
    %465 = arith.subf %420, %464 : vector<16x1xf32>
    %466 = vector.broadcast %463 : vector<16x1xf32> to vector<16x256xf32>
    %467 = arith.mulf %447, %466 : vector<16x256xf32>
    %468 = vector.broadcast %465 : vector<16x1xf32> to vector<16x256xf32>
    %469 = arith.addf %467, %468 : vector<16x256xf32>
    %470 = arith.addf %411, %469 : vector<16x256xf32>
    %c112 = arith.constant 112 : index
    %c0_258 = arith.constant 0 : index
    %471 = vector.load %arg19[%c112, %c0_258] : memref<128x256xf32, #tpu.memory_space<vmem>>, vector<16x256xf32>
    tpu.vector_store %arg19[%c112, %c0_258], %470 {strides = array<i32>} : memref<128x256xf32, #tpu.memory_space<vmem>>, vector<16x256xf32>,
    %c0_259 = arith.constant 0 : index
    %c0_260 = arith.constant 0 : index
    %472 = vector.load %arg19[%c0_259, %c0_260] : memref<128x256xf32, #tpu.memory_space<vmem>>, vector<128x256xf32>
    %473 = arith.truncf %472 : vector<128x256xf32> to vector<128x256xbf16>
    %c0_261 = arith.constant 0 : index
    %c0_262 = arith.constant 0 : index
    %474 = vector.load %arg9[%c0_261, %c0_262] : memref<256x128xbf16, #tpu.memory_space<vmem>>, vector<256x128xbf16>
    %cst_263 = arith.constant dense<0.000000e+00> : vector<256x256xf32>
    %475 = tpu.matmul %474, %473, %cst_263 {dimension_numbers = #tpu.dot_dimension_numbers<[1], [0], [0], [1], [0, 0, 1, 1], [], []>} : vector<256x128xbf16>, vector<128x256xbf16>, vector<256x256xf32> -> vector<256x256xf32>
    %c0_264 = arith.constant 0 : index
    %c0_265 = arith.constant 0 : index
    %476 = vector.load %arg10[%c0_264, %c0_265] : memref<256x1xf32, #tpu.memory_space<vmem>>, vector<256x1xf32>
    %477 = vector.broadcast %476 : vector<256x1xf32> to vector<256x256xf32>
    %478 = arith.addf %475, %477 : vector<256x256xf32>
    %479 = vector.extract_strided_slice %478 {offsets = [0, 0], sizes = [256, 128], strides = [1, 1]} : vector<256x256xf32> to vector<256x128xf32>
    %cst_266 = arith.constant dense<0xFF800000> : vector<256xf32>
    %480 = vector.multi_reduction <maximumf>, %479, %cst_266 [1] : vector<256x128xf32> to vector<256xf32>
    %481 = vector.shape_cast %480 : vector<256xf32> to vector<256x1xf32>
    %482 = vector.extract_strided_slice %478 {offsets = [0, 128], sizes = [256, 128], strides = [1, 1]} : vector<256x256xf32> to vector<256x128xf32>
    %cst_267 = arith.constant dense<0xFF800000> : vector<256xf32>
    %483 = vector.multi_reduction <maximumf>, %482, %cst_267 [1] : vector<256x128xf32> to vector<256xf32>
    %484 = vector.shape_cast %483 : vector<256xf32> to vector<256x1xf32>
    %485 = tpu.concatenate %481, %484 in 1 : vector<256x1xf32>, vector<256x1xf32> -> vector<256x2xf32>
    %c0_268 = arith.constant 0 : index
    %c0_269 = arith.constant 0 : index
    %486 = vector.load %arg11[%c0_268, %c0_269] : memref<256x256xbf16, #tpu.memory_space<vmem>>, vector<256x256xbf16>
    %487 = arith.truncf %485 : vector<256x2xf32> to vector<256x2xbf16>
    %cst_270 = arith.constant dense<0.000000e+00> : vector<256x2xf32>
    %488 = tpu.matmul %486, %487, %cst_270 {dimension_numbers = #tpu.dot_dimension_numbers<[1], [0], [0], [1], [0, 0, 1, 1], [], []>} : vector<256x256xbf16>, vector<256x2xbf16>, vector<256x2xf32> -> vector<256x2xf32>
    %489 = vector.extract_strided_slice %488 {offsets = [0, 0], sizes = [256, 1], strides = [1, 1]} : vector<256x2xf32> to vector<256x1xf32>
    %490 = vector.shape_cast %489 : vector<256x1xf32> to vector<256x1xf32>
    %491 = vector.broadcast %490 : vector<256x1xf32> to vector<256x128xf32>
    %492 = vector.extract_strided_slice %488 {offsets = [0, 1], sizes = [256, 1], strides = [1, 1]} : vector<256x2xf32> to vector<256x1xf32>
    %493 = vector.shape_cast %492 : vector<256x1xf32> to vector<256x1xf32>
    %494 = vector.broadcast %493 : vector<256x1xf32> to vector<256x128xf32>
    %495 = tpu.concatenate %491, %494 in 1 : vector<256x128xf32>, vector<256x128xf32> -> vector<256x256xf32>
    %c0_271 = arith.constant 0 : index
    %c0_272 = arith.constant 0 : index
    %496 = vector.load %arg12[%c0_271, %c0_272] : memref<256x128xbf16, #tpu.memory_space<vmem>>, vector<256x128xbf16>
    %cst_273 = arith.constant dense<0.000000e+00> : vector<256x256xf32>
    %497 = tpu.matmul %496, %473, %cst_273 {dimension_numbers = #tpu.dot_dimension_numbers<[1], [0], [0], [1], [0, 0, 1, 1], [], []>} : vector<256x128xbf16>, vector<128x256xbf16>, vector<256x256xf32> -> vector<256x256xf32>
    %498 = arith.addf %497, %495 : vector<256x256xf32>
    %c0_274 = arith.constant 0 : index
    %c0_275 = arith.constant 0 : index
    %499 = vector.load %arg13[%c0_274, %c0_275] : memref<256x1xf32, #tpu.memory_space<vmem>>, vector<256x1xf32>
    %500 = vector.broadcast %499 : vector<256x1xf32> to vector<256x256xf32>
    %501 = arith.addf %498, %500 : vector<256x256xf32>
    %cst_276 = arith.constant 0.000000e+00 : f32
    %502 = vector.broadcast %cst_276 : f32 to vector<256x256xf32>
    %503 = arith.maximumf %501, %502 : vector<256x256xf32>
    %c0_277 = arith.constant 0 : index
    %c0_278 = arith.constant 0 : index
    %504 = vector.load %arg14[%c0_277, %c0_278] : memref<64x256xbf16, #tpu.memory_space<vmem>>, vector<64x256xbf16>
    %505 = arith.truncf %503 : vector<256x256xf32> to vector<256x256xbf16>
    %cst_279 = arith.constant dense<0.000000e+00> : vector<64x256xf32>
    %506 = tpu.matmul %504, %505, %cst_279 {dimension_numbers = #tpu.dot_dimension_numbers<[1], [0], [0], [1], [0, 0, 1, 1], [], []>} : vector<64x256xbf16>, vector<256x256xbf16>, vector<64x256xf32> -> vector<64x256xf32>
    %c0_280 = arith.constant 0 : index
    %c0_281 = arith.constant 0 : index
    %507 = vector.load %arg15[%c0_280, %c0_281] : memref<64x1xf32, #tpu.memory_space<vmem>>, vector<64x1xf32>
    %508 = vector.broadcast %507 : vector<64x1xf32> to vector<64x256xf32>
    %509 = arith.addf %506, %508 : vector<64x256xf32>
    %cst_282 = arith.constant 0.000000e+00 : f32
    %510 = vector.broadcast %cst_282 : f32 to vector<64x256xf32>
    %511 = arith.maximumf %509, %510 : vector<64x256xf32>
    %c0_283 = arith.constant 0 : index
    %c0_284 = arith.constant 0 : index
    %512 = vector.load %arg16[%c0_283, %c0_284] : memref<2x64xbf16, #tpu.memory_space<vmem>>, vector<2x64xbf16>
    %513 = arith.truncf %511 : vector<64x256xf32> to vector<64x256xbf16>
    %cst_285 = arith.constant dense<0.000000e+00> : vector<2x256xf32>
    %514 = tpu.matmul %512, %513, %cst_285 {dimension_numbers = #tpu.dot_dimension_numbers<[1], [0], [0], [1], [0, 0, 1, 1], [], []>} : vector<2x64xbf16>, vector<64x256xbf16>, vector<2x256xf32> -> vector<2x256xf32>
    %c0_286 = arith.constant 0 : index
    %c0_287 = arith.constant 0 : index
    %515 = vector.load %arg17[%c0_286, %c0_287] : memref<2x1xf32, #tpu.memory_space<vmem>>, vector<2x1xf32>
    %516 = vector.broadcast %515 : vector<2x1xf32> to vector<2x256xf32>
    %517 = arith.addf %514, %516 : vector<2x256xf32>
    %c0_288 = arith.constant 0 : index
    %c0_289 = arith.constant 0 : index
    %518 = vector.load %arg18[%c0_288, %c0_289] : memref<2x256xf32, #tpu.memory_space<vmem>>, vector<2x256xf32>
    tpu.vector_store %arg18[%c0_288, %c0_289], %517 {strides = array<i32>} : memref<2x256xf32, #tpu.memory_space<vmem>>, vector<2x256xf32>,
    return
  }
}

</mosaic_0001>

<bundles_post_ra>
// kernel: snake_net.1
= control target key start
LH: loop header
LB: loop body
LE: loop exit
PB: predicated region body
PF: predicated region fallthrough
CT: control target
= control target key end

     0   :  { %s7122_s0 = inlined_call_operand.vmem [shape: f32[2,8,128], index: 0, kind: input, shape index: {}]   ;;  %s7123_s1 = inlined_call_operand.vmem [shape: bf16[16,72], index: 1, kind: input, shape index: {}]   ;;  %s7124_s2 = inlined_call_operand.vmem [shape: f32[16,1], index: 2, kind: input, shape index: {}]   ;;  %s7125_s3 = inlined_call_operand.vmem [shape: f32[16,1], index: 3, kind: input, shape index: {}]   ;;  %s7126_s4 = inlined_call_operand.vmem [shape: f32[16,1], index: 4, kind: input, shape index: {}]   ;;  %s7127_s5 = inlined_call_operand.vmem [shape: bf16[7,16,144], index: 5, kind: input, shape index: {}]   ;;  %s7128_s6 = inlined_call_operand.vmem [shape: f32[7,16,1], index: 6, kind: input, shape index: {}]   ;;  %s7129_s7 = inlined_call_operand.vmem [shape: f32[7,16,1], index: 7, kind: input, shape index: {}]   ;;  %s7130_s8 = inlined_call_operand.vmem [shape: f32[7,16,1], index: 8, kind: input, shape index: {}]   ;;  %s7131_s9 = inlined_call_operand.vmem [shape: bf16[256,128], index: 9, kind: input, shape index: {}]   ;;  %s7132_s10 = inlined_call_operand.vmem [shape: f32[256,1], index: 10, kind: input, shape index: {}]   ;;  %s7133_s11 = inlined_call_operand.vmem [shape: bf16[256,256], index: 11, kind: input, shape index: {}]   ;;  %s7134_s12 = inlined_call_operand.vmem [shape: bf16[256,128], index: 12, kind: input, shape index: {}]   ;;  %s7135_s13 = inlined_call_operand.vmem [shape: f32[256,1], index: 13, kind: input, shape index: {}]   ;;  %s7136_s14 = inlined_call_operand.vmem [shape: bf16[64,256], index: 14, kind: input, shape index: {}]   ;;  %s7137_s15 = inlined_call_operand.vmem [shape: f32[64,1], index: 15, kind: input, shape index: {}]   ;;  %s7138_s16 = inlined_call_operand.vmem [shape: bf16[2,64], index: 16, kind: input, shape index: {}]   ;;  %s7139_s17 = inlined_call_operand.vmem [shape: f32[2,1], index: 17, kind: input, shape index: {}]   ;;  %s7140_s18 = inlined_call_operand.hbm [shape: f32[2,256], index: 18, kind: output, shape index: {}]  }
   0x1   :  { %7164 = sst [smem:[#allocation46_spill]] %s7122_s0 }
   0x2   :  { %7165 = sst [smem:[#allocation47_spill]] %s7123_s1 }
   0x3   :  { %7166 = sst [smem:[#allocation48_spill]] %s7124_s2 }
   0x4   :  { %s7167_s29 = sld [smem:[#allocation46_spill]]  ;;  %s5334_s19 = smov 2   ;;  %v7145_v4 = vmov 0  }
   0x5   :  { %s5335_s1 = smov 4   ;;  %s5336_s20 = smov 1   ;;  %172 = vmatprep.mubr.bf16.mxu0 %v7145_v4  ;;  %4538 = vset.pattern.permute.xlu0 %v7145_v4 }
   0x6   :  { %s5337_s21 = smov 3   ;;  %s5338_s22 = smov 127   ;;  %4539 = vset.pattern.permute.xlu1 %v7145_v4 }
   0x7   :  { %s5339_s2 = smov 126   ;;  %s5340_s23 = smov 125  }
   0x8   :  { %s7143_s24 = smov 124   ;;  %s7168_s27 = sld [smem:[#allocation48_spill]] }
   0xa   :  { %v61_v0 = vld [vmem:[%s7167_s29] sm:$0xff]  ;;  %v4220_v1 = vld [vmem:[%s7167_s29 + $0x8] sm:$0xff] }
   0xb   :  { %v4508_v2 = vpack.i.bf16 %v61_v0, %v4220_v1  ;;  %v4533_v3 = vpack.i.bf16 %v4220_v1, %v61_v0 }
   0xd   :  { %4509 = vrot.lane.b32.xlu1 %v4508_v2, %s5334_s19  ;;  %4499 = vrot.lane.b32.xlu0 %v4508_v2, %s5335_s1 }
   0xe   :  { %v66_v5 = vld [vmem:[%s7168_s27] sm:$0xff]  ;;  %v67_v6 = vld [vmem:[%s7168_s27 + $0x8] sm:$0xff] }
  0x11   :  { %4514 = vrot.lane.b32.xlu1 %v4508_v2, %s5336_s20  ;;  %4504 = vrot.lane.b32.xlu0 %v4508_v2, %s5337_s21 }
  0x15   :  { %4519 = vrot.lane.b32.xlu0 %v4508_v2, %s5338_s22  ;;  %4524 = vrot.lane.b32.xlu1 %v4508_v2, %s5339_s2 }
  0x19   :  { %4529 = vrot.lane.b32.xlu0 %v4508_v2, %s5340_s23  ;;  %4534 = vrot.lane.b32.xlu1 %v4533_v3, %s7143_s24 }
  0x1d   :  { %116 = vperm.xlu0 %4538, %v66_v5   ;;  %121 = vperm.xlu1 %4539, %v67_v6  }
  0x1e   :  { %23 = vsyncpa [#allocation4], 0  ;;  %vm133_vm0 = vcmask 1043456   ;;  %s7169_s25 = sld [smem:[#allocation47_spill]]  ;;  %vm129_vm1 = vcmask 588800   ;;  %vm364_vm2 = vcmask 130048  }
  0x1f   :  { %s7170_s24 = smov 124   ;;  %s5344_s30 = smov 6   ;;  %vm2586_vm3 = vcmask 7168   ;;  %vm4149_vm4 = vcmask 523264  }
  0x20   :  { %s5345_s0 = smov 122  }
  0x24   :  { %v5164_v42 = vld [vmem:[%s7169_s25] sm:$0xff]  }
  0x7f   :  { %v4510_v7 = vpop.permute.xlu1 %4509  ;;  %v4500_v8 = vpop.permute.xlu0 %4499 }
  0x80   :  { %v4511_v9 = vunpack.i.l.bf16 %v4510_v7  ;;  %v4501_v12 = vunpack.i.l.bf16 %v4500_v8  ;;  %v4502_v16 = vunpack.i.h.bf16 %v4500_v8  ;;  %v4512_v19 = vunpack.i.h.bf16 %v4510_v7 }
  0x83   :  { %v4515_v10 = vpop.permute.xlu1 %4514  ;;  %v4505_v11 = vpop.permute.xlu0 %4504 }
  0x84   :  { %v4516_v13 = vunpack.i.l.bf16 %v4515_v10  ;;  %v4506_v14 = vunpack.i.l.bf16 %v4505_v11  ;;  %v4507_v15 = vunpack.i.h.bf16 %v4505_v11  ;;  %v4517_v20 = vunpack.i.h.bf16 %v4515_v10 }
  0x86   :  { %v105_v17 = vpack.c.bf16 %v4506_v14, %v4501_v12  ;;  %v104_v18 = vpack.c.bf16 %v4507_v15, %v4502_v16  ;;  %v107_v23 = vpack.c.bf16 %v4516_v13, %v4511_v9  ;;  %v106_v28 = vpack.c.bf16 %v4517_v20, %v4512_v19  ;;  %v68_v20 = vld [vmem:[%s7125_s3] sm:$0xff] }
  0x87   :  { %v4520_v21 = vpop.permute.xlu0 %4519  ;;  %v4525_v22 = vpop.permute.xlu1 %4524 }
  0x88   :  { %140 = vmatprep.subr.bf16.mxu0 %v105_v17  ;;  %v4521_v24 = vunpack.i.l.bf16 %v4520_v21  ;;  %v4522_v25 = vunpack.i.h.bf16 %v4520_v21  ;;  %v4526_v26 = vunpack.i.l.bf16 %v4525_v22  ;;  %v4527_v32 = vunpack.i.h.bf16 %v4525_v22 }
  0x89   :  { %141 = vmatpush1.bf16.msra.mxu0 %v104_v18  ;;  %v69_v18 = vld [vmem:[%s7125_s3 + $0x8] sm:$0xff]  ;;  %s5346_s3 = smov 120  }
  0x8a   :  { %142 = vmatprep.subr.bf16.mxu0 %v107_v23  ;;  %v109_v27 = vpack.c.bf16 %v4521_v24, %v4220_v1  ;;  %v108_v34 = vpack.c.bf16 %v4522_v25, %v61_v0  ;;  %v71_v25 = vld [vmem:[%s7126_s4 + $0x8] sm:$0xff] }
  0x8b   :  { %v4530_v29 = vpop.permute.xlu0 %4529  ;;  %v4535_v30 = vpop.permute.xlu1 %4534 }
  0x8c   :  { %v4531_v31 = vunpack.i.l.bf16 %v4530_v29  ;;  %v4532_v33 = vunpack.i.h.bf16 %v4530_v29  ;;  %v4537_v35 = vunpack.i.h.bf16 %v4535_v30  ;;  %v4536_v36 = vunpack.i.l.bf16 %v4535_v30 }
  0x8d   :  { %143 = vmatpush1.bf16.msra.mxu0 %v106_v28 }
  0x8e   :  { %144 = vmatprep.subr.bf16.mxu0 %v109_v27  ;;  %v111_v37 = vpack.c.bf16 %v4531_v31, %v4526_v26  ;;  %v110_v38 = vpack.c.bf16 %v4532_v33, %v4527_v32  ;;  %v113_v39 = vpack.c.bf16 %v4537_v35, %v4537_v35  ;;  %v112_v40 = vpack.c.bf16 %v4536_v36, %v4536_v36  ;;  %v70_v26 = vld [vmem:[%s7126_s4] sm:$0xff]  ;;  %s5350_s4 = smov 112  }
  0x90   :  { %v135_v41 = vsel %vm133_vm0, %v112_v40, 0 }
  0x91   :  { %145 = vmatpush1.bf16.msra.mxu0 %v108_v34 }
  0x92   :  { %146 = vmatprep.subr.bf16.mxu0 %v111_v37 }
  0x95   :  { %147 = vmatpush1.bf16.msra.mxu0 %v110_v38 }
  0x96   :  { %4222 = vmatprep.subr.msk.bf16.mxu0 %vm133_vm0, %v113_v39 }
  0x99   :  { %149 = vmatpush1.bf16.msra.mxu0 %v135_v41 }
  0x9c   :  { %4223 = vmatmul.mubr.msk.bf16.vlgmr.msra.gmra.mrb[0].mxu0 %vm129_vm1, %v5164_v42  ;;  %v117_v43 = vpop.permute.xlu0 %116  ;;  %v122_v45 = vpop.permute.xlu1 %121 }
 0x16f   :  { %v174_v44 = vpop.f32.mrb[0].mxu0 }
 0x170   :  { %v175_v46 = vadd.f32 %v174_v44, %v117_v43  ;;  %v176_v47 = vpop.f32.mrb[1].mxu0  ;;  %v5167_v44 = vld [vmem:[%s7127_s5 + $0x4] ss:$8 sps:$4 sm:$0xff]  }
 0x171   :  { %v177_v48 = vadd.f32 %v176_v47, %v117_v43  ;;  %v178_v49 = vpop.f32.mrb[2].mxu0  ;;  %4226 = vmatprep.mubr.msk.bf16.mxu1 %vm364_vm2, %v5167_v44 }
 0x172   :  { %v183_v50 = vmax.f32 %v175_v46, 0.0  ;;  %v179_v51 = vadd.f32 %v178_v49, %v122_v45  ;;  %v180_v52 = vpop.f32.mrb[3].mxu0  ;;  %v258_v46 = vld [vmem:[%s7128_s6 + $0x8] sm:$0xff] }
 0x173   :  { %v184_v53 = vmax.f32 %v177_v48, 0.0  ;;  %v181_v54 = vadd.f32 %v180_v52, %v122_v45  ;;  %v257_v45 = vld [vmem:[%s7128_s6] sm:$0xff] }
 0x174   :  { %v185_v55 = vmax.f32 %v179_v51, 0.0  ;;  %v187_v61 = vmul.f32 %v183_v50, %v183_v50 }
 0x175   :  { %v186_v56 = vmax.f32 %v181_v54, 0.0  ;;  %v191_v57 = vadd.f32 %v184_v53, %v183_v50  ;;  %v188_v62 = vmul.f32 %v184_v53, %v184_v53 }
 0x176   :  { %v189_v58 = vmul.f32 %v185_v55, %v185_v55 }
 0x177   :  { %192 = vadd.xlane.f32.xlu1 %v191_v57  ;;  %v194_v59 = vadd.f32 %v186_v56, %v185_v55  ;;  %v190_v60 = vmul.f32 %v186_v56, %v186_v56  ;;  %v197_v0 = vadd.f32 %v188_v62, %v187_v61 }
 0x179   :  { %195 = vadd.xlane.f32.xlu0 %v194_v59  ;;  %v200_v63 = vadd.f32 %v190_v60, %v189_v58 }
 0x17b   :  { %201 = vadd.xlane.f32.xlu1 %v200_v63 }
 0x17d   :  { %198 = vadd.xlane.f32.xlu0 %v197_v0 }
 0x204   :  { %v193_v1 = vpop.xlane.xlu1 %192 }
 0x205   :  { %v203_v3 = vmul.f32 0.00390625, %v193_v1 }
 0x206   :  { %v196_v2 = vpop.xlane.xlu0 %195 }
 0x207   :  { %v204_v5 = vmul.f32 0.00390625, %v196_v2  ;;  %v207_v10 = vmul.f32 %v203_v3, %v203_v3 }
 0x208   :  { %v202_v6 = vpop.xlane.xlu1 %201 }
 0x209   :  { %v208_v7 = vmul.f32 %v204_v5, %v204_v5  ;;  %v206_v8 = vmul.f32 0.00390625, %v202_v6 }
 0x20a   :  { %v199_v9 = vpop.xlane.xlu0 %198 }
 0x20b   :  { %v210_v11 = vsub.f32 %v206_v8, %v208_v7  ;;  %v205_v12 = vmul.f32 0.00390625, %v199_v9 }
 0x20d   :  { %v212_v13 = vmax.f32 %v210_v11, 0.0  ;;  %v209_v14 = vsub.f32 %v205_v12, %v207_v10 }
 0x20f   :  { %v214_v15 = vadd.f32 1e-05, %v212_v13  ;;  %v211_v16 = vmax.f32 %v209_v14, 0.0 }
 0x211   :  { %5278 = vrsqrt.f32 %v214_v15  ;;  %v213_v17 = vadd.f32 1e-05, %v211_v16 }
 0x213   :  { %5280 = vrsqrt.f32 %v213_v17 }
 0x21b   :  { %v5279_v19 = vpop.eup %5278 }
 0x21c   :  { %v218_v21 = vmul.f32 %v5279_v19, %v69_v18 }
 0x21d   :  { %v5281_v22 = vpop.eup %5280 }
 0x21e   :  { %230 = vperm.xlu1 %4539, %v218_v21   ;;  %v217_v23 = vmul.f32 %v5281_v22, %v68_v20  ;;  %v220_v24 = vmul.f32 %v218_v21, %v204_v5 }
 0x220   :  { %225 = vperm.xlu0 %4538, %v217_v23   ;;  %v219_v27 = vmul.f32 %v217_v23, %v203_v3  ;;  %v222_v28 = vsub.f32 %v71_v25, %v220_v24 }
 0x222   :  { %v221_v29 = vsub.f32 %v70_v26, %v219_v27 }
 0x224   :  { %244 = vperm.xlu0 %4538, %v222_v28   ;;  %239 = vperm.xlu1 %4539, %v221_v29  }
 0x29d   :  { %v231_v30 = vpop.permute.xlu1 %230 }
 0x29e   :  { %v235_v32 = vmul.f32 %v231_v30, %v185_v55  ;;  %v236_v33 = vmul.f32 %v231_v30, %v186_v56 }
 0x29f   :  { %v226_v31 = vpop.permute.xlu0 %225 }
 0x2a0   :  { %v233_v34 = vmul.f32 %v226_v31, %v183_v50  ;;  %v234_v35 = vmul.f32 %v226_v31, %v184_v53 }
 0x2a3   :  { %v245_v36 = vpop.permute.xlu0 %244  ;;  %v240_v37 = vpop.permute.xlu1 %239 }
 0x2a4   :  { %v5486_v38 = vadd.f32 %v245_v36, %v235_v32  ;;  %v5488_v39 = vadd.f32 %v245_v36, %v236_v33  ;;  %v5490_v40 = vadd.f32 %v240_v37, %v233_v34  ;;  %v5492_v41 = vadd.f32 %v240_v37, %v234_v35 }
 0x2a6   :  { %v4540_v42 = vpack.i.bf16 %v5488_v39, %v5492_v41  ;;  %v4545_v43 = vpack.i.bf16 %v5486_v38, %v5490_v40  ;;  %v5526_v20 = vpack.c.bf16 %v5488_v39, %v5492_v41  ;;  %v5531_v25 = vpack.c.bf16 %v5486_v38, %v5490_v40 }
 0x2a8   :  { %4541 = vrot.lane.b32.xlu1 %v4540_v42, %s5335_s1  ;;  %4546 = vrot.lane.b32.xlu0 %v4545_v43, %s5335_s1 }
 0x2ac   :  { %4551 = vrot.lane.b32.xlu1 %v4540_v42, %s5337_s21  ;;  %4556 = vrot.lane.b32.xlu0 %v4545_v43, %s5337_s21 }
 0x2b0   :  { %4561 = vrot.lane.b32.xlu1 %v4540_v42, %s5334_s19  ;;  %4566 = vrot.lane.b32.xlu0 %v4545_v43, %s5334_s19 }
 0x2b4   :  { %4571 = vrot.lane.b32.xlu1 %v4540_v42, %s5336_s20  ;;  %4576 = vrot.lane.b32.xlu0 %v4545_v43, %s5336_s20 }
 0x2b8   :  { %4581 = vrot.lane.b32.xlu1 %v4540_v42, %s5338_s22  ;;  %4586 = vrot.lane.b32.xlu0 %v4545_v43, %s5338_s22 }
 0x2bc   :  { %4591 = vrot.lane.b32.xlu1 %v4540_v42, %s5339_s2  ;;  %4596 = vrot.lane.b32.xlu0 %v4545_v43, %s5339_s2 }
 0x2c0   :  { %4601 = vrot.lane.b32.xlu1 %v4540_v42, %s5340_s23  ;;  %4606 = vrot.lane.b32.xlu0 %v4545_v43, %s5340_s23 }
 0x2c4   :  { %4611 = vrot.lane.b32.xlu1 %v4540_v42, %s7170_s24  ;;  %4616 = vrot.lane.b32.xlu0 %v4545_v43, %s7170_s24 }
 0x2c8   :  { %347 = vperm.xlu1 %4539, %v257_v45   ;;  %352 = vperm.xlu0 %4538, %v258_v46  }
 0x31a   :  { %v4542_v47 = vpop.permute.xlu1 %4541  ;;  %v4547_v48 = vpop.permute.xlu0 %4546 }
 0x31b   :  { %v4544_v49 = vunpack.i.h.bf16 %v4542_v47  ;;  %v4543_v50 = vunpack.i.l.bf16 %v4542_v47  ;;  %v4549_v51 = vunpack.i.h.bf16 %v4547_v48  ;;  %v4548_v52 = vunpack.i.l.bf16 %v4547_v48 }
 0x31d   :  { %v328_v53 = vpack.c.bf16 %v4544_v49, %v4543_v50  ;;  %v327_v54 = vpack.c.bf16 %v4549_v51, %v4548_v52 }
 0x31e   :  { %v4552_v55 = vpop.permute.xlu1 %4551  ;;  %v4557_v56 = vpop.permute.xlu0 %4556 }
 0x31f   :  { %v4554_v57 = vunpack.i.h.bf16 %v4552_v55  ;;  %v4553_v58 = vunpack.i.l.bf16 %v4552_v55  ;;  %v4559_v59 = vunpack.i.h.bf16 %v4557_v56  ;;  %v4558_v60 = vunpack.i.l.bf16 %v4557_v56  ;;  %368 = vmatprep.subr.bf16.mxu1 %v328_v53 }
 0x320   :  { %369 = vmatpush1.bf16.msra.mxu1 %v327_v54  ;;  %v5165_v54 = vld [vmem:[%s7127_s5] ss:$8 sps:$4 sm:$0xff]  }
 0x321   :  { %v330_v61 = vpack.c.bf16 %v4554_v57, %v4553_v58  ;;  %v329_v62 = vpack.c.bf16 %v4559_v59, %v4558_v60 }
 0x322   :  { %v4562_v63 = vpop.permute.xlu1 %4561  ;;  %v4567_v0 = vpop.permute.xlu0 %4566 }
 0x323   :  { %v4564_v1 = vunpack.i.h.bf16 %v4562_v63  ;;  %v4563_v2 = vunpack.i.l.bf16 %v4562_v63  ;;  %v4569_v3 = vunpack.i.h.bf16 %v4567_v0  ;;  %v4568_v5 = vunpack.i.l.bf16 %v4567_v0  ;;  %370 = vmatprep.subr.bf16.mxu1 %v330_v61 }
 0x324   :  { %371 = vmatpush1.bf16.msra.mxu1 %v329_v62 }
 0x325   :  { %v332_v6 = vpack.c.bf16 %v4564_v1, %v4563_v2  ;;  %v331_v7 = vpack.c.bf16 %v4569_v3, %v4568_v5 }
 0x326   :  { %v4572_v8 = vpop.permute.xlu1 %4571  ;;  %v4577_v9 = vpop.permute.xlu0 %4576 }
 0x327   :  { %v4574_v10 = vunpack.i.h.bf16 %v4572_v8  ;;  %v4573_v11 = vunpack.i.l.bf16 %v4572_v8  ;;  %v4579_v12 = vunpack.i.h.bf16 %v4577_v9  ;;  %v4578_v13 = vunpack.i.l.bf16 %v4577_v9  ;;  %372 = vmatprep.subr.bf16.mxu1 %v332_v6 }
 0x328   :  { %373 = vmatpush1.bf16.msra.mxu1 %v331_v7 }
 0x329   :  { %v334_v14 = vpack.c.bf16 %v4574_v10, %v4573_v11  ;;  %v333_v15 = vpack.c.bf16 %v4579_v12, %v4578_v13 }
 0x32a   :  { %v4582_v16 = vpop.permute.xlu1 %4581  ;;  %v4587_v17 = vpop.permute.xlu0 %4586 }
 0x32b   :  { %v4584_v18 = vunpack.i.h.bf16 %v4582_v16  ;;  %v4583_v19 = vunpack.i.l.bf16 %v4582_v16  ;;  %374 = vmatprep.subr.bf16.mxu1 %v334_v14  ;;  %v4589_v21 = vunpack.i.h.bf16 %v4587_v17  ;;  %v4588_v22 = vunpack.i.l.bf16 %v4587_v17 }
 0x32c   :  { %375 = vmatpush1.bf16.msra.mxu1 %v333_v15 }
 0x32d   :  { %376 = vmatprep.subr.bf16.mxu1 %v5526_v20  ;;  %v338_v28 = vpack.c.bf16 %v4584_v18, %v4583_v19  ;;  %v337_v33 = vpack.c.bf16 %v4589_v21, %v4588_v22 }
 0x32e   :  { %v4592_v23 = vpop.permute.xlu1 %4591  ;;  %v4597_v24 = vpop.permute.xlu0 %4596 }
 0x32f   :  { %v4594_v26 = vunpack.i.h.bf16 %v4592_v23  ;;  %v4593_v27 = vunpack.i.l.bf16 %v4592_v23  ;;  %v4599_v29 = vunpack.i.h.bf16 %v4597_v24  ;;  %v4598_v30 = vunpack.i.l.bf16 %v4597_v24 }
 0x330   :  { %377 = vmatpush1.bf16.msra.mxu1 %v5531_v25 }
 0x331   :  { %378 = vmatprep.subr.bf16.mxu1 %v338_v28  ;;  %v340_v36 = vpack.c.bf16 %v4594_v26, %v4593_v27  ;;  %v339_v44 = vpack.c.bf16 %v4599_v29, %v4598_v30 }
 0x332   :  { %v4602_v31 = vpop.permute.xlu1 %4601  ;;  %v4607_v32 = vpop.permute.xlu0 %4606 }
 0x333   :  { %v4604_v34 = vunpack.i.h.bf16 %v4602_v31  ;;  %v4603_v35 = vunpack.i.l.bf16 %v4602_v31  ;;  %v4609_v37 = vunpack.i.h.bf16 %v4607_v32  ;;  %v4608_v42 = vunpack.i.l.bf16 %v4607_v32  ;;  %v260_v32 = vld [vmem:[%s7129_s7 + $0x8] sm:$0xff] }
 0x334   :  { %379 = vmatpush1.bf16.msra.mxu1 %v337_v33 }
 0x335   :  { %380 = vmatprep.subr.bf16.mxu1 %v340_v36  ;;  %v342_v48 = vpack.c.bf16 %v4604_v34, %v4603_v35  ;;  %v341_v51 = vpack.c.bf16 %v4609_v37, %v4608_v42  ;;  %v259_v34 = vld [vmem:[%s7129_s7] sm:$0xff] }
 0x336   :  { %v4612_v43 = vpop.permute.xlu1 %4611  ;;  %v4617_v47 = vpop.permute.xlu0 %4616 }
 0x337   :  { %v4614_v45 = vunpack.i.h.bf16 %v4612_v43  ;;  %v4613_v46 = vunpack.i.l.bf16 %v4612_v43  ;;  %v4619_v49 = vunpack.i.h.bf16 %v4617_v47  ;;  %v4618_v50 = vunpack.i.l.bf16 %v4617_v47  ;;  %v262_v43 = vld [vmem:[%s7130_s8 + $0x8] sm:$0xff] }
 0x338   :  { %381 = vmatpush1.bf16.msra.mxu1 %v339_v44  ;;  %v261_v44 = vld [vmem:[%s7130_s8] sm:$0xff] }
 0x339   :  { %382 = vmatprep.subr.bf16.mxu1 %v342_v48  ;;  %v344_v52 = vpack.c.bf16 %v4614_v45, %v4613_v46  ;;  %v343_v53 = vpack.c.bf16 %v4619_v49, %v4618_v50 }
 0x33c   :  { %383 = vmatpush1.bf16.msra.mxu1 %v341_v51 }
 0x33d   :  { %384 = vmatprep.subr.bf16.mxu1 %v344_v52 }
 0x340   :  { %385 = vmatpush1.bf16.msra.mxu1 %v343_v53 }
 0x343   :  { %401 = vmatmul.mubr.bf16.vlgmr.msra.gmra.mrb[0].mxu1 %v5165_v54 }
 0x347   :  { %v348_v55 = vpop.permute.xlu1 %347  ;;  %v353_v59 = vpop.permute.xlu0 %352 }
 0x416   :  { %v402_v56 = vpop.f32.mrb[0].mxu1 }
 0x417   :  { %v403_v57 = vadd.f32 %v402_v56, %v348_v55  ;;  %v404_v58 = vpop.f32.mrb[1].mxu1 }
 0x418   :  { %v405_v60 = vadd.f32 %v404_v58, %v348_v55  ;;  %v406_v61 = vpop.f32.mrb[2].mxu1 }
 0x419   :  { %v411_v62 = vmax.f32 %v403_v57, 0.0  ;;  %v407_v63 = vadd.f32 %v406_v61, %v353_v59  ;;  %v408_v0 = vpop.f32.mrb[3].mxu1 }
 0x41a   :  { %v412_v1 = vmax.f32 %v405_v60, 0.0  ;;  %v409_v2 = vadd.f32 %v408_v0, %v353_v59 }
 0x41b   :  { %v413_v3 = vmax.f32 %v407_v63, 0.0  ;;  %v415_v10 = vmul.f32 %v411_v62, %v411_v62 }
 0x41c   :  { %v414_v5 = vmax.f32 %v409_v2, 0.0  ;;  %v419_v6 = vadd.f32 %v412_v1, %v411_v62  ;;  %v416_v11 = vmul.f32 %v412_v1, %v412_v1 }
 0x41d   :  { %v417_v7 = vmul.f32 %v413_v3, %v413_v3 }
 0x41e   :  { %420 = vadd.xlane.f32.xlu1 %v419_v6  ;;  %v422_v8 = vadd.f32 %v414_v5, %v413_v3  ;;  %v418_v9 = vmul.f32 %v414_v5, %v414_v5  ;;  %v425_v13 = vadd.f32 %v416_v11, %v415_v10 }
 0x420   :  { %423 = vadd.xlane.f32.xlu0 %v422_v8  ;;  %v428_v12 = vadd.f32 %v418_v9, %v417_v7 }
 0x422   :  { %429 = vadd.xlane.f32.xlu1 %v428_v12 }
 0x424   :  { %426 = vadd.xlane.f32.xlu0 %v425_v13 }
 0x4ab   :  { %v421_v14 = vpop.xlane.xlu1 %420 }
 0x4ac   :  { %v431_v16 = vmul.f32 0.00390625, %v421_v14 }
 0x4ad   :  { %v424_v15 = vpop.xlane.xlu0 %423 }
 0x4ae   :  { %v432_v17 = vmul.f32 0.00390625, %v424_v15  ;;  %v435_v23 = vmul.f32 %v431_v16, %v431_v16 }
 0x4af   :  { %v430_v18 = vpop.xlane.xlu1 %429 }
 0x4b0   :  { %v436_v19 = vmul.f32 %v432_v17, %v432_v17  ;;  %v434_v21 = vmul.f32 0.00390625, %v430_v18 }
 0x4b1   :  { %v427_v22 = vpop.xlane.xlu0 %426 }
 0x4b2   :  { %v438_v24 = vsub.f32 %v434_v21, %v436_v19  ;;  %v433_v26 = vmul.f32 0.00390625, %v427_v22 }
 0x4b4   :  { %v440_v27 = vmax.f32 %v438_v24, 0.0  ;;  %v437_v28 = vsub.f32 %v433_v26, %v435_v23 }
 0x4b6   :  { %v442_v29 = vadd.f32 1e-05, %v440_v27  ;;  %v439_v30 = vmax.f32 %v437_v28, 0.0 }
 0x4b8   :  { %5282 = vrsqrt.f32 %v442_v29  ;;  %v441_v31 = vadd.f32 1e-05, %v439_v30 }
 0x4ba   :  { %5284 = vrsqrt.f32 %v441_v31 }
 0x4c2   :  { %v5283_v33 = vpop.eup %5282 }
 0x4c3   :  { %v446_v35 = vmul.f32 %v5283_v33, %v260_v32 }
 0x4c4   :  { %v5285_v36 = vpop.eup %5284 }
 0x4c5   :  { %458 = vperm.xlu1 %4539, %v446_v35   ;;  %v445_v37 = vmul.f32 %v5285_v36, %v259_v34  ;;  %v448_v42 = vmul.f32 %v446_v35, %v432_v17 }
 0x4c7   :  { %453 = vperm.xlu0 %4538, %v445_v37   ;;  %v447_v45 = vmul.f32 %v445_v37, %v431_v16  ;;  %v450_v46 = vsub.f32 %v262_v43, %v448_v42 }
 0x4c9   :  { %v449_v47 = vsub.f32 %v261_v44, %v447_v45 }
 0x4cb   :  { %472 = vperm.xlu0 %4538, %v450_v46   ;;  %467 = vperm.xlu1 %4539, %v449_v47  }
 0x544   :  { %v459_v48 = vpop.permute.xlu1 %458 }
 0x545   :  { %v463_v50 = vmul.f32 %v459_v48, %v413_v3  ;;  %v464_v51 = vmul.f32 %v459_v48, %v414_v5 }
 0x546   :  { %v454_v49 = vpop.permute.xlu0 %453 }
 0x547   :  { %v461_v52 = vmul.f32 %v454_v49, %v411_v62  ;;  %v462_v53 = vmul.f32 %v454_v49, %v412_v1 }
 0x54a   :  { %v473_v54 = vpop.permute.xlu0 %472  ;;  %v468_v55 = vpop.permute.xlu1 %467 }
 0x54b   :  { %v477_v56 = vadd.f32 %v473_v54, %v463_v50  ;;  %v478_v57 = vadd.f32 %v473_v54, %v464_v51  ;;  %v475_v58 = vadd.f32 %v468_v55, %v461_v52  ;;  %v476_v59 = vadd.f32 %v468_v55, %v462_v53 }
 0x54d   :  { %v5550_v60 = vadd.f32 %v477_v56, %v5486_v38  ;;  %v5553_v61 = vadd.f32 %v478_v57, %v5488_v39  ;;  %v5556_v63 = vadd.f32 %v475_v58, %v5490_v40  ;;  %v5559_v0 = vadd.f32 %v476_v59, %v5492_v41  ;;  %v5168_v38 = vld [vmem:[%s7127_s5 + $0x14] ss:$8 sps:$4 sm:$0xff]  }
 0x54e   :  { %4237 = vmatprep.mubr.msk.bf16.mxu1 %vm364_vm2, %v5168_v38  ;;  %v4229_v39 = vld [vmem:[%s7128_s6 + $0x10] sm:$0xff]  ;;  %v4230_v40 = vld [vmem:[%s7128_s6 + $0x18] sm:$0xff] }
 0x54f   :  { %v4620_v62 = vpack.i.bf16 %v5553_v61, %v5559_v0  ;;  %v4625_v1 = vpack.i.bf16 %v5550_v60, %v5556_v63  ;;  %v5593_v44 = vpack.c.bf16 %v5553_v61, %v5559_v0  ;;  %v5598_v49 = vpack.c.bf16 %v5550_v60, %v5556_v63 }
 0x551   :  { %4621 = vrot.lane.b32.xlu1 %v4620_v62, %s5335_s1  ;;  %4626 = vrot.lane.b32.xlu0 %v4625_v1, %s5335_s1 }
 0x555   :  { %4631 = vrot.lane.b32.xlu1 %v4620_v62, %s5337_s21  ;;  %4636 = vrot.lane.b32.xlu0 %v4625_v1, %s5337_s21 }
 0x559   :  { %4641 = vrot.lane.b32.xlu1 %v4620_v62, %s5334_s19  ;;  %4646 = vrot.lane.b32.xlu0 %v4625_v1, %s5334_s19 }
 0x55d   :  { %4651 = vrot.lane.b32.xlu1 %v4620_v62, %s5336_s20  ;;  %4656 = vrot.lane.b32.xlu0 %v4625_v1, %s5336_s20 }
 0x561   :  { %4661 = vrot.lane.b32.xlu1 %v4620_v62, %s5338_s22  ;;  %4666 = vrot.lane.b32.xlu0 %v4625_v1, %s5338_s22 }
 0x565   :  { %4671 = vrot.lane.b32.xlu1 %v4620_v62, %s5339_s2  ;;  %4676 = vrot.lane.b32.xlu0 %v4625_v1, %s5339_s2 }
 0x569   :  { %4681 = vrot.lane.b32.xlu1 %v4620_v62, %s5340_s23  ;;  %4686 = vrot.lane.b32.xlu0 %v4625_v1, %s5340_s23 }
 0x56d   :  { %4691 = vrot.lane.b32.xlu1 %v4620_v62, %s7170_s24  ;;  %4696 = vrot.lane.b32.xlu0 %v4625_v1, %s7170_s24 }
 0x571   :  { %583 = vperm.xlu1 %4539, %v4229_v39   ;;  %588 = vperm.xlu0 %4538, %v4230_v40  }
 0x5c3   :  { %v4622_v41 = vpop.permute.xlu1 %4621  ;;  %v4627_v2 = vpop.permute.xlu0 %4626 }
 0x5c4   :  { %v4624_v3 = vunpack.i.h.bf16 %v4622_v41  ;;  %v4623_v5 = vunpack.i.l.bf16 %v4622_v41  ;;  %v4629_v6 = vunpack.i.h.bf16 %v4627_v2  ;;  %v4628_v7 = vunpack.i.l.bf16 %v4627_v2 }
 0x5c6   :  { %v563_v8 = vpack.c.bf16 %v4629_v6, %v4628_v7  ;;  %v564_v9 = vpack.c.bf16 %v4624_v3, %v4623_v5 }
 0x5c7   :  { %v4632_v10 = vpop.permute.xlu1 %4631  ;;  %v4637_v11 = vpop.permute.xlu0 %4636 }
 0x5c8   :  { %v4634_v12 = vunpack.i.h.bf16 %v4632_v10  ;;  %v4633_v13 = vunpack.i.l.bf16 %v4632_v10  ;;  %v4639_v14 = vunpack.i.h.bf16 %v4637_v11  ;;  %v4638_v15 = vunpack.i.l.bf16 %v4637_v11  ;;  %603 = vmatprep.subr.bf16.mxu1 %v564_v9  ;;  %v5170_v11 = vld [vmem:[%s7127_s5 + $0x10] ss:$8 sps:$4 sm:$0xff]  }
 0x5c9   :  { %604 = vmatpush1.bf16.msra.mxu1 %v563_v8 }
 0x5ca   :  { %v565_v16 = vpack.c.bf16 %v4639_v14, %v4638_v15  ;;  %v566_v17 = vpack.c.bf16 %v4634_v12, %v4633_v13 }
 0x5cb   :  { %v4642_v18 = vpop.permute.xlu1 %4641  ;;  %v4647_v19 = vpop.permute.xlu0 %4646 }
 0x5cc   :  { %v4644_v21 = vunpack.i.h.bf16 %v4642_v18  ;;  %v4643_v22 = vunpack.i.l.bf16 %v4642_v18  ;;  %v4649_v23 = vunpack.i.h.bf16 %v4647_v19  ;;  %v4648_v24 = vunpack.i.l.bf16 %v4647_v19  ;;  %605 = vmatprep.subr.bf16.mxu1 %v566_v17 }
 0x5cd   :  { %606 = vmatpush1.bf16.msra.mxu1 %v565_v16 }
 0x5ce   :  { %v567_v26 = vpack.c.bf16 %v4649_v23, %v4648_v24  ;;  %v568_v27 = vpack.c.bf16 %v4644_v21, %v4643_v22 }
 0x5cf   :  { %v4652_v28 = vpop.permute.xlu1 %4651  ;;  %v4657_v29 = vpop.permute.xlu0 %4656 }
 0x5d0   :  { %v4654_v30 = vunpack.i.h.bf16 %v4652_v28  ;;  %v4653_v31 = vunpack.i.l.bf16 %v4652_v28  ;;  %v4659_v32 = vunpack.i.h.bf16 %v4657_v29  ;;  %v4658_v33 = vunpack.i.l.bf16 %v4657_v29  ;;  %607 = vmatprep.subr.bf16.mxu1 %v568_v27 }
 0x5d1   :  { %608 = vmatpush1.bf16.msra.mxu1 %v567_v26 }
 0x5d2   :  { %v569_v34 = vpack.c.bf16 %v4659_v32, %v4658_v33  ;;  %v570_v35 = vpack.c.bf16 %v4654_v30, %v4653_v31 }
 0x5d3   :  { %v4662_v36 = vpop.permute.xlu1 %4661  ;;  %v4667_v37 = vpop.permute.xlu0 %4666 }
 0x5d4   :  { %v4664_v42 = vunpack.i.h.bf16 %v4662_v36  ;;  %v4663_v43 = vunpack.i.l.bf16 %v4662_v36  ;;  %609 = vmatprep.subr.bf16.mxu1 %v570_v35  ;;  %v4669_v45 = vunpack.i.h.bf16 %v4667_v37  ;;  %v4668_v46 = vunpack.i.l.bf16 %v4667_v37 }
 0x5d5   :  { %610 = vmatpush1.bf16.msra.mxu1 %v569_v34 }
 0x5d6   :  { %611 = vmatprep.subr.bf16.mxu1 %v5593_v44  ;;  %v574_v52 = vpack.c.bf16 %v4664_v42, %v4663_v43  ;;  %v573_v53 = vpack.c.bf16 %v4669_v45, %v4668_v46 }
 0x5d7   :  { %v4672_v47 = vpop.permute.xlu1 %4671  ;;  %v4677_v48 = vpop.permute.xlu0 %4676 }
 0x5d8   :  { %v4674_v50 = vunpack.i.h.bf16 %v4672_v47  ;;  %v4673_v51 = vunpack.i.l.bf16 %v4672_v47  ;;  %v4679_v54 = vunpack.i.h.bf16 %v4677_v48  ;;  %v4678_v55 = vunpack.i.l.bf16 %v4677_v48 }
 0x5d9   :  { %612 = vmatpush1.bf16.msra.mxu1 %v5598_v49 }
 0x5da   :  { %613 = vmatprep.subr.bf16.mxu1 %v574_v52  ;;  %v576_v62 = vpack.c.bf16 %v4674_v50, %v4673_v51  ;;  %v575_v1 = vpack.c.bf16 %v4679_v54, %v4678_v55 }
 0x5db   :  { %v4682_v56 = vpop.permute.xlu1 %4681  ;;  %v4687_v57 = vpop.permute.xlu0 %4686 }
 0x5dc   :  { %v4684_v58 = vunpack.i.h.bf16 %v4682_v56  ;;  %v4683_v59 = vunpack.i.l.bf16 %v4682_v56  ;;  %v4689_v38 = vunpack.i.h.bf16 %v4687_v57  ;;  %v4688_v39 = vunpack.i.l.bf16 %v4687_v57 }
 0x5dd   :  { %614 = vmatpush1.bf16.msra.mxu1 %v573_v53 }
 0x5de   :  { %615 = vmatprep.subr.bf16.mxu1 %v576_v62  ;;  %v578_v5 = vpack.c.bf16 %v4684_v58, %v4683_v59  ;;  %v577_v6 = vpack.c.bf16 %v4689_v38, %v4688_v39  ;;  %v4232_v58 = vld [vmem:[%s7129_s7 + $0x18] sm:$0xff]  ;;  %v4231_v62 = vld [vmem:[%s7129_s7 + $0x10] sm:$0xff] }
 0x5df   :  { %v4692_v40 = vpop.permute.xlu1 %4691  ;;  %v4697_v3 = vpop.permute.xlu0 %4696 }
 0x5e0   :  { %v4694_v41 = vunpack.i.h.bf16 %v4692_v40  ;;  %v4693_v2 = vunpack.i.l.bf16 %v4692_v40  ;;  %v4699_v7 = vunpack.i.h.bf16 %v4697_v3  ;;  %v4698_v8 = vunpack.i.l.bf16 %v4697_v3 }
 0x5e1   :  { %616 = vmatpush1.bf16.msra.mxu1 %v575_v1 }
 0x5e2   :  { %617 = vmatprep.subr.bf16.mxu1 %v578_v5  ;;  %v580_v9 = vpack.c.bf16 %v4694_v41, %v4693_v2  ;;  %v579_v10 = vpack.c.bf16 %v4699_v7, %v4698_v8  ;;  %v4234_v41 = vld [vmem:[%s7130_s8 + $0x18] sm:$0xff]  ;;  %v4233_v2 = vld [vmem:[%s7130_s8 + $0x10] sm:$0xff] }
 0x5e5   :  { %618 = vmatpush1.bf16.msra.mxu1 %v577_v6 }
 0x5e6   :  { %619 = vmatprep.subr.bf16.mxu1 %v580_v9 }
 0x5e9   :  { %620 = vmatpush1.bf16.msra.mxu1 %v579_v10 }
 0x5ec   :  { %636 = vmatmul.mubr.bf16.vlgmr.msra.gmra.mrb[4].mxu1 %v5170_v11 }
 0x5f0   :  { %v584_v12 = vpop.permute.xlu1 %583  ;;  %v589_v16 = vpop.permute.xlu0 %588 }
 0x6bf   :  { %v637_v13 = vpop.f32.mrb[4].mxu1 }
 0x6c0   :  { %v638_v14 = vadd.f32 %v637_v13, %v584_v12  ;;  %v639_v15 = vpop.f32.mrb[5].mxu1 }
 0x6c1   :  { %v640_v17 = vadd.f32 %v639_v15, %v584_v12  ;;  %v641_v18 = vpop.f32.mrb[6].mxu1 }
 0x6c2   :  { %v646_v19 = vmax.f32 %v638_v14, 0.0  ;;  %v642_v21 = vadd.f32 %v641_v18, %v589_v16  ;;  %v643_v22 = vpop.f32.mrb[7].mxu1 }
 0x6c3   :  { %v647_v23 = vmax.f32 %v640_v17, 0.0  ;;  %v644_v24 = vadd.f32 %v643_v22, %v589_v16 }
 0x6c4   :  { %v648_v26 = vmax.f32 %v642_v21, 0.0  ;;  %v650_v32 = vmul.f32 %v646_v19, %v646_v19 }
 0x6c5   :  { %v649_v27 = vmax.f32 %v644_v24, 0.0  ;;  %v654_v28 = vadd.f32 %v647_v23, %v646_v19  ;;  %v651_v33 = vmul.f32 %v647_v23, %v647_v23 }
 0x6c6   :  { %v652_v29 = vmul.f32 %v648_v26, %v648_v26 }
 0x6c7   :  { %655 = vadd.xlane.f32.xlu1 %v654_v28  ;;  %v657_v30 = vadd.f32 %v649_v27, %v648_v26  ;;  %v653_v31 = vmul.f32 %v649_v27, %v649_v27  ;;  %v660_v35 = vadd.f32 %v651_v33, %v650_v32 }
 0x6c9   :  { %658 = vadd.xlane.f32.xlu0 %v657_v30  ;;  %v663_v34 = vadd.f32 %v653_v31, %v652_v29 }
 0x6cb   :  { %664 = vadd.xlane.f32.xlu1 %v663_v34 }
 0x6cd   :  { %661 = vadd.xlane.f32.xlu0 %v660_v35 }
 0x754   :  { %v656_v36 = vpop.xlane.xlu1 %655 }
 0x755   :  { %v666_v42 = vmul.f32 0.00390625, %v656_v36 }
 0x756   :  { %v659_v37 = vpop.xlane.xlu0 %658 }
 0x757   :  { %v667_v43 = vmul.f32 0.00390625, %v659_v37  ;;  %v670_v50 = vmul.f32 %v666_v42, %v666_v42 }
 0x758   :  { %v665_v45 = vpop.xlane.xlu1 %664 }
 0x759   :  { %v671_v46 = vmul.f32 %v667_v43, %v667_v43  ;;  %v669_v47 = vmul.f32 0.00390625, %v665_v45 }
 0x75a   :  { %v662_v48 = vpop.xlane.xlu0 %661 }
 0x75b   :  { %v673_v51 = vsub.f32 %v669_v47, %v671_v46  ;;  %v668_v52 = vmul.f32 0.00390625, %v662_v48 }
 0x75d   :  { %v675_v53 = vmax.f32 %v673_v51, 0.0  ;;  %v672_v54 = vsub.f32 %v668_v52, %v670_v50 }
 0x75f   :  { %v677_v55 = vadd.f32 1e-05, %v675_v53  ;;  %v674_v56 = vmax.f32 %v672_v54, 0.0 }
 0x761   :  { %5286 = vrsqrt.f32 %v677_v55  ;;  %v676_v57 = vadd.f32 1e-05, %v674_v56 }
 0x763   :  { %5288 = vrsqrt.f32 %v676_v57 }
 0x76b   :  { %v5287_v59 = vpop.eup %5286 }
 0x76c   :  { %v681_v1 = vmul.f32 %v5287_v59, %v4232_v58 }
 0x76d   :  { %v5289_v38 = vpop.eup %5288 }
 0x76e   :  { %693 = vperm.xlu1 %4539, %v681_v1   ;;  %v680_v39 = vmul.f32 %v5289_v38, %v4231_v62  ;;  %v683_v40 = vmul.f32 %v681_v1, %v667_v43 }
 0x770   :  { %688 = vperm.xlu0 %4538, %v680_v39   ;;  %v682_v3 = vmul.f32 %v680_v39, %v666_v42  ;;  %v685_v5 = vsub.f32 %v4234_v41, %v683_v40 }
 0x772   :  { %v684_v6 = vsub.f32 %v4233_v2, %v682_v3 }
 0x774   :  { %707 = vperm.xlu0 %4538, %v685_v5   ;;  %702 = vperm.xlu1 %4539, %v684_v6  }
 0x7ed   :  { %v694_v7 = vpop.permute.xlu1 %693 }
 0x7ee   :  { %v698_v9 = vmul.f32 %v694_v7, %v648_v26  ;;  %v699_v10 = vmul.f32 %v694_v7, %v649_v27 }
 0x7ef   :  { %v689_v8 = vpop.permute.xlu0 %688 }
 0x7f0   :  { %v696_v11 = vmul.f32 %v689_v8, %v646_v19  ;;  %v697_v12 = vmul.f32 %v689_v8, %v647_v23 }
 0x7f3   :  { %v708_v13 = vpop.permute.xlu0 %707  ;;  %v703_v14 = vpop.permute.xlu1 %702 }
 0x7f4   :  { %v712_v15 = vadd.f32 %v708_v13, %v698_v9  ;;  %v713_v16 = vadd.f32 %v708_v13, %v699_v10  ;;  %v710_v17 = vadd.f32 %v703_v14, %v696_v11  ;;  %v711_v18 = vadd.f32 %v703_v14, %v697_v12 }
 0x7f6   :  { %v5617_v21 = vadd.f32 %v712_v15, %v5550_v60  ;;  %v5620_v22 = vadd.f32 %v713_v16, %v5553_v61  ;;  %v5623_v24 = vadd.f32 %v710_v17, %v5556_v63  ;;  %v5626_v26 = vadd.f32 %v711_v18, %v5559_v0  ;;  %v5171_v60 = vld [vmem:[%s7127_s5 + $0x24] ss:$8 sps:$4 sm:$0xff]  }
 0x7f7   :  { %4248 = vmatprep.mubr.msk.bf16.mxu1 %vm364_vm2, %v5171_v60  ;;  %v4240_v61 = vld [vmem:[%s7128_s6 + $0x20] sm:$0xff]  ;;  %v4241_v63 = vld [vmem:[%s7128_s6 + $0x28] sm:$0xff] }
 0x7f8   :  { %v4700_v19 = vpack.i.bf16 %v5620_v22, %v5626_v26  ;;  %v4705_v23 = vpack.i.bf16 %v5617_v21, %v5623_v24  ;;  %v5660_v5 = vpack.c.bf16 %v5620_v22, %v5626_v26  ;;  %v5665_v10 = vpack.c.bf16 %v5617_v21, %v5623_v24 }
 0x7fa   :  { %4701 = vrot.lane.b32.xlu1 %v4700_v19, %s5335_s1  ;;  %4706 = vrot.lane.b32.xlu0 %v4705_v23, %s5335_s1 }
 0x7fe   :  { %4711 = vrot.lane.b32.xlu1 %v4700_v19, %s5337_s21  ;;  %4716 = vrot.lane.b32.xlu0 %v4705_v23, %s5337_s21 }
 0x802   :  { %4721 = vrot.lane.b32.xlu1 %v4700_v19, %s5334_s19  ;;  %4726 = vrot.lane.b32.xlu0 %v4705_v23, %s5334_s19 }
 0x806   :  { %4731 = vrot.lane.b32.xlu1 %v4700_v19, %s5336_s20  ;;  %4736 = vrot.lane.b32.xlu0 %v4705_v23, %s5336_s20  ;;  %s5348_s20 = smov 12  }
 0x80a   :  { %4741 = vrot.lane.b32.xlu1 %v4700_v19, %s5338_s22  ;;  %4746 = vrot.lane.b32.xlu0 %v4705_v23, %s5338_s22  ;;  %s5343_s22 = smov 8  }
 0x80e   :  { %4751 = vrot.lane.b32.xlu1 %v4700_v19, %s5339_s2  ;;  %4756 = vrot.lane.b32.xlu0 %v4705_v23, %s5339_s2 }
 0x812   :  { %4761 = vrot.lane.b32.xlu1 %v4700_v19, %s5340_s23  ;;  %4766 = vrot.lane.b32.xlu0 %v4705_v23, %s5340_s23  ;;  %s5349_s23 = smov 116  }
 0x816   :  { %4771 = vrot.lane.b32.xlu1 %v4700_v19, %s7170_s24  ;;  %4776 = vrot.lane.b32.xlu0 %v4705_v23, %s7170_s24 }
 0x81a   :  { %818 = vperm.xlu1 %4539, %v4240_v61   ;;  %823 = vperm.xlu0 %4538, %v4241_v63  }
 0x86c   :  { %v4702_v0 = vpop.permute.xlu1 %4701  ;;  %v4707_v27 = vpop.permute.xlu0 %4706 }
 0x86d   :  { %v4704_v28 = vunpack.i.h.bf16 %v4702_v0  ;;  %v4703_v29 = vunpack.i.l.bf16 %v4702_v0  ;;  %v4709_v30 = vunpack.i.h.bf16 %v4707_v27  ;;  %v4708_v31 = vunpack.i.l.bf16 %v4707_v27 }
 0x86f   :  { %v798_v32 = vpack.c.bf16 %v4709_v30, %v4708_v31  ;;  %v799_v33 = vpack.c.bf16 %v4704_v28, %v4703_v29 }
 0x870   :  { %v4712_v34 = vpop.permute.xlu1 %4711  ;;  %v4717_v35 = vpop.permute.xlu0 %4716 }
 0x871   :  { %v4714_v36 = vunpack.i.h.bf16 %v4712_v34  ;;  %v4713_v37 = vunpack.i.l.bf16 %v4712_v34  ;;  %v4719_v42 = vunpack.i.h.bf16 %v4717_v35  ;;  %v4718_v43 = vunpack.i.l.bf16 %v4717_v35  ;;  %838 = vmatprep.subr.bf16.mxu1 %v799_v33 }
 0x872   :  { %839 = vmatpush1.bf16.msra.mxu1 %v798_v32 }
 0x873   :  { %v800_v45 = vpack.c.bf16 %v4719_v42, %v4718_v43  ;;  %v801_v46 = vpack.c.bf16 %v4714_v36, %v4713_v37  ;;  %v5173_v37 = vld [vmem:[%s7127_s5 + $0x20] ss:$8 sps:$4 sm:$0xff]  }
 0x874   :  { %v4722_v47 = vpop.permute.xlu1 %4721  ;;  %v4727_v48 = vpop.permute.xlu0 %4726 }
 0x875   :  { %v4724_v50 = vunpack.i.h.bf16 %v4722_v47  ;;  %v4723_v51 = vunpack.i.l.bf16 %v4722_v47  ;;  %v4729_v52 = vunpack.i.h.bf16 %v4727_v48  ;;  %v4728_v53 = vunpack.i.l.bf16 %v4727_v48  ;;  %840 = vmatprep.subr.bf16.mxu1 %v801_v46 }
 0x876   :  { %841 = vmatpush1.bf16.msra.mxu1 %v800_v45 }
 0x877   :  { %v802_v54 = vpack.c.bf16 %v4729_v52, %v4728_v53  ;;  %v803_v55 = vpack.c.bf16 %v4724_v50, %v4723_v51 }
 0x878   :  { %v4732_v56 = vpop.permute.xlu1 %4731  ;;  %v4737_v57 = vpop.permute.xlu0 %4736 }
 0x879   :  { %v4734_v58 = vunpack.i.h.bf16 %v4732_v56  ;;  %v4733_v59 = vunpack.i.l.bf16 %v4732_v56  ;;  %v4739_v62 = vunpack.i.h.bf16 %v4737_v57  ;;  %v4738_v1 = vunpack.i.l.bf16 %v4737_v57  ;;  %842 = vmatprep.subr.bf16.mxu1 %v803_v55 }
 0x87a   :  { %843 = vmatpush1.bf16.msra.mxu1 %v802_v54 }
 0x87b   :  { %v804_v38 = vpack.c.bf16 %v4739_v62, %v4738_v1  ;;  %v805_v39 = vpack.c.bf16 %v4734_v58, %v4733_v59 }
 0x87c   :  { %v4742_v40 = vpop.permute.xlu1 %4741  ;;  %v4747_v41 = vpop.permute.xlu0 %4746 }
 0x87d   :  { %v4744_v2 = vunpack.i.h.bf16 %v4742_v40  ;;  %v4743_v3 = vunpack.i.l.bf16 %v4742_v40  ;;  %844 = vmatprep.subr.bf16.mxu1 %v805_v39  ;;  %v4749_v6 = vunpack.i.h.bf16 %v4747_v41  ;;  %v4748_v7 = vunpack.i.l.bf16 %v4747_v41 }
 0x87e   :  { %845 = vmatpush1.bf16.msra.mxu1 %v804_v38 }
 0x87f   :  { %846 = vmatprep.subr.bf16.mxu1 %v5660_v5  ;;  %v809_v13 = vpack.c.bf16 %v4744_v2, %v4743_v3  ;;  %v808_v14 = vpack.c.bf16 %v4749_v6, %v4748_v7 }
 0x880   :  { %v4752_v8 = vpop.permute.xlu1 %4751  ;;  %v4757_v9 = vpop.permute.xlu0 %4756 }
 0x881   :  { %v4754_v11 = vunpack.i.h.bf16 %v4752_v8  ;;  %v4753_v12 = vunpack.i.l.bf16 %v4752_v8  ;;  %v4759_v15 = vunpack.i.h.bf16 %v4757_v9  ;;  %v4758_v16 = vunpack.i.l.bf16 %v4757_v9 }
 0x882   :  { %847 = vmatpush1.bf16.msra.mxu1 %v5665_v10 }
 0x883   :  { %848 = vmatprep.subr.bf16.mxu1 %v809_v13  ;;  %v811_v60 = vpack.c.bf16 %v4754_v11, %v4753_v12  ;;  %v810_v61 = vpack.c.bf16 %v4759_v15, %v4758_v16 }
 0x884   :  { %v4762_v17 = vpop.permute.xlu1 %4761  ;;  %v4767_v18 = vpop.permute.xlu0 %4766 }
 0x885   :  { %v4764_v19 = vunpack.i.h.bf16 %v4762_v17  ;;  %v4763_v23 = vunpack.i.l.bf16 %v4762_v17  ;;  %v4769_v63 = vunpack.i.h.bf16 %v4767_v18  ;;  %v4768_v0 = vunpack.i.l.bf16 %v4767_v18 }
 0x886   :  { %849 = vmatpush1.bf16.msra.mxu1 %v808_v14 }
 0x887   :  { %850 = vmatprep.subr.bf16.mxu1 %v811_v60  ;;  %v813_v31 = vpack.c.bf16 %v4764_v19, %v4763_v23  ;;  %v812_v32 = vpack.c.bf16 %v4769_v63, %v4768_v0  ;;  %v4243_v60 = vld [vmem:[%s7129_s7 + $0x28] sm:$0xff]  ;;  %v4242_v63 = vld [vmem:[%s7129_s7 + $0x20] sm:$0xff] }
 0x888   :  { %v4772_v27 = vpop.permute.xlu1 %4771  ;;  %v4777_v30 = vpop.permute.xlu0 %4776 }
 0x889   :  { %v4774_v28 = vunpack.i.h.bf16 %v4772_v27  ;;  %v4773_v29 = vunpack.i.l.bf16 %v4772_v27  ;;  %v4779_v33 = vunpack.i.h.bf16 %v4777_v30  ;;  %v4778_v34 = vunpack.i.l.bf16 %v4777_v30  ;;  %v4245_v30 = vld [vmem:[%s7130_s8 + $0x28] sm:$0xff] }
 0x88a   :  { %851 = vmatpush1.bf16.msra.mxu1 %v810_v61 }
 0x88b   :  { %852 = vmatprep.subr.bf16.mxu1 %v813_v31  ;;  %v815_v35 = vpack.c.bf16 %v4774_v28, %v4773_v29  ;;  %v814_v36 = vpack.c.bf16 %v4779_v33, %v4778_v34  ;;  %v4244_v31 = vld [vmem:[%s7130_s8 + $0x20] sm:$0xff] }
 0x88e   :  { %853 = vmatpush1.bf16.msra.mxu1 %v812_v32 }
 0x88f   :  { %854 = vmatprep.subr.bf16.mxu1 %v815_v35 }
 0x892   :  { %855 = vmatpush1.bf16.msra.mxu1 %v814_v36 }
 0x895   :  { %871 = vmatmul.mubr.bf16.vlgmr.msra.gmra.mrb[8].mxu1 %v5173_v37 }
 0x899   :  { %v819_v42 = vpop.permute.xlu1 %818  ;;  %v824_v47 = vpop.permute.xlu0 %823 }
 0x968   :  { %v872_v43 = vpop.f32.mrb[8].mxu1 }
 0x969   :  { %v873_v45 = vadd.f32 %v872_v43, %v819_v42  ;;  %v874_v46 = vpop.f32.mrb[9].mxu1 }
 0x96a   :  { %v875_v48 = vadd.f32 %v874_v46, %v819_v42  ;;  %v876_v50 = vpop.f32.mrb[10].mxu1 }
 0x96b   :  { %v881_v51 = vmax.f32 %v873_v45, 0.0  ;;  %v877_v52 = vadd.f32 %v876_v50, %v824_v47  ;;  %v878_v53 = vpop.f32.mrb[11].mxu1 }
 0x96c   :  { %v882_v54 = vmax.f32 %v875_v48, 0.0  ;;  %v879_v55 = vadd.f32 %v878_v53, %v824_v47 }
 0x96d   :  { %v883_v56 = vmax.f32 %v877_v52, 0.0  ;;  %v885_v38 = vmul.f32 %v881_v51, %v881_v51 }
 0x96e   :  { %v884_v57 = vmax.f32 %v879_v55, 0.0  ;;  %v889_v58 = vadd.f32 %v882_v54, %v881_v51  ;;  %v886_v39 = vmul.f32 %v882_v54, %v882_v54 }
 0x96f   :  { %v887_v59 = vmul.f32 %v883_v56, %v883_v56 }
 0x970   :  { %890 = vadd.xlane.f32.xlu1 %v889_v58  ;;  %v892_v62 = vadd.f32 %v884_v57, %v883_v56  ;;  %v888_v1 = vmul.f32 %v884_v57, %v884_v57  ;;  %v895_v41 = vadd.f32 %v886_v39, %v885_v38 }
 0x972   :  { %893 = vadd.xlane.f32.xlu0 %v892_v62  ;;  %v898_v40 = vadd.f32 %v888_v1, %v887_v59 }
 0x974   :  { %899 = vadd.xlane.f32.xlu1 %v898_v40 }
 0x976   :  { %896 = vadd.xlane.f32.xlu0 %v895_v41 }
 0x9fd   :  { %v891_v2 = vpop.xlane.xlu1 %890 }
 0x9fe   :  { %v901_v6 = vmul.f32 0.00390625, %v891_v2 }
 0x9ff   :  { %v894_v3 = vpop.xlane.xlu0 %893 }
 0xa00   :  { %v902_v7 = vmul.f32 0.00390625, %v894_v3  ;;  %v905_v13 = vmul.f32 %v901_v6, %v901_v6 }
 0xa01   :  { %v900_v8 = vpop.xlane.xlu1 %899 }
 0xa02   :  { %v906_v9 = vmul.f32 %v902_v7, %v902_v7  ;;  %v904_v11 = vmul.f32 0.00390625, %v900_v8 }
 0xa03   :  { %v897_v12 = vpop.xlane.xlu0 %896 }
 0xa04   :  { %v908_v14 = vsub.f32 %v904_v11, %v906_v9  ;;  %v903_v15 = vmul.f32 0.00390625, %v897_v12 }
 0xa06   :  { %v910_v16 = vmax.f32 %v908_v14, 0.0  ;;  %v907_v17 = vsub.f32 %v903_v15, %v905_v13 }
 0xa08   :  { %v912_v18 = vadd.f32 1e-05, %v910_v16  ;;  %v909_v19 = vmax.f32 %v907_v17, 0.0 }
 0xa0a   :  { %5290 = vrsqrt.f32 %v912_v18  ;;  %v911_v23 = vadd.f32 1e-05, %v909_v19 }
 0xa0c   :  { %5292 = vrsqrt.f32 %v911_v23 }
 0xa14   :  { %v5291_v61 = vpop.eup %5290 }
 0xa15   :  { %v916_v0 = vmul.f32 %v5291_v61, %v4243_v60 }
 0xa16   :  { %v5293_v27 = vpop.eup %5292 }
 0xa17   :  { %928 = vperm.xlu1 %4539, %v916_v0   ;;  %v915_v28 = vmul.f32 %v5293_v27, %v4242_v63  ;;  %v918_v29 = vmul.f32 %v916_v0, %v902_v7 }
 0xa19   :  { %923 = vperm.xlu0 %4538, %v915_v28   ;;  %v917_v32 = vmul.f32 %v915_v28, %v901_v6  ;;  %v920_v33 = vsub.f32 %v4245_v30, %v918_v29 }
 0xa1b   :  { %v919_v34 = vsub.f32 %v4244_v31, %v917_v32 }
 0xa1d   :  { %942 = vperm.xlu0 %4538, %v920_v33   ;;  %937 = vperm.xlu1 %4539, %v919_v34  }
 0xa96   :  { %v929_v35 = vpop.permute.xlu1 %928 }
 0xa97   :  { %v933_v37 = vmul.f32 %v929_v35, %v883_v56  ;;  %v934_v42 = vmul.f32 %v929_v35, %v884_v57 }
 0xa98   :  { %v924_v36 = vpop.permute.xlu0 %923 }
 0xa99   :  { %v931_v43 = vmul.f32 %v924_v36, %v881_v51  ;;  %v932_v45 = vmul.f32 %v924_v36, %v882_v54 }
 0xa9c   :  { %v943_v46 = vpop.permute.xlu0 %942  ;;  %v938_v47 = vpop.permute.xlu1 %937 }
 0xa9d   :  { %v947_v48 = vadd.f32 %v943_v46, %v933_v37  ;;  %v948_v50 = vadd.f32 %v943_v46, %v934_v42  ;;  %v945_v52 = vadd.f32 %v938_v47, %v931_v43  ;;  %v946_v53 = vadd.f32 %v938_v47, %v932_v45 }
 0xa9f   :  { %v5684_v55 = vadd.f32 %v947_v48, %v5617_v21  ;;  %v5687_v58 = vadd.f32 %v948_v50, %v5620_v22  ;;  %v5690_v59 = vadd.f32 %v945_v52, %v5623_v24  ;;  %v5693_v56 = vadd.f32 %v946_v53, %v5626_v26  ;;  %v5174_v21 = vld [vmem:[%s7127_s5 + $0x34] ss:$8 sps:$4 sm:$0xff]  }
 0xaa0   :  { %4259 = vmatprep.mubr.msk.bf16.mxu0 %vm364_vm2, %v5174_v21  ;;  %v4251_v22 = vld [vmem:[%s7128_s6 + $0x30] sm:$0xff]  ;;  %v4252_v24 = vld [vmem:[%s7128_s6 + $0x38] sm:$0xff] }
 0xaa1   :  { %v4780_v51 = vpack.i.bf16 %v5687_v58, %v5693_v56  ;;  %v4785_v54 = vpack.i.bf16 %v5684_v55, %v5690_v59  ;;  %v5727_v35 = vpack.c.bf16 %v5687_v58, %v5693_v56  ;;  %v5732_v45 = vpack.c.bf16 %v5684_v55, %v5690_v59 }
 0xaa3   :  { %4781 = vrot.lane.b32.xlu1 %v4780_v51, %s5343_s22  ;;  %4786 = vrot.lane.b32.xlu0 %v4785_v54, %s5343_s22 }
 0xaa7   :  { %4791 = vrot.lane.b32.xlu1 %v4780_v51, %s5344_s30  ;;  %4796 = vrot.lane.b32.xlu0 %v4785_v54, %s5344_s30 }
 0xaab   :  { %4801 = vrot.lane.b32.xlu1 %v4780_v51, %s5335_s1  ;;  %4806 = vrot.lane.b32.xlu0 %v4785_v54, %s5335_s1 }
 0xaaf   :  { %4811 = vrot.lane.b32.xlu1 %v4780_v51, %s5334_s19  ;;  %4816 = vrot.lane.b32.xlu0 %v4785_v54, %s5334_s19 }
 0xab3   :  { %4821 = vrot.lane.b32.xlu1 %v4780_v51, %s5339_s2  ;;  %4826 = vrot.lane.b32.xlu0 %v4785_v54, %s5339_s2 }
 0xab7   :  { %4831 = vrot.lane.b32.xlu1 %v4780_v51, %s7170_s24  ;;  %4836 = vrot.lane.b32.xlu0 %v4785_v54, %s7170_s24 }
 0xabb   :  { %4841 = vrot.lane.b32.xlu1 %v4780_v51, %s5345_s0  ;;  %4846 = vrot.lane.b32.xlu0 %v4785_v54, %s5345_s0 }
 0xabf   :  { %4851 = vrot.lane.b32.xlu1 %v4780_v51, %s5346_s3  ;;  %4856 = vrot.lane.b32.xlu0 %v4785_v54, %s5346_s3 }
 0xac3   :  { %1053 = vperm.xlu1 %4539, %v4251_v22   ;;  %1058 = vperm.xlu0 %4538, %v4252_v24  }
 0xb15   :  { %v4782_v26 = vpop.permute.xlu1 %4781  ;;  %v4787_v57 = vpop.permute.xlu0 %4786 }
 0xb16   :  { %v4784_v62 = vunpack.i.h.bf16 %v4782_v26  ;;  %v4783_v1 = vunpack.i.l.bf16 %v4782_v26  ;;  %v4789_v38 = vunpack.i.h.bf16 %v4787_v57  ;;  %v4788_v39 = vunpack.i.l.bf16 %v4787_v57 }
 0xb18   :  { %v1033_v40 = vpack.c.bf16 %v4789_v38, %v4788_v39  ;;  %v1034_v41 = vpack.c.bf16 %v4784_v62, %v4783_v1 }
 0xb19   :  { %v4792_v2 = vpop.permute.xlu1 %4791  ;;  %v4797_v3 = vpop.permute.xlu0 %4796 }
 0xb1a   :  { %v4794_v6 = vunpack.i.h.bf16 %v4792_v2  ;;  %v4793_v7 = vunpack.i.l.bf16 %v4792_v2  ;;  %v4799_v8 = vunpack.i.h.bf16 %v4797_v3  ;;  %v4798_v9 = vunpack.i.l.bf16 %v4797_v3  ;;  %1073 = vmatprep.subr.bf16.mxu0 %v1034_v41 }
 0xb1b   :  { %1074 = vmatpush1.bf16.msra.mxu0 %v1033_v40 }
 0xb1c   :  { %v1035_v11 = vpack.c.bf16 %v4799_v8, %v4798_v9  ;;  %v1036_v12 = vpack.c.bf16 %v4794_v6, %v4793_v7  ;;  %v5176_v9 = vld [vmem:[%s7127_s5 + $0x30] ss:$8 sps:$4 sm:$0xff]  }
 0xb1d   :  { %v4802_v13 = vpop.permute.xlu1 %4801  ;;  %v4807_v14 = vpop.permute.xlu0 %4806 }
 0xb1e   :  { %v4804_v15 = vunpack.i.h.bf16 %v4802_v13  ;;  %v4803_v16 = vunpack.i.l.bf16 %v4802_v13  ;;  %v4809_v17 = vunpack.i.h.bf16 %v4807_v14  ;;  %v4808_v18 = vunpack.i.l.bf16 %v4807_v14  ;;  %1075 = vmatprep.subr.bf16.mxu0 %v1036_v12 }
 0xb1f   :  { %1076 = vmatpush1.bf16.msra.mxu0 %v1035_v11 }
 0xb20   :  { %v1037_v19 = vpack.c.bf16 %v4809_v17, %v4808_v18  ;;  %v1038_v23 = vpack.c.bf16 %v4804_v15, %v4803_v16 }
 0xb21   :  { %v4812_v60 = vpop.permute.xlu1 %4811  ;;  %v4817_v61 = vpop.permute.xlu0 %4816 }
 0xb22   :  { %v4814_v63 = vunpack.i.h.bf16 %v4812_v60  ;;  %v4813_v0 = vunpack.i.l.bf16 %v4812_v60  ;;  %v4819_v27 = vunpack.i.h.bf16 %v4817_v61  ;;  %v4818_v28 = vunpack.i.l.bf16 %v4817_v61  ;;  %1077 = vmatprep.subr.bf16.mxu0 %v1038_v23 }
 0xb23   :  { %1078 = vmatpush1.bf16.msra.mxu0 %v1037_v19 }
 0xb24   :  { %v1039_v29 = vpack.c.bf16 %v4819_v27, %v4818_v28  ;;  %v1040_v30 = vpack.c.bf16 %v4814_v63, %v4813_v0 }
 0xb25   :  { %v4822_v31 = vpop.permute.xlu1 %4821  ;;  %v4827_v32 = vpop.permute.xlu0 %4826 }
 0xb26   :  { %v4824_v33 = vunpack.i.h.bf16 %v4822_v31  ;;  %v4823_v34 = vunpack.i.l.bf16 %v4822_v31  ;;  %1079 = vmatprep.subr.bf16.mxu0 %v1040_v30  ;;  %v4829_v36 = vunpack.i.h.bf16 %v4827_v32  ;;  %v4828_v37 = vunpack.i.l.bf16 %v4827_v32 }
 0xb27   :  { %1080 = vmatpush1.bf16.msra.mxu0 %v1039_v29 }
 0xb28   :  { %1081 = vmatprep.subr.bf16.mxu0 %v5727_v35  ;;  %v1044_v48 = vpack.c.bf16 %v4824_v33, %v4823_v34  ;;  %v1043_v50 = vpack.c.bf16 %v4829_v36, %v4828_v37 }
 0xb29   :  { %v4832_v42 = vpop.permute.xlu1 %4831  ;;  %v4837_v43 = vpop.permute.xlu0 %4836 }
 0xb2a   :  { %v4834_v46 = vunpack.i.h.bf16 %v4832_v42  ;;  %v4833_v47 = vunpack.i.l.bf16 %v4832_v42  ;;  %v4839_v52 = vunpack.i.h.bf16 %v4837_v43  ;;  %v4838_v53 = vunpack.i.l.bf16 %v4837_v43 }
 0xb2b   :  { %1082 = vmatpush1.bf16.msra.mxu0 %v5732_v45 }
 0xb2c   :  { %1083 = vmatprep.subr.bf16.mxu0 %v1044_v48  ;;  %v1046_v24 = vpack.c.bf16 %v4834_v46, %v4833_v47  ;;  %v1045_v26 = vpack.c.bf16 %v4839_v52, %v4838_v53 }
 0xb2d   :  { %v4842_v51 = vpop.permute.xlu1 %4841  ;;  %v4847_v54 = vpop.permute.xlu0 %4846 }
 0xb2e   :  { %v4844_v21 = vunpack.i.h.bf16 %v4842_v51  ;;  %v4843_v22 = vunpack.i.l.bf16 %v4842_v51  ;;  %v4849_v57 = vunpack.i.h.bf16 %v4847_v54  ;;  %v4848_v62 = vunpack.i.l.bf16 %v4847_v54 }
 0xb2f   :  { %1084 = vmatpush1.bf16.msra.mxu0 %v1043_v50 }
 0xb30   :  { %1085 = vmatprep.subr.bf16.mxu0 %v1046_v24  ;;  %v1048_v41 = vpack.c.bf16 %v4844_v21, %v4843_v22  ;;  %v1047_v2 = vpack.c.bf16 %v4849_v57, %v4848_v62  ;;  %v4254_v57 = vld [vmem:[%s7129_s7 + $0x38] sm:$0xff] }
 0xb31   :  { %v4852_v1 = vpop.permute.xlu1 %4851  ;;  %v4857_v40 = vpop.permute.xlu0 %4856 }
 0xb32   :  { %v4854_v38 = vunpack.i.h.bf16 %v4852_v1  ;;  %v4853_v39 = vunpack.i.l.bf16 %v4852_v1  ;;  %v4859_v3 = vunpack.i.h.bf16 %v4857_v40  ;;  %v4858_v6 = vunpack.i.l.bf16 %v4857_v40  ;;  %v4253_v1 = vld [vmem:[%s7129_s7 + $0x30] sm:$0xff] }
 0xb33   :  { %1086 = vmatpush1.bf16.msra.mxu0 %v1045_v26 }
 0xb34   :  { %1087 = vmatprep.subr.bf16.mxu0 %v1048_v41  ;;  %v1050_v7 = vpack.c.bf16 %v4854_v38, %v4853_v39  ;;  %v1049_v8 = vpack.c.bf16 %v4859_v3, %v4858_v6  ;;  %v4255_v3 = vld [vmem:[%s7130_s8 + $0x30] sm:$0xff] }
 0xb37   :  { %1088 = vmatpush1.bf16.msra.mxu0 %v1047_v2  ;;  %v4256_v2 = vld [vmem:[%s7130_s8 + $0x38] sm:$0xff] }
 0xb38   :  { %1089 = vmatprep.subr.bf16.mxu0 %v1050_v7 }
 0xb3b   :  { %1090 = vmatpush1.bf16.msra.mxu0 %v1049_v8 }
 0xb3e   :  { %1106 = vmatmul.mubr.bf16.vlgmr.msra.gmra.mrb[4].mxu0 %v5176_v9 }
 0xb42   :  { %v1054_v11 = vpop.permute.xlu1 %1053  ;;  %v1059_v15 = vpop.permute.xlu0 %1058 }
 0xc11   :  { %v1107_v12 = vpop.f32.mrb[4].mxu0 }
 0xc12   :  { %v1108_v13 = vadd.f32 %v1107_v12, %v1054_v11  ;;  %v1109_v14 = vpop.f32.mrb[5].mxu0 }
 0xc13   :  { %v1110_v16 = vadd.f32 %v1109_v14, %v1054_v11  ;;  %v1111_v17 = vpop.f32.mrb[6].mxu0 }
 0xc14   :  { %v1116_v18 = vmax.f32 %v1108_v13, 0.0  ;;  %v1112_v19 = vadd.f32 %v1111_v17, %v1059_v15  ;;  %v1113_v23 = vpop.f32.mrb[7].mxu0 }
 0xc15   :  { %v1117_v60 = vmax.f32 %v1110_v16, 0.0  ;;  %v1114_v61 = vadd.f32 %v1113_v23, %v1059_v15 }
 0xc16   :  { %v1118_v63 = vmax.f32 %v1112_v19, 0.0  ;;  %v1120_v29 = vmul.f32 %v1116_v18, %v1116_v18 }
 0xc17   :  { %v1119_v0 = vmax.f32 %v1114_v61, 0.0  ;;  %v1124_v27 = vadd.f32 %v1117_v60, %v1116_v18  ;;  %v1121_v30 = vmul.f32 %v1117_v60, %v1117_v60 }
 0xc18   :  { %v1122_v28 = vmul.f32 %v1118_v63, %v1118_v63 }
 0xc19   :  { %v1123_v31 = vmul.f32 %v1119_v0, %v1119_v0  ;;  %1125 = vadd.xlane.f32.xlu1 %v1124_v27  ;;  %v1127_v32 = vadd.f32 %v1119_v0, %v1118_v63  ;;  %v1130_v34 = vadd.f32 %v1121_v30, %v1120_v29 }
 0xc1b   :  { %1128 = vadd.xlane.f32.xlu0 %v1127_v32  ;;  %v1133_v33 = vadd.f32 %v1123_v31, %v1122_v28 }
 0xc1d   :  { %1134 = vadd.xlane.f32.xlu1 %v1133_v33 }
 0xc1f   :  { %1131 = vadd.xlane.f32.xlu0 %v1130_v34 }
 0xca6   :  { %v1126_v36 = vpop.xlane.xlu1 %1125 }
 0xca7   :  { %v1136_v42 = vmul.f32 0.00390625, %v1126_v36 }
 0xca8   :  { %v1129_v37 = vpop.xlane.xlu0 %1128 }
 0xca9   :  { %v1137_v43 = vmul.f32 0.00390625, %v1129_v37  ;;  %v1140_v52 = vmul.f32 %v1136_v42, %v1136_v42 }
 0xcaa   :  { %v1135_v46 = vpop.xlane.xlu1 %1134 }
 0xcab   :  { %v1141_v47 = vmul.f32 %v1137_v43, %v1137_v43  ;;  %v1139_v48 = vmul.f32 0.00390625, %v1135_v46 }
 0xcac   :  { %v1132_v50 = vpop.xlane.xlu0 %1131 }
 0xcad   :  { %v1143_v53 = vsub.f32 %v1139_v48, %v1141_v47  ;;  %v1138_v51 = vmul.f32 0.00390625, %v1132_v50 }
 0xcaf   :  { %v1145_v54 = vmax.f32 %v1143_v53, 0.0  ;;  %v1142_v21 = vsub.f32 %v1138_v51, %v1140_v52 }
 0xcb1   :  { %v1147_v22 = vadd.f32 1e-05, %v1145_v54  ;;  %v1144_v24 = vmax.f32 %v1142_v21, 0.0 }
 0xcb3   :  { %5294 = vrsqrt.f32 %v1147_v22  ;;  %v1146_v26 = vadd.f32 1e-05, %v1144_v24 }
 0xcb5   :  { %5296 = vrsqrt.f32 %v1146_v26 }
 0xcbd   :  { %v5295_v62 = vpop.eup %5294 }
 0xcbe   :  { %v1151_v38 = vmul.f32 %v5295_v62, %v4254_v57 }
 0xcbf   :  { %v5297_v39 = vpop.eup %5296 }
 0xcc0   :  { %1163 = vperm.xlu1 %4539, %v1151_v38   ;;  %v1150_v40 = vmul.f32 %v5297_v39, %v4253_v1  ;;  %v1153_v41 = vmul.f32 %v1151_v38, %v1137_v43 }
 0xcc2   :  { %1158 = vperm.xlu0 %4538, %v1150_v40   ;;  %v1152_v6 = vmul.f32 %v1150_v40, %v1136_v42  ;;  %v1155_v7 = vsub.f32 %v4256_v2, %v1153_v41 }
 0xcc4   :  { %v1154_v8 = vsub.f32 %v4255_v3, %v1152_v6 }
 0xcc6   :  { %1177 = vperm.xlu0 %4538, %v1155_v7   ;;  %1172 = vperm.xlu1 %4539, %v1154_v8  }
 0xd3f   :  { %v1164_v9 = vpop.permute.xlu1 %1163 }
 0xd40   :  { %v1168_v12 = vmul.f32 %v1164_v9, %v1118_v63  ;;  %v1169_v13 = vmul.f32 %v1164_v9, %v1119_v0 }
 0xd41   :  { %v1159_v11 = vpop.permute.xlu0 %1158 }
 0xd42   :  { %v1166_v14 = vmul.f32 %v1159_v11, %v1116_v18  ;;  %v1167_v15 = vmul.f32 %v1159_v11, %v1117_v60 }
 0xd45   :  { %v1178_v16 = vpop.permute.xlu0 %1177  ;;  %v1173_v17 = vpop.permute.xlu1 %1172 }
 0xd46   :  { %v1182_v19 = vadd.f32 %v1178_v16, %v1168_v12  ;;  %v1183_v23 = vadd.f32 %v1178_v16, %v1169_v13  ;;  %v1180_v61 = vadd.f32 %v1173_v17, %v1166_v14  ;;  %v1181_v27 = vadd.f32 %v1173_v17, %v1167_v15 }
 0xd48   :  { %v5751_v28 = vadd.f32 %v1182_v19, %v5684_v55  ;;  %v5754_v29 = vadd.f32 %v1183_v23, %v5687_v58  ;;  %v5757_v30 = vadd.f32 %v1180_v61, %v5690_v59  ;;  %v5760_v63 = vadd.f32 %v1181_v27, %v5693_v56  ;;  %v5177_v55 = vld [vmem:[%s7127_s5 + $0x44] ss:$8 sps:$4 sm:$0xff]  }
 0xd49   :  { %4270 = vmatprep.mubr.msk.bf16.mxu1 %vm364_vm2, %v5177_v55  ;;  %v4262_v58 = vld [vmem:[%s7128_s6 + $0x40] sm:$0xff]  ;;  %v4263_v59 = vld [vmem:[%s7128_s6 + $0x48] sm:$0xff] }
 0xd4a   :  { %v4860_v18 = vpack.i.bf16 %v5754_v29, %v5760_v63  ;;  %v4865_v60 = vpack.i.bf16 %v5751_v28, %v5757_v30  ;;  %v5794_v12 = vpack.c.bf16 %v5754_v29, %v5760_v63  ;;  %v5799_v17 = vpack.c.bf16 %v5751_v28, %v5757_v30 }
 0xd4c   :  { %4861 = vrot.lane.b32.xlu1 %v4860_v18, %s5343_s22  ;;  %4866 = vrot.lane.b32.xlu0 %v4865_v60, %s5343_s22 }
 0xd50   :  { %4871 = vrot.lane.b32.xlu1 %v4860_v18, %s5344_s30  ;;  %4876 = vrot.lane.b32.xlu0 %v4865_v60, %s5344_s30 }
 0xd54   :  { %4881 = vrot.lane.b32.xlu1 %v4860_v18, %s5335_s1  ;;  %4886 = vrot.lane.b32.xlu0 %v4865_v60, %s5335_s1 }
 0xd58   :  { %4891 = vrot.lane.b32.xlu1 %v4860_v18, %s5334_s19  ;;  %4896 = vrot.lane.b32.xlu0 %v4865_v60, %s5334_s19 }
 0xd5c   :  { %4901 = vrot.lane.b32.xlu1 %v4860_v18, %s5339_s2  ;;  %4906 = vrot.lane.b32.xlu0 %v4865_v60, %s5339_s2  ;;  %s5347_s2 = smov 16  }
 0xd60   :  { %4911 = vrot.lane.b32.xlu1 %v4860_v18, %s7170_s24  ;;  %4916 = vrot.lane.b32.xlu0 %v4865_v60, %s7170_s24 }
 0xd64   :  { %4921 = vrot.lane.b32.xlu1 %v4860_v18, %s5345_s0  ;;  %4926 = vrot.lane.b32.xlu0 %v4865_v60, %s5345_s0 }
 0xd68   :  { %4931 = vrot.lane.b32.xlu1 %v4860_v18, %s5346_s3  ;;  %4936 = vrot.lane.b32.xlu0 %v4865_v60, %s5346_s3 }
 0xd6c   :  { %1288 = vperm.xlu1 %4539, %v4262_v58   ;;  %1293 = vperm.xlu0 %4538, %v4263_v59  }
 0xdbe   :  { %v4862_v56 = vpop.permute.xlu1 %4861  ;;  %v4867_v0 = vpop.permute.xlu0 %4866 }
 0xdbf   :  { %v4864_v31 = vunpack.i.h.bf16 %v4862_v56  ;;  %v4863_v32 = vunpack.i.l.bf16 %v4862_v56  ;;  %v4869_v33 = vunpack.i.h.bf16 %v4867_v0  ;;  %v4868_v34 = vunpack.i.l.bf16 %v4867_v0 }
 0xdc1   :  { %v1268_v36 = vpack.c.bf16 %v4869_v33, %v4868_v34  ;;  %v1269_v37 = vpack.c.bf16 %v4864_v31, %v4863_v32 }
 0xdc2   :  { %v4872_v42 = vpop.permute.xlu1 %4871  ;;  %v4877_v43 = vpop.permute.xlu0 %4876 }
 0xdc3   :  { %v4874_v46 = vunpack.i.h.bf16 %v4872_v42  ;;  %v4873_v47 = vunpack.i.l.bf16 %v4872_v42  ;;  %v4879_v48 = vunpack.i.h.bf16 %v4877_v43  ;;  %v4878_v50 = vunpack.i.l.bf16 %v4877_v43  ;;  %1308 = vmatprep.subr.bf16.mxu1 %v1269_v37 }
 0xdc4   :  { %1309 = vmatpush1.bf16.msra.mxu1 %v1268_v36 }
 0xdc5   :  { %v1270_v52 = vpack.c.bf16 %v4879_v48, %v4878_v50  ;;  %v1271_v53 = vpack.c.bf16 %v4874_v46, %v4873_v47 }
 0xdc6   :  { %v4882_v51 = vpop.permute.xlu1 %4881  ;;  %v4887_v54 = vpop.permute.xlu0 %4886 }
 0xdc7   :  { %v4884_v21 = vunpack.i.h.bf16 %v4882_v51  ;;  %v4883_v22 = vunpack.i.l.bf16 %v4882_v51  ;;  %v4889_v24 = vunpack.i.h.bf16 %v4887_v54  ;;  %v4888_v26 = vunpack.i.l.bf16 %v4887_v54  ;;  %1310 = vmatprep.subr.bf16.mxu1 %v1271_v53  ;;  %v5179_v53 = vld [vmem:[%s7127_s5 + $0x40] ss:$8 sps:$4 sm:$0xff]  }
 0xdc8   :  { %1311 = vmatpush1.bf16.msra.mxu1 %v1270_v52 }
 0xdc9   :  { %v1272_v57 = vpack.c.bf16 %v4889_v24, %v4888_v26  ;;  %v1273_v62 = vpack.c.bf16 %v4884_v21, %v4883_v22 }
 0xdca   :  { %v4892_v1 = vpop.permute.xlu1 %4891  ;;  %v4897_v38 = vpop.permute.xlu0 %4896 }
 0xdcb   :  { %v4894_v39 = vunpack.i.h.bf16 %v4892_v1  ;;  %v4893_v40 = vunpack.i.l.bf16 %v4892_v1  ;;  %v4899_v41 = vunpack.i.h.bf16 %v4897_v38  ;;  %v4898_v2 = vunpack.i.l.bf16 %v4897_v38  ;;  %1312 = vmatprep.subr.bf16.mxu1 %v1273_v62 }
 0xdcc   :  { %1313 = vmatpush1.bf16.msra.mxu1 %v1272_v57 }
 0xdcd   :  { %v1274_v3 = vpack.c.bf16 %v4899_v41, %v4898_v2  ;;  %v1275_v6 = vpack.c.bf16 %v4894_v39, %v4893_v40 }
 0xdce   :  { %v4902_v7 = vpop.permute.xlu1 %4901  ;;  %v4907_v8 = vpop.permute.xlu0 %4906 }
 0xdcf   :  { %v4904_v9 = vunpack.i.h.bf16 %v4902_v7  ;;  %v4903_v11 = vunpack.i.l.bf16 %v4902_v7  ;;  %1314 = vmatprep.subr.bf16.mxu1 %v1275_v6  ;;  %v4909_v13 = vunpack.i.h.bf16 %v4907_v8  ;;  %v4908_v14 = vunpack.i.l.bf16 %v4907_v8 }
 0xdd0   :  { %1315 = vmatpush1.bf16.msra.mxu1 %v1274_v3 }
 0xdd1   :  { %1316 = vmatprep.subr.bf16.mxu1 %v5794_v12  ;;  %v1279_v61 = vpack.c.bf16 %v4904_v9, %v4903_v11  ;;  %v1278_v27 = vpack.c.bf16 %v4909_v13, %v4908_v14 }
 0xdd2   :  { %v4912_v15 = vpop.permute.xlu1 %4911  ;;  %v4917_v16 = vpop.permute.xlu0 %4916 }
 0xdd3   :  { %v4914_v19 = vunpack.i.h.bf16 %v4912_v15  ;;  %v4913_v23 = vunpack.i.l.bf16 %v4912_v15  ;;  %v4919_v18 = vunpack.i.h.bf16 %v4917_v16  ;;  %v4918_v60 = vunpack.i.l.bf16 %v4917_v16 }
 0xdd4   :  { %1317 = vmatpush1.bf16.msra.mxu1 %v5799_v17 }
 0xdd5   :  { %1318 = vmatprep.subr.bf16.mxu1 %v1279_v61  ;;  %v1281_v0 = vpack.c.bf16 %v4914_v19, %v4913_v23  ;;  %v1280_v31 = vpack.c.bf16 %v4919_v18, %v4918_v60 }
 0xdd6   :  { %v4922_v55 = vpop.permute.xlu1 %4921  ;;  %v4927_v58 = vpop.permute.xlu0 %4926 }
 0xdd7   :  { %v4924_v59 = vunpack.i.h.bf16 %v4922_v55  ;;  %v4923_v56 = vunpack.i.l.bf16 %v4922_v55  ;;  %v4929_v32 = vunpack.i.h.bf16 %v4927_v58  ;;  %v4928_v33 = vunpack.i.l.bf16 %v4927_v58 }
 0xdd8   :  { %1319 = vmatpush1.bf16.msra.mxu1 %v1278_v27 }
 0xdd9   :  { %1320 = vmatprep.subr.bf16.mxu1 %v1281_v0  ;;  %v1283_v43 = vpack.c.bf16 %v4924_v59, %v4923_v56  ;;  %v1282_v46 = vpack.c.bf16 %v4929_v32, %v4928_v33 }
 0xdda   :  { %v4932_v34 = vpop.permute.xlu1 %4931  ;;  %v4937_v42 = vpop.permute.xlu0 %4936 }
 0xddb   :  { %v4934_v36 = vunpack.i.h.bf16 %v4932_v34  ;;  %v4933_v37 = vunpack.i.l.bf16 %v4932_v34  ;;  %v4939_v47 = vunpack.i.h.bf16 %v4937_v42  ;;  %v4938_v48 = vunpack.i.l.bf16 %v4937_v42  ;;  %v4265_v34 = vld [vmem:[%s7129_s7 + $0x48] sm:$0xff] }
 0xddc   :  { %1321 = vmatpush1.bf16.msra.mxu1 %v1280_v31 }
 0xddd   :  { %1322 = vmatprep.subr.bf16.mxu1 %v1283_v43  ;;  %v1285_v50 = vpack.c.bf16 %v4934_v36, %v4933_v37  ;;  %v1284_v52 = vpack.c.bf16 %v4939_v47, %v4938_v48  ;;  %v4264_v37 = vld [vmem:[%s7129_s7 + $0x40] sm:$0xff]  ;;  %v4267_v48 = vld [vmem:[%s7130_s8 + $0x48] sm:$0xff] }
 0xde0   :  { %1323 = vmatpush1.bf16.msra.mxu1 %v1282_v46 }
 0xde1   :  { %1324 = vmatprep.subr.bf16.mxu1 %v1285_v50  ;;  %v4266_v50 = vld [vmem:[%s7130_s8 + $0x40] sm:$0xff] }
 0xde4   :  { %1325 = vmatpush1.bf16.msra.mxu1 %v1284_v52 }
 0xde7   :  { %1341 = vmatmul.mubr.bf16.vlgmr.msra.gmra.mrb[12].mxu1 %v5179_v53 }
 0xdeb   :  { %v1289_v51 = vpop.permute.xlu1 %1288  ;;  %v1294_v24 = vpop.permute.xlu0 %1293 }
 0xeba   :  { %v1342_v54 = vpop.f32.mrb[12].mxu1 }
 0xebb   :  { %v1343_v21 = vadd.f32 %v1342_v54, %v1289_v51  ;;  %v1344_v22 = vpop.f32.mrb[13].mxu1 }
 0xebc   :  { %v1345_v26 = vadd.f32 %v1344_v22, %v1289_v51  ;;  %v1346_v57 = vpop.f32.mrb[14].mxu1 }
 0xebd   :  { %v1351_v62 = vmax.f32 %v1343_v21, 0.0  ;;  %v1347_v1 = vadd.f32 %v1346_v57, %v1294_v24  ;;  %v1348_v38 = vpop.f32.mrb[15].mxu1 }
 0xebe   :  { %v1352_v39 = vmax.f32 %v1345_v26, 0.0  ;;  %v1349_v40 = vadd.f32 %v1348_v38, %v1294_v24 }
 0xebf   :  { %v1353_v41 = vmax.f32 %v1347_v1, 0.0  ;;  %v1355_v7 = vmul.f32 %v1351_v62, %v1351_v62 }
 0xec0   :  { %v1354_v2 = vmax.f32 %v1349_v40, 0.0  ;;  %v1359_v3 = vadd.f32 %v1352_v39, %v1351_v62  ;;  %v1356_v8 = vmul.f32 %v1352_v39, %v1352_v39 }
 0xec1   :  { %v1357_v6 = vmul.f32 %v1353_v41, %v1353_v41 }
 0xec2   :  { %v1358_v9 = vmul.f32 %v1354_v2, %v1354_v2  ;;  %1360 = vadd.xlane.f32.xlu1 %v1359_v3  ;;  %v1362_v11 = vadd.f32 %v1354_v2, %v1353_v41  ;;  %v1365_v14 = vadd.f32 %v1356_v8, %v1355_v7 }
 0xec4   :  { %1363 = vadd.xlane.f32.xlu0 %v1362_v11  ;;  %v1368_v13 = vadd.f32 %v1358_v9, %v1357_v6 }
 0xec6   :  { %1369 = vadd.xlane.f32.xlu1 %v1368_v13 }
 0xec8   :  { %1366 = vadd.xlane.f32.xlu0 %v1365_v14 }
 0xf4f   :  { %v1361_v15 = vpop.xlane.xlu1 %1360 }
 0xf50   :  { %v1371_v19 = vmul.f32 0.00390625, %v1361_v15 }
 0xf51   :  { %v1364_v16 = vpop.xlane.xlu0 %1363 }
 0xf52   :  { %v1372_v23 = vmul.f32 0.00390625, %v1364_v16  ;;  %v1375_v55 = vmul.f32 %v1371_v19, %v1371_v19 }
 0xf53   :  { %v1370_v61 = vpop.xlane.xlu1 %1369 }
 0xf54   :  { %v1376_v27 = vmul.f32 %v1372_v23, %v1372_v23  ;;  %v1374_v18 = vmul.f32 0.00390625, %v1370_v61 }
 0xf55   :  { %v1367_v60 = vpop.xlane.xlu0 %1366 }
 0xf56   :  { %v1378_v58 = vsub.f32 %v1374_v18, %v1376_v27  ;;  %v1373_v59 = vmul.f32 0.00390625, %v1367_v60 }
 0xf58   :  { %v1380_v56 = vmax.f32 %v1378_v58, 0.0  ;;  %v1377_v0 = vsub.f32 %v1373_v59, %v1375_v55 }
 0xf5a   :  { %v1382_v31 = vadd.f32 1e-05, %v1380_v56  ;;  %v1379_v32 = vmax.f32 %v1377_v0, 0.0 }
 0xf5c   :  { %5298 = vrsqrt.f32 %v1382_v31  ;;  %v1381_v33 = vadd.f32 1e-05, %v1379_v32 }
 0xf5e   :  { %5300 = vrsqrt.f32 %v1381_v33 }
 0xf66   :  { %v5299_v36 = vpop.eup %5298 }
 0xf67   :  { %v1386_v42 = vmul.f32 %v5299_v36, %v4265_v34 }
 0xf68   :  { %v5301_v43 = vpop.eup %5300 }
 0xf69   :  { %1398 = vperm.xlu1 %4539, %v1386_v42   ;;  %v1385_v46 = vmul.f32 %v5301_v43, %v4264_v37  ;;  %v1388_v47 = vmul.f32 %v1386_v42, %v1372_v23 }
 0xf6b   :  { %1393 = vperm.xlu0 %4538, %v1385_v46   ;;  %v1387_v52 = vmul.f32 %v1385_v46, %v1371_v19  ;;  %v1390_v53 = vsub.f32 %v4267_v48, %v1388_v47 }
 0xf6d   :  { %v1389_v51 = vsub.f32 %v4266_v50, %v1387_v52 }
 0xf6f   :  { %1412 = vperm.xlu0 %4538, %v1390_v53   ;;  %1407 = vperm.xlu1 %4539, %v1389_v51  }
 0xfe8   :  { %v1399_v54 = vpop.permute.xlu1 %1398 }
 0xfe9   :  { %v1403_v22 = vmul.f32 %v1399_v54, %v1353_v41  ;;  %v1404_v24 = vmul.f32 %v1399_v54, %v1354_v2 }
 0xfea   :  { %v1394_v21 = vpop.permute.xlu0 %1393 }
 0xfeb   :  { %v1401_v26 = vmul.f32 %v1394_v21, %v1351_v62  ;;  %v1402_v57 = vmul.f32 %v1394_v21, %v1352_v39 }
 0xfee   :  { %v1413_v1 = vpop.permute.xlu0 %1412  ;;  %v1408_v38 = vpop.permute.xlu1 %1407 }
 0xfef   :  { %v1417_v40 = vadd.f32 %v1413_v1, %v1403_v22  ;;  %v1418_v3 = vadd.f32 %v1413_v1, %v1404_v24  ;;  %v1415_v6 = vadd.f32 %v1408_v38, %v1401_v26  ;;  %v1416_v7 = vadd.f32 %v1408_v38, %v1402_v57 }
 0xff1   :  { %v5818_v8 = vadd.f32 %v1417_v40, %v5751_v28  ;;  %v5821_v9 = vadd.f32 %v1418_v3, %v5754_v29  ;;  %v5824_v11 = vadd.f32 %v1415_v6, %v5757_v30  ;;  %v5827_v41 = vadd.f32 %v1416_v7, %v5760_v63  ;;  %v5180_v28 = vld [vmem:[%s7127_s5 + $0x54] ss:$8 sps:$4 sm:$0xff]  }
 0xff2   :  { %4281 = vmatprep.mubr.msk.bf16.mxu0 %vm364_vm2, %v5180_v28  ;;  %v4273_v29 = vld [vmem:[%s7128_s6 + $0x50] sm:$0xff]  ;;  %v4274_v30 = vld [vmem:[%s7128_s6 + $0x58] sm:$0xff] }
 0xff3   :  { %v4940_v62 = vpack.i.bf16 %v5821_v9, %v5827_v41  ;;  %v4945_v39 = vpack.i.bf16 %v5818_v8, %v5824_v11  ;;  %v5861_v26 = vpack.c.bf16 %v5821_v9, %v5827_v41  ;;  %v5866_v3 = vpack.c.bf16 %v5818_v8, %v5824_v11 }
 0xff5   :  { %4941 = vrot.lane.b32.xlu1 %v4940_v62, %s5347_s2  ;;  %4946 = vrot.lane.b32.xlu0 %v4945_v39, %s5347_s2 }
 0xff9   :  { %4951 = vrot.lane.b32.xlu1 %v4940_v62, %s5348_s20  ;;  %4956 = vrot.lane.b32.xlu0 %v4945_v39, %s5348_s20 }
 0xffd   :  { %4961 = vrot.lane.b32.xlu1 %v4940_v62, %s5343_s22  ;;  %4966 = vrot.lane.b32.xlu0 %v4945_v39, %s5343_s22 }
0x1001   :  { %4971 = vrot.lane.b32.xlu1 %v4940_v62, %s5335_s1  ;;  %4976 = vrot.lane.b32.xlu0 %v4945_v39, %s5335_s1 }
0x1005   :  { %4981 = vrot.lane.b32.xlu1 %v4940_v62, %s7170_s24  ;;  %4986 = vrot.lane.b32.xlu0 %v4945_v39, %s7170_s24 }
0x1009   :  { %4991 = vrot.lane.b32.xlu1 %v4940_v62, %s5346_s3  ;;  %4996 = vrot.lane.b32.xlu0 %v4945_v39, %s5346_s3 }
0x100d   :  { %5001 = vrot.lane.b32.xlu1 %v4940_v62, %s5349_s23  ;;  %5006 = vrot.lane.b32.xlu0 %v4945_v39, %s5349_s23 }
0x1011   :  { %5011 = vrot.lane.b32.xlu1 %v4940_v62, %s5350_s4  ;;  %5016 = vrot.lane.b32.xlu0 %v4945_v39, %s5350_s4 }
0x1015   :  { %1523 = vperm.xlu1 %4539, %v4273_v29   ;;  %1528 = vperm.xlu0 %4538, %v4274_v30  }
0x1067   :  { %v4942_v63 = vpop.permute.xlu1 %4941  ;;  %v4947_v2 = vpop.permute.xlu0 %4946 }
0x1068   :  { %v4944_v13 = vunpack.i.h.bf16 %v4942_v63  ;;  %v4943_v14 = vunpack.i.l.bf16 %v4942_v63  ;;  %v4949_v15 = vunpack.i.h.bf16 %v4947_v2  ;;  %v4948_v16 = vunpack.i.l.bf16 %v4947_v2 }
0x106a   :  { %v1503_v19 = vpack.c.bf16 %v4949_v15, %v4948_v16  ;;  %v1504_v23 = vpack.c.bf16 %v4944_v13, %v4943_v14 }
0x106b   :  { %v4952_v61 = vpop.permute.xlu1 %4951  ;;  %v4957_v27 = vpop.permute.xlu0 %4956 }
0x106c   :  { %v4954_v18 = vunpack.i.h.bf16 %v4952_v61  ;;  %v4953_v60 = vunpack.i.l.bf16 %v4952_v61  ;;  %v4959_v55 = vunpack.i.h.bf16 %v4957_v27  ;;  %v4958_v58 = vunpack.i.l.bf16 %v4957_v27  ;;  %1543 = vmatprep.subr.bf16.mxu0 %v1504_v23 }
0x106d   :  { %1544 = vmatpush1.bf16.msra.mxu0 %v1503_v19 }
0x106e   :  { %v1505_v59 = vpack.c.bf16 %v4959_v55, %v4958_v58  ;;  %v1506_v56 = vpack.c.bf16 %v4954_v18, %v4953_v60 }
0x106f   :  { %v4962_v0 = vpop.permute.xlu1 %4961  ;;  %v4967_v31 = vpop.permute.xlu0 %4966 }
0x1070   :  { %v4964_v32 = vunpack.i.h.bf16 %v4962_v0  ;;  %v4963_v33 = vunpack.i.l.bf16 %v4962_v0  ;;  %v4969_v34 = vunpack.i.h.bf16 %v4967_v31  ;;  %v4968_v36 = vunpack.i.l.bf16 %v4967_v31  ;;  %1545 = vmatprep.subr.bf16.mxu0 %v1506_v56  ;;  %v5182_v31 = vld [vmem:[%s7127_s5 + $0x50] ss:$8 sps:$4 sm:$0xff]  }
0x1071   :  { %1546 = vmatpush1.bf16.msra.mxu0 %v1505_v59 }
0x1072   :  { %v1507_v37 = vpack.c.bf16 %v4969_v34, %v4968_v36  ;;  %v1508_v42 = vpack.c.bf16 %v4964_v32, %v4963_v33 }
0x1073   :  { %v4972_v43 = vpop.permute.xlu1 %4971  ;;  %v4977_v46 = vpop.permute.xlu0 %4976 }
0x1074   :  { %v4974_v47 = vunpack.i.h.bf16 %v4972_v43  ;;  %v4973_v48 = vunpack.i.l.bf16 %v4972_v43  ;;  %v4979_v50 = vunpack.i.h.bf16 %v4977_v46  ;;  %v4978_v52 = vunpack.i.l.bf16 %v4977_v46  ;;  %1547 = vmatprep.subr.bf16.mxu0 %v1508_v42 }
0x1075   :  { %1548 = vmatpush1.bf16.msra.mxu0 %v1507_v37 }
0x1076   :  { %v1509_v53 = vpack.c.bf16 %v4979_v50, %v4978_v52  ;;  %v1510_v51 = vpack.c.bf16 %v4974_v47, %v4973_v48 }
0x1077   :  { %v4982_v54 = vpop.permute.xlu1 %4981  ;;  %v4987_v21 = vpop.permute.xlu0 %4986 }
0x1078   :  { %v4984_v22 = vunpack.i.h.bf16 %v4982_v54  ;;  %v4983_v24 = vunpack.i.l.bf16 %v4982_v54  ;;  %1549 = vmatprep.subr.bf16.mxu0 %v1510_v51  ;;  %v4989_v57 = vunpack.i.h.bf16 %v4987_v21  ;;  %v4988_v1 = vunpack.i.l.bf16 %v4987_v21 }
0x1079   :  { %1550 = vmatpush1.bf16.msra.mxu0 %v1509_v53 }
0x107a   :  { %1551 = vmatprep.subr.bf16.mxu0 %v5861_v26  ;;  %v1514_v62 = vpack.c.bf16 %v4984_v22, %v4983_v24  ;;  %v1513_v39 = vpack.c.bf16 %v4989_v57, %v4988_v1 }
0x107b   :  { %v4992_v38 = vpop.permute.xlu1 %4991  ;;  %v4997_v40 = vpop.permute.xlu0 %4996 }
0x107c   :  { %v4994_v6 = vunpack.i.h.bf16 %v4992_v38  ;;  %v4993_v7 = vunpack.i.l.bf16 %v4992_v38  ;;  %v4999_v28 = vunpack.i.h.bf16 %v4997_v40  ;;  %v4998_v29 = vunpack.i.l.bf16 %v4997_v40 }
0x107d   :  { %1552 = vmatpush1.bf16.msra.mxu0 %v5866_v3 }
0x107e   :  { %1553 = vmatprep.subr.bf16.mxu0 %v1514_v62  ;;  %v1516_v14 = vpack.c.bf16 %v4994_v6, %v4993_v7  ;;  %v1515_v15 = vpack.c.bf16 %v4999_v28, %v4998_v29 }
0x107f   :  { %v5002_v30 = vpop.permute.xlu1 %5001  ;;  %v5007_v63 = vpop.permute.xlu0 %5006 }
0x1080   :  { %v5004_v2 = vunpack.i.h.bf16 %v5002_v30  ;;  %v5003_v13 = vunpack.i.l.bf16 %v5002_v30  ;;  %v5009_v16 = vunpack.i.h.bf16 %v5007_v63  ;;  %v5008_v19 = vunpack.i.l.bf16 %v5007_v63 }
0x1081   :  { %1554 = vmatpush1.bf16.msra.mxu0 %v1513_v39 }
0x1082   :  { %1555 = vmatprep.subr.bf16.mxu0 %v1516_v14  ;;  %v1518_v60 = vpack.c.bf16 %v5004_v2, %v5003_v13  ;;  %v1517_v55 = vpack.c.bf16 %v5009_v16, %v5008_v19 }
0x1083   :  { %v5012_v23 = vpop.permute.xlu1 %5011  ;;  %v5017_v18 = vpop.permute.xlu0 %5016 }
0x1084   :  { %v5014_v61 = vunpack.i.h.bf16 %v5012_v23  ;;  %v5013_v27 = vunpack.i.l.bf16 %v5012_v23  ;;  %v5019_v58 = vunpack.i.h.bf16 %v5017_v18  ;;  %v5018_v59 = vunpack.i.l.bf16 %v5017_v18 }
0x1085   :  { %1556 = vmatpush1.bf16.msra.mxu0 %v1515_v15 }
0x1086   :  { %1557 = vmatprep.subr.bf16.mxu0 %v1518_v60  ;;  %v1520_v56 = vpack.c.bf16 %v5014_v61, %v5013_v27  ;;  %v1519_v0 = vpack.c.bf16 %v5019_v58, %v5018_v59  ;;  %v4276_v27 = vld [vmem:[%s7129_s7 + $0x58] sm:$0xff]  ;;  %v4275_v60 = vld [vmem:[%s7129_s7 + $0x50] sm:$0xff] }
0x1089   :  { %1558 = vmatpush1.bf16.msra.mxu0 %v1517_v55 }
0x108a   :  { %1559 = vmatprep.subr.bf16.mxu0 %v1520_v56 }
0x108d   :  { %1560 = vmatpush1.bf16.msra.mxu0 %v1519_v0  ;;  %v4278_v0 = vld [vmem:[%s7130_s8 + $0x58] sm:$0xff] }
0x108e   :  { %2265 = vmatprep.subr.bf16.mxu0 %v5526_v20 }
0x1090   :  { %1576 = vmatmul.mubr.bf16.vlgmr.msra.gmra.mrb[8].mxu0 %v5182_v31  ;;  %v4277_v31 = vld [vmem:[%s7130_s8 + $0x50] sm:$0xff] }
0x1091   :  { %2266 = vmatpush1.bf16.msra.mxu0 %v5531_v25  ;;  %2297 = vmatprep.mubr.bf16.mxu0 %v7145_v4 }
0x1092   :  { %2267 = vmatprep.subr.bf16.mxu0 %v5593_v44 }
0x1094   :  { %v1524_v32 = vpop.permute.xlu1 %1523  ;;  %v1529_v37 = vpop.permute.xlu0 %1528 }
0x1095   :  { %2268 = vmatpush1.bf16.msra.mxu0 %v5598_v49 }
0x1096   :  { %2269 = vmatprep.subr.bf16.mxu0 %v5660_v5 }
0x1099   :  { %2270 = vmatpush1.bf16.msra.mxu0 %v5665_v10 }
0x109a   :  { %2271 = vmatprep.subr.bf16.mxu0 %v5727_v35 }
0x109d   :  { %2272 = vmatpush1.bf16.msra.mxu0 %v5732_v45 }
0x109e   :  { %2273 = vmatprep.subr.bf16.mxu0 %v5794_v12 }
0x10a1   :  { %2274 = vmatpush1.bf16.msra.mxu0 %v5799_v17 }
0x10a2   :  { %2275 = vmatprep.subr.bf16.mxu0 %v5861_v26 }
0x10a5   :  { %2276 = vmatpush1.bf16.msra.mxu0 %v5866_v3 }
0x1163   :  { %v1577_v33 = vpop.f32.mrb[8].mxu0 }
0x1164   :  { %v1578_v34 = vadd.f32 %v1577_v33, %v1524_v32  ;;  %v1579_v36 = vpop.f32.mrb[9].mxu0 }
0x1165   :  { %v1580_v42 = vadd.f32 %v1579_v36, %v1524_v32  ;;  %v1581_v43 = vpop.f32.mrb[10].mxu0 }
0x1166   :  { %v1586_v46 = vmax.f32 %v1578_v34, 0.0  ;;  %v1582_v47 = vadd.f32 %v1581_v43, %v1529_v37  ;;  %v1583_v48 = vpop.f32.mrb[11].mxu0 }
0x1167   :  { %v1587_v50 = vmax.f32 %v1580_v42, 0.0  ;;  %v1584_v52 = vadd.f32 %v1583_v48, %v1529_v37 }
0x1168   :  { %v1588_v53 = vmax.f32 %v1582_v47, 0.0  ;;  %v1590_v22 = vmul.f32 %v1586_v46, %v1586_v46 }
0x1169   :  { %v1589_v51 = vmax.f32 %v1584_v52, 0.0  ;;  %v1594_v54 = vadd.f32 %v1587_v50, %v1586_v46  ;;  %v1591_v24 = vmul.f32 %v1587_v50, %v1587_v50 }
0x116a   :  { %v1592_v21 = vmul.f32 %v1588_v53, %v1588_v53 }
0x116b   :  { %v1593_v57 = vmul.f32 %v1589_v51, %v1589_v51  ;;  %1595 = vadd.xlane.f32.xlu1 %v1594_v54  ;;  %v1597_v1 = vadd.f32 %v1589_v51, %v1588_v53  ;;  %v1600_v40 = vadd.f32 %v1591_v24, %v1590_v22 }
0x116d   :  { %1598 = vadd.xlane.f32.xlu0 %v1597_v1  ;;  %v1603_v38 = vadd.f32 %v1593_v57, %v1592_v21 }
0x116f   :  { %1604 = vadd.xlane.f32.xlu1 %v1603_v38 }
0x1171   :  { %1601 = vadd.xlane.f32.xlu0 %v1600_v40 }
0x11f8   :  { %v1596_v6 = vpop.xlane.xlu1 %1595 }
0x11f9   :  { %v1606_v62 = vmul.f32 0.00390625, %v1596_v6 }
0x11fa   :  { %v1599_v7 = vpop.xlane.xlu0 %1598 }
0x11fb   :  { %v1607_v39 = vmul.f32 0.00390625, %v1599_v7  ;;  %v1610_v2 = vmul.f32 %v1606_v62, %v1606_v62 }
0x11fc   :  { %v1605_v28 = vpop.xlane.xlu1 %1604 }
0x11fd   :  { %v1611_v29 = vmul.f32 %v1607_v39, %v1607_v39  ;;  %v1609_v30 = vmul.f32 0.00390625, %v1605_v28 }
0x11fe   :  { %v1602_v63 = vpop.xlane.xlu0 %1601 }
0x11ff   :  { %v1613_v13 = vsub.f32 %v1609_v30, %v1611_v29  ;;  %v1608_v14 = vmul.f32 0.00390625, %v1602_v63 }
0x1201   :  { %v1615_v15 = vmax.f32 %v1613_v13, 0.0  ;;  %v1612_v16 = vsub.f32 %v1608_v14, %v1610_v2 }
0x1203   :  { %v1617_v19 = vadd.f32 1e-05, %v1615_v15  ;;  %v1614_v23 = vmax.f32 %v1612_v16, 0.0 }
0x1205   :  { %5302 = vrsqrt.f32 %v1617_v19  ;;  %v1616_v61 = vadd.f32 1e-05, %v1614_v23 }
0x1207   :  { %5304 = vrsqrt.f32 %v1616_v61 }
0x120f   :  { %v5303_v18 = vpop.eup %5302 }
0x1210   :  { %v1621_v55 = vmul.f32 %v5303_v18, %v4276_v27 }
0x1211   :  { %v5305_v58 = vpop.eup %5304 }
0x1212   :  { %1633 = vperm.xlu1 %4539, %v1621_v55   ;;  %v1620_v59 = vmul.f32 %v5305_v58, %v4275_v60  ;;  %v1623_v56 = vmul.f32 %v1621_v55, %v1607_v39 }
0x1214   :  { %1628 = vperm.xlu0 %4538, %v1620_v59   ;;  %v1622_v32 = vmul.f32 %v1620_v59, %v1606_v62  ;;  %v1625_v33 = vsub.f32 %v4278_v0, %v1623_v56 }
0x1216   :  { %v1624_v34 = vsub.f32 %v4277_v31, %v1622_v32 }
0x1218   :  { %1647 = vperm.xlu0 %4538, %v1625_v33   ;;  %1642 = vperm.xlu1 %4539, %v1624_v34  }
0x1291   :  { %v1634_v36 = vpop.permute.xlu1 %1633 }
0x1292   :  { %v1638_v42 = vmul.f32 %v1634_v36, %v1588_v53  ;;  %v1639_v43 = vmul.f32 %v1634_v36, %v1589_v51  ;;  %v4285_v51 = vld [vmem:[%s7128_s6 + $0x68] sm:$0xff] }
0x1293   :  { %v1629_v37 = vpop.permute.xlu0 %1628 }
0x1294   :  { %v1636_v47 = vmul.f32 %v1629_v37, %v1586_v46  ;;  %v1637_v48 = vmul.f32 %v1629_v37, %v1587_v50 }
0x1297   :  { %v1648_v52 = vpop.permute.xlu0 %1647  ;;  %v1643_v54 = vpop.permute.xlu1 %1642 }
0x1298   :  { %v1652_v21 = vadd.f32 %v1648_v52, %v1638_v42  ;;  %v1653_v22 = vadd.f32 %v1648_v52, %v1639_v43  ;;  %v1650_v24 = vadd.f32 %v1643_v54, %v1636_v47  ;;  %v1651_v57 = vadd.f32 %v1643_v54, %v1637_v48 }
0x129a   :  { %v5898_v1 = vadd.f32 %v1652_v21, %v5818_v8  ;;  %v5901_v38 = vadd.f32 %v1653_v22, %v5821_v9  ;;  %v5904_v40 = vadd.f32 %v1650_v24, %v5824_v11  ;;  %v5907_v53 = vadd.f32 %v1651_v57, %v5827_v41  ;;  %v5183_v11 = vld [vmem:[%s7127_s5 + $0x64] ss:$8 sps:$4 sm:$0xff]  }
0x129b   :  { %4292 = vmatprep.mubr.msk.bf16.mxu1 %vm364_vm2, %v5183_v11  ;;  %v4284_v41 = vld [vmem:[%s7128_s6 + $0x60] sm:$0xff] }
0x129c   :  { %v5020_v46 = vpack.i.bf16 %v5901_v38, %v5907_v53  ;;  %v5913_v50 = vpack.c.bf16 %v5901_v38, %v5907_v53  ;;  %v5025_v8 = vpack.i.bf16 %v5898_v1, %v5904_v40  ;;  %v5919_v9 = vpack.c.bf16 %v5898_v1, %v5904_v40 }
0x129e   :  { %5021 = vrot.lane.b32.xlu1 %v5020_v46, %s5347_s2  ;;  %2277 = vmatprep.subr.bf16.mxu0 %v5913_v50 }
0x129f   :  { %5026 = vrot.lane.b32.xlu0 %v5025_v8, %s5347_s2  ;;  %2278 = vmatpush1.bf16.msra.mxu0 %v5919_v9 }
0x12a2   :  { %5031 = vrot.lane.b32.xlu1 %v5020_v46, %s5348_s20 }
0x12a3   :  { %5036 = vrot.lane.b32.xlu0 %v5025_v8, %s5348_s20 }
0x12a6   :  { %5041 = vrot.lane.b32.xlu1 %v5020_v46, %s5343_s22 }
0x12a7   :  { %5046 = vrot.lane.b32.xlu0 %v5025_v8, %s5343_s22 }
0x12aa   :  { %5051 = vrot.lane.b32.xlu1 %v5020_v46, %s5335_s1 }
0x12ab   :  { %5056 = vrot.lane.b32.xlu0 %v5025_v8, %s5335_s1 }
0x12ae   :  { %5061 = vrot.lane.b32.xlu1 %v5020_v46, %s7170_s24 }
0x12af   :  { %5066 = vrot.lane.b32.xlu0 %v5025_v8, %s7170_s24 }
0x12b2   :  { %5071 = vrot.lane.b32.xlu1 %v5020_v46, %s5346_s3 }
0x12b3   :  { %5076 = vrot.lane.b32.xlu0 %v5025_v8, %s5346_s3 }
0x12b6   :  { %5081 = vrot.lane.b32.xlu1 %v5020_v46, %s5349_s23 }
0x12b7   :  { %5086 = vrot.lane.b32.xlu0 %v5025_v8, %s5349_s23 }
0x12ba   :  { %5091 = vrot.lane.b32.xlu1 %v5020_v46, %s5350_s4 }
0x12bb   :  { %5096 = vrot.lane.b32.xlu0 %v5025_v8, %s5350_s4 }
0x12be   :  { %1758 = vperm.xlu1 %4539, %v4284_v41  }
0x12bf   :  { %1763 = vperm.xlu0 %4538, %v4285_v51  }
0x1310   :  { %v5022_v6 = vpop.permute.xlu1 %5021 }
0x1311   :  { %v5024_v7 = vunpack.i.h.bf16 %v5022_v6  ;;  %v5023_v62 = vunpack.i.l.bf16 %v5022_v6  ;;  %v5027_v39 = vpop.permute.xlu0 %5026 }
0x1312   :  { %v5029_v28 = vunpack.i.h.bf16 %v5027_v39  ;;  %v5028_v29 = vunpack.i.l.bf16 %v5027_v39 }
0x1313   :  { %v1739_v30 = vpack.c.bf16 %v5024_v7, %v5023_v62 }
0x1314   :  { %v1738_v63 = vpack.c.bf16 %v5029_v28, %v5028_v29  ;;  %v5032_v2 = vpop.permute.xlu1 %5031 }
0x1315   :  { %v5034_v13 = vunpack.i.h.bf16 %v5032_v2  ;;  %v5033_v14 = vunpack.i.l.bf16 %v5032_v2  ;;  %v5037_v15 = vpop.permute.xlu0 %5036  ;;  %1778 = vmatprep.subr.bf16.mxu1 %v1739_v30 }
0x1316   :  { %v5039_v16 = vunpack.i.h.bf16 %v5037_v15  ;;  %v5038_v19 = vunpack.i.l.bf16 %v5037_v15  ;;  %1779 = vmatpush1.bf16.msra.mxu1 %v1738_v63 }
0x1317   :  { %v1741_v23 = vpack.c.bf16 %v5034_v13, %v5033_v14 }
0x1318   :  { %v1740_v61 = vpack.c.bf16 %v5039_v16, %v5038_v19  ;;  %v5042_v27 = vpop.permute.xlu1 %5041 }
0x1319   :  { %v5044_v18 = vunpack.i.h.bf16 %v5042_v27  ;;  %v5043_v60 = vunpack.i.l.bf16 %v5042_v27  ;;  %v5047_v55 = vpop.permute.xlu0 %5046  ;;  %1780 = vmatprep.subr.bf16.mxu1 %v1741_v23 }
0x131a   :  { %v5049_v58 = vunpack.i.h.bf16 %v5047_v55  ;;  %v5048_v59 = vunpack.i.l.bf16 %v5047_v55  ;;  %1781 = vmatpush1.bf16.msra.mxu1 %v1740_v61  ;;  %v5185_v55 = vld [vmem:[%s7127_s5 + $0x60] ss:$8 sps:$4 sm:$0xff]   ;;  %s5352_s5 = smov [#allocation3]  }
0x131b   :  { %v1743_v56 = vpack.c.bf16 %v5044_v18, %v5043_v60  ;;  %s4212_s4 = sshll.u32 %s5352_s5, 4  ;;  %s4213_s4 = int_to_ptr.vmem [resolvable:$true] %s4212_s4 }
0x131c   :  { %v1742_v0 = vpack.c.bf16 %v5049_v58, %v5048_v59  ;;  %v5052_v31 = vpop.permute.xlu1 %5051  ;;  %s5310_s29 = scalar_lea.vmem %s4213_s4, 64  ;;  %p5315_p1 = scmp.lt.s32.totalorder %s4213_s4, %s4213_s4 }
0x131d   :  { %v5054_v32 = vunpack.i.h.bf16 %v5052_v31  ;;  %v5053_v33 = vunpack.i.l.bf16 %v5052_v31  ;;  %v5057_v34 = vpop.permute.xlu0 %5056  ;;  %1782 = vmatprep.subr.bf16.mxu1 %v1743_v56  ;;  %p5311_p0 = scmp.ne.s32.totalorder %s4213_s4, %s5310_s29  ;;  %p5316_p2 = scmp.lt.s32.totalorder %s5310_s29, %s5310_s29 }
0x131e   :  { %v5059_v36 = vunpack.i.h.bf16 %v5057_v34  ;;  %v5058_v37 = vunpack.i.l.bf16 %v5057_v34  ;;  %1783 = vmatpush1.bf16.msra.mxu1 %v1742_v0 }
0x131f   :  { %v1745_v42 = vpack.c.bf16 %v5054_v32, %v5053_v33  ;;  %p5317_p3 = por %p5316_p2, %p5315_p1 }
0x1320   :  { %v1744_v43 = vpack.c.bf16 %v5059_v36, %v5058_v37  ;;  %v5062_v47 = vpop.permute.xlu1 %5061 }
0x1321   :  { %v5064_v48 = vunpack.i.h.bf16 %v5062_v47  ;;  %v5063_v52 = vunpack.i.l.bf16 %v5062_v47  ;;  %v5067_v54 = vpop.permute.xlu0 %5066  ;;  %1784 = vmatprep.subr.bf16.mxu1 %v1745_v42  ;;  %p5318_p4 = pnand %p5317_p3, %p5311_p0 }
0x1322   :  { %1785 = vmatpush1.bf16.msra.mxu1 %v1744_v43  ;;  %v5069_v21 = vunpack.i.h.bf16 %v5067_v54  ;;  %v5068_v22 = vunpack.i.l.bf16 %v5067_v54 }
0x1323   :  { %1786 = vmatprep.subr.bf16.mxu1 %v5913_v50  ;;  %v1749_v11 = vpack.c.bf16 %v5064_v48, %v5063_v52 }
0x1324   :  { %v5072_v24 = vpop.permute.xlu1 %5071  ;;  %v1748_v41 = vpack.c.bf16 %v5069_v21, %v5068_v22 }
0x1325   :  { %v5074_v57 = vunpack.i.h.bf16 %v5072_v24  ;;  %v5073_v46 = vunpack.i.l.bf16 %v5072_v24  ;;  %v5077_v8 = vpop.permute.xlu0 %5076 }
0x1326   :  { %1787 = vmatpush1.bf16.msra.mxu1 %v5919_v9  ;;  %v5079_v51 = vunpack.i.h.bf16 %v5077_v8  ;;  %v5078_v6 = vunpack.i.l.bf16 %v5077_v8 }
0x1327   :  { %1788 = vmatprep.subr.bf16.mxu1 %v1749_v11  ;;  %v1751_v29 = vpack.c.bf16 %v5074_v57, %v5073_v46 }
0x1328   :  { %v5082_v7 = vpop.permute.xlu1 %5081  ;;  %v1750_v30 = vpack.c.bf16 %v5079_v51, %v5078_v6 }
0x1329   :  { %v5084_v62 = vunpack.i.h.bf16 %v5082_v7  ;;  %v5083_v39 = vunpack.i.l.bf16 %v5082_v7  ;;  %v5087_v28 = vpop.permute.xlu0 %5086 }
0x132a   :  { %1789 = vmatpush1.bf16.msra.mxu1 %v1748_v41  ;;  %v5089_v63 = vunpack.i.h.bf16 %v5087_v28  ;;  %v5088_v2 = vunpack.i.l.bf16 %v5087_v28 }
0x132b   :  { %1790 = vmatprep.subr.bf16.mxu1 %v1751_v29  ;;  %v1753_v19 = vpack.c.bf16 %v5084_v62, %v5083_v39 }
0x132c   :  { %v5092_v13 = vpop.permute.xlu1 %5091  ;;  %v1752_v23 = vpack.c.bf16 %v5089_v63, %v5088_v2 }
0x132d   :  { %v5094_v14 = vunpack.i.h.bf16 %v5092_v13  ;;  %v5093_v15 = vunpack.i.l.bf16 %v5092_v13  ;;  %v5097_v16 = vpop.permute.xlu0 %5096 }
0x132e   :  { %1791 = vmatpush1.bf16.msra.mxu1 %v1750_v30  ;;  %v5099_v61 = vunpack.i.h.bf16 %v5097_v16  ;;  %v5098_v27 = vunpack.i.l.bf16 %v5097_v16 }
0x132f   :  { %1792 = vmatprep.subr.bf16.mxu1 %v1753_v19  ;;  %v1755_v18 = vpack.c.bf16 %v5094_v14, %v5093_v15  ;;  %v4287_v19 = vld [vmem:[%s7129_s7 + $0x68] sm:$0xff] }
0x1330   :  { %v1754_v60 = vpack.c.bf16 %v5099_v61, %v5098_v27  ;;  %v4286_v61 = vld [vmem:[%s7129_s7 + $0x60] sm:$0xff] }
0x1332   :  { %1793 = vmatpush1.bf16.msra.mxu1 %v1752_v23 }
0x1333   :  { %1794 = vmatprep.subr.bf16.mxu1 %v1755_v18 }
0x1336   :  { %1795 = vmatpush1.bf16.msra.mxu1 %v1754_v60 }
0x1339   :  { %1811 = vmatmul.mubr.bf16.vlgmr.msra.gmra.mrb[16].mxu1 %v5185_v55 }
0x133d   :  { %v1759_v58 = vpop.permute.xlu1 %1758 }
0x133e   :  { %v1764_v31 = vpop.permute.xlu0 %1763 }
0x140c   :  { %v1812_v59 = vpop.f32.mrb[16].mxu1 }
0x140d   :  { %v1813_v56 = vadd.f32 %v1812_v59, %v1759_v58  ;;  %v1814_v0 = vpop.f32.mrb[17].mxu1  ;;  %v4288_v59 = vld [vmem:[%s7130_s8 + $0x60] sm:$0xff] }
0x140e   :  { %v1815_v32 = vadd.f32 %v1814_v0, %v1759_v58  ;;  %v1816_v33 = vpop.f32.mrb[18].mxu1  ;;  %v4289_v58 = vld [vmem:[%s7130_s8 + $0x68] sm:$0xff] }
0x140f   :  { %v5954_v34 = vmax.f32 %v1813_v56, 0.0  ;;  %v1817_v36 = vadd.f32 %v1816_v33, %v1764_v31  ;;  %v1818_v37 = vpop.f32.mrb[19].mxu1  ;;  %v1993_v33 = vld [vmem:[%s7132_s10 + $0x80] sm:$0xff] }
0x1410   :  { %v5956_v42 = vmax.f32 %v1815_v32, 0.0  ;;  %v1819_v43 = vadd.f32 %v1818_v37, %v1764_v31  ;;  %v1994_v32 = vld [vmem:[%s7132_s10 + $0x88] sm:$0xff]  ;;  %v1977_v37 = vld [vmem:[%s7132_s10] sm:$0xff] }
0x1411   :  { %v5958_v47 = vmax.f32 %v1817_v36, 0.0  ;;  %v1825_v21 = vmul.f32 %v5954_v34, %v5954_v34  ;;  %v1978_v36 = vld [vmem:[%s7132_s10 + $0x8] sm:$0xff] }
0x1412   :  { %v5960_v48 = vmax.f32 %v1819_v43, 0.0  ;;  %v1829_v52 = vadd.f32 %v5956_v42, %v5954_v34  ;;  %v1826_v22 = vmul.f32 %v5956_v42, %v5956_v42  ;;  %v1996_v43 = vld [vmem:[%s7132_s10 + $0x98] sm:$0xff] }
0x1413   :  { %v1827_v54 = vmul.f32 %v5958_v47, %v5958_v47 }
0x1414   :  { %v1828_v24 = vmul.f32 %v5960_v48, %v5960_v48  ;;  %1830 = vadd.xlane.f32.xlu1 %v1829_v52  ;;  %v1832_v57 = vadd.f32 %v5960_v48, %v5958_v47  ;;  %v1835_v8 = vadd.f32 %v1826_v22, %v1825_v21  ;;  %v1995_v52 = vld [vmem:[%s7132_s10 + $0x90] sm:$0xff]  ;;  %v1998_v22 = vld [vmem:[%s7132_s10 + $0xa8] sm:$0xff] }
0x1415   :  { %v1979_v21 = vld [vmem:[%s7132_s10 + $0x10] sm:$0xff] }
0x1416   :  { %1833 = vadd.xlane.f32.xlu0 %v1832_v57  ;;  %v1838_v46 = vadd.f32 %v1828_v24, %v1827_v54  ;;  %v1980_v54 = vld [vmem:[%s7132_s10 + $0x18] sm:$0xff]  ;;  %v1997_v24 = vld [vmem:[%s7132_s10 + $0xa0] sm:$0xff]  ;;  %v1982_v57 = vld [vmem:[%s7132_s10 + $0x28] sm:$0xff] }
0x1418   :  { %1839 = vadd.xlane.f32.xlu1 %v1838_v46  ;;  %v1981_v46 = vld [vmem:[%s7132_s10 + $0x20] sm:$0xff] }
0x141a   :  { %1836 = vadd.xlane.f32.xlu0 %v1835_v8  ;;  %v2000_v8 = vld [vmem:[%s7132_s10 + $0xb8] sm:$0xff] }
0x14a1   :  { %v1831_v11 = vpop.xlane.xlu1 %1830 }
0x14a2   :  { %v1841_v51 = vmul.f32 0.00390625, %v1831_v11  ;;  %v1999_v11 = vld [vmem:[%s7132_s10 + $0xb0] sm:$0xff] }
0x14a3   :  { %v1834_v41 = vpop.xlane.xlu0 %1833 }
0x14a4   :  { %v1842_v6 = vmul.f32 0.00390625, %v1834_v41  ;;  %v1845_v29 = vmul.f32 %v1841_v51, %v1841_v51  ;;  %v1984_v41 = vld [vmem:[%s7132_s10 + $0x38] sm:$0xff] }
0x14a5   :  { %v1840_v7 = vpop.xlane.xlu1 %1839 }
0x14a6   :  { %v1846_v62 = vmul.f32 %v1842_v6, %v1842_v6  ;;  %v1844_v39 = vmul.f32 0.00390625, %v1840_v7  ;;  %v2001_v7 = vld [vmem:[%s7132_s10 + $0xc0] sm:$0xff] }
0x14a7   :  { %v1837_v28 = vpop.xlane.xlu0 %1836 }
0x14a8   :  { %v1848_v30 = vsub.f32 %v1844_v39, %v1846_v62  ;;  %v1843_v63 = vmul.f32 0.00390625, %v1837_v28  ;;  %v1986_v62 = vld [vmem:[%s7132_s10 + $0x48] sm:$0xff]  ;;  %v1985_v39 = vld [vmem:[%s7132_s10 + $0x40] sm:$0xff]  ;;  %v2004_v28 = vld [vmem:[%s7132_s10 + $0xd8] sm:$0xff] }
0x14aa   :  { %v1850_v2 = vmax.f32 %v1848_v30, 0.0  ;;  %v1847_v13 = vsub.f32 %v1843_v63, %v1845_v29  ;;  %v2003_v29 = vld [vmem:[%s7132_s10 + $0xd0] sm:$0xff]  ;;  %v1988_v30 = vld [vmem:[%s7132_s10 + $0x58] sm:$0xff] }
0x14ab   :  { %v1987_v63 = vld [vmem:[%s7132_s10 + $0x50] sm:$0xff] }
0x14ac   :  { %v1852_v14 = vadd.f32 1e-05, %v1850_v2  ;;  %v1849_v15 = vmax.f32 %v1847_v13, 0.0  ;;  %v2006_v2 = vld [vmem:[%s7132_s10 + $0xe8] sm:$0xff]  ;;  %v2005_v13 = vld [vmem:[%s7132_s10 + $0xe0] sm:$0xff] }
0x14ae   :  { %5306 = vrsqrt.f32 %v1852_v14  ;;  %v1851_v16 = vadd.f32 1e-05, %v1849_v15  ;;  %v1990_v14 = vld [vmem:[%s7132_s10 + $0x68] sm:$0xff]  ;;  %v1989_v15 = vld [vmem:[%s7132_s10 + $0x60] sm:$0xff] }
0x14b0   :  { %5308 = vrsqrt.f32 %v1851_v16  ;;  %v2008_v16 = vld [vmem:[%s7132_s10 + $0xf8] sm:$0xff] }
0x14b8   :  { %v5307_v23 = vpop.eup %5306 }
0x14b9   :  { %v1856_v27 = vmul.f32 %v5307_v23, %v4287_v19  ;;  %v2007_v19 = vld [vmem:[%s7132_s10 + $0xf0] sm:$0xff]  ;;  %v1992_v23 = vld [vmem:[%s7132_s10 + $0x78] sm:$0xff] }
0x14ba   :  { %v5309_v18 = vpop.eup %5308 }
0x14bb   :  { %1868 = vperm.xlu1 %4539, %v1856_v27   ;;  %v1855_v60 = vmul.f32 %v5309_v18, %v4286_v61  ;;  %v1858_v55 = vmul.f32 %v1856_v27, %v1842_v6  ;;  %v2002_v6 = vld [vmem:[%s7132_s10 + $0xc8] sm:$0xff]  ;;  %v1991_v61 = vld [vmem:[%s7132_s10 + $0x70] sm:$0xff] }
0x14bd   :  { %1863 = vperm.xlu0 %4538, %v1855_v60   ;;  %v1857_v56 = vmul.f32 %v1855_v60, %v1841_v51  ;;  %v1860_v0 = vsub.f32 %v4289_v58, %v1858_v55  ;;  %v1983_v51 = vld [vmem:[%s7132_s10 + $0x30] sm:$0xff] }
0x14bf   :  { %v1859_v31 = vsub.f32 %v4288_v59, %v1857_v56 }
0x14c1   :  { %1882 = vperm.xlu0 %4538, %v1860_v0   ;;  %1877 = vperm.xlu1 %4539, %v1859_v31  }
0x14c5   :  { %2096 = vperm.xlu0 %4538, %v1994_v32   ;;  %2091 = vperm.xlu1 %4539, %v1993_v33  }
0x14c9   :  { %2016 = vperm.xlu0 %4538, %v1978_v36   ;;  %2011 = vperm.xlu1 %4539, %v1977_v37  }
0x14cd   :  { %2106 = vperm.xlu0 %4538, %v1996_v43   ;;  %2101 = vperm.xlu1 %4539, %v1995_v52  }
0x14d1   :  { %2026 = vperm.xlu0 %4538, %v1980_v54   ;;  %2021 = vperm.xlu1 %4539, %v1979_v21  }
0x14d5   :  { %2116 = vperm.xlu0 %4538, %v1998_v22   ;;  %2111 = vperm.xlu1 %4539, %v1997_v24  }
0x14d9   :  { %2036 = vperm.xlu0 %4538, %v1982_v57   ;;  %2031 = vperm.xlu1 %4539, %v1981_v46  }
0x14dd   :  { %2126 = vperm.xlu0 %4538, %v2000_v8   ;;  %2121 = vperm.xlu1 %4539, %v1999_v11  }
0x14e1   :  { %2046 = vperm.xlu0 %4538, %v1984_v41   ;;  %2041 = vperm.xlu1 %4539, %v1983_v51  }
0x14e5   :  { %2136 = vperm.xlu0 %4538, %v2002_v6   ;;  %2131 = vperm.xlu1 %4539, %v2001_v7  }
0x14e9   :  { %2056 = vperm.xlu0 %4538, %v1986_v62   ;;  %2051 = vperm.xlu1 %4539, %v1985_v39  }
0x14ed   :  { %2146 = vperm.xlu0 %4538, %v2004_v28   ;;  %2141 = vperm.xlu1 %4539, %v2003_v29  }
0x14f1   :  { %2066 = vperm.xlu0 %4538, %v1988_v30   ;;  %2061 = vperm.xlu1 %4539, %v1987_v63  }
0x14f5   :  { %2156 = vperm.xlu0 %4538, %v2006_v2   ;;  %2151 = vperm.xlu1 %4539, %v2005_v13  }
0x14f9   :  { %2076 = vperm.xlu0 %4538, %v1990_v14   ;;  %2071 = vperm.xlu1 %4539, %v1989_v15  }
0x14fd   :  { %2166 = vperm.xlu0 %4538, %v2008_v16   ;;  %2161 = vperm.xlu1 %4539, %v2007_v19  }
0x1501   :  { %2086 = vperm.xlu0 %4538, %v1992_v23   ;;  %2081 = vperm.xlu1 %4539, %v1991_v61  }
0x153a   :  { %v1869_v27 = vpop.permute.xlu1 %1868 }
0x153b   :  { %v1873_v60 = vmul.f32 %v1869_v27, %v5958_v47  ;;  %v1874_v55 = vmul.f32 %v1869_v27, %v5960_v48 }
0x153c   :  { %v1864_v18 = vpop.permute.xlu0 %1863 }
0x153d   :  { %v1871_v58 = vmul.f32 %v1864_v18, %v5954_v34  ;;  %v1872_v59 = vmul.f32 %v1864_v18, %v5956_v42  ;;  %v5186_v34 = vld [vmem:[%s7131_s9] sm:$0xff]  }
0x1540   :  { %v1883_v56 = vpop.permute.xlu0 %1882  ;;  %v1878_v0 = vpop.permute.xlu1 %1877 }
0x1541   :  { %v1887_v31 = vadd.f32 %v1883_v56, %v1873_v60  ;;  %v1888_v32 = vadd.f32 %v1883_v56, %v1874_v55  ;;  %v1885_v33 = vadd.f32 %v1878_v0, %v1871_v58  ;;  %v1886_v36 = vadd.f32 %v1878_v0, %v1872_v59 }
0x1543   :  { %v1891_v37 = vadd.f32 %v1887_v31, %v5898_v1  ;;  %v1892_v43 = vadd.f32 %v1888_v32, %v5901_v38  ;;  %v1889_v52 = vadd.f32 %v1885_v33, %v5904_v40  ;;  %v1890_v47 = vadd.f32 %v1886_v36, %v5907_v53  ;;  %v5187_v1 = vld [vmem:[%s7131_s9 + $0x8] sm:$0xff]   ;;  %v5200_v38 = vld [vmem:[%s7131_s9 + $0x70] sm:$0xff]   ;;  %v5201_v40 = vld [vmem:[%s7131_s9 + $0x78] sm:$0xff]  }
0x1544   :  { %v6168_v53 = vpop.permute.xlu1 %2091 }
0x1545   :  { %v1944_v54 = vpack.c.bf16 %v1892_v43, %v1890_v47  ;;  %v1943_v48 = vpack.c.bf16 %v1891_v37, %v1889_v52 }
0x1547   :  { %2279 = vmatprep.subr.bf16.mxu0 %v1944_v54 }
0x1548   :  { %2280 = vmatpush1.bf16.msra.mxu0 %v1943_v48 }
0x1549   :  { %3404 = vmatprep.subr.bf16.mxu0 %v5526_v20  ;;  %v5188_v20 = vld [vmem:[%s7131_s9 + $0x10] sm:$0xff]  }
0x154b   :  { %2298 = vmatmul.mubr.bf16.vlgmr.msra.gmra.mrb[12].mxu0 %v5186_v34 }
0x154c   :  { %3405 = vmatpush1.bf16.msra.mxu0 %v5531_v25  ;;  %2307 = vmatprep.mubr.bf16.mxu0 %v7145_v4  ;;  %v5189_v25 = vld [vmem:[%s7131_s9 + $0x18] sm:$0xff]  }
0x154d   :  { %3406 = vmatprep.subr.bf16.mxu0 %v5593_v44  ;;  %v5190_v44 = vld [vmem:[%s7131_s9 + $0x20] sm:$0xff]  }
0x1550   :  { %3407 = vmatpush1.bf16.msra.mxu0 %v5598_v49  ;;  %v5191_v49 = vld [vmem:[%s7131_s9 + $0x28] sm:$0xff]  }
0x1551   :  { %3408 = vmatprep.subr.bf16.mxu0 %v5660_v5  ;;  %v5192_v5 = vld [vmem:[%s7131_s9 + $0x30] sm:$0xff]  }
0x1553   :  { %2308 = vmatmul.mubr.bf16.gmra.mrb[16].mxu0 %v5187_v1 }
0x1554   :  { %3409 = vmatpush1.bf16.msra.mxu0 %v5665_v10  ;;  %2317 = vmatprep.mubr.bf16.mxu0 %v7145_v4  ;;  %v5193_v10 = vld [vmem:[%s7131_s9 + $0x38] sm:$0xff]  }
0x1555   :  { %3410 = vmatprep.subr.bf16.mxu0 %v5727_v35  ;;  %v5194_v35 = vld [vmem:[%s7131_s9 + $0x40] sm:$0xff]  }
0x1558   :  { %3411 = vmatpush1.bf16.msra.mxu0 %v5732_v45  ;;  %v5195_v45 = vld [vmem:[%s7131_s9 + $0x48] sm:$0xff]  }
0x1559   :  { %3412 = vmatprep.subr.bf16.mxu0 %v5794_v12  ;;  %v5196_v12 = vld [vmem:[%s7131_s9 + $0x50] sm:$0xff]  }
0x155b   :  { %2318 = vmatmul.mubr.bf16.gmra.mrb[20].mxu0 %v5188_v20 }
0x155c   :  { %3413 = vmatpush1.bf16.msra.mxu0 %v5799_v17  ;;  %2327 = vmatprep.mubr.bf16.mxu0 %v7145_v4  ;;  %v5197_v17 = vld [vmem:[%s7131_s9 + $0x58] sm:$0xff]  }
0x155d   :  { %3414 = vmatprep.subr.bf16.mxu0 %v5861_v26  ;;  %v5198_v26 = vld [vmem:[%s7131_s9 + $0x60] sm:$0xff]  }
0x1560   :  { %3415 = vmatpush1.bf16.msra.mxu0 %v5866_v3  ;;  %v5199_v3 = vld [vmem:[%s7131_s9 + $0x68] sm:$0xff]  }
0x1561   :  { %3416 = vmatprep.subr.bf16.mxu0 %v5913_v50  ;;  %v6170_v50 = vpop.permute.xlu0 %2096 }
0x1563   :  { %2328 = vmatmul.mubr.bf16.gmra.mrb[24].mxu0 %v5189_v25 }
0x1564   :  { %3417 = vmatpush1.bf16.msra.mxu0 %v5919_v9  ;;  %2337 = vmatprep.mubr.bf16.mxu0 %v7145_v4  ;;  %v2012_v9 = vpop.permute.xlu1 %2011 }
0x1565   :  { %3418 = vmatprep.subr.bf16.mxu0 %v1944_v54  ;;  %v2017_v42 = vpop.permute.xlu0 %2016 }
0x1568   :  { %3419 = vmatpush1.bf16.msra.mxu0 %v1943_v48  ;;  %v6172_v21 = vpop.permute.xlu1 %2101 }
0x1569   :  { %v6174_v22 = vpop.permute.xlu0 %2106 }
0x156b   :  { %2338 = vmatmul.mubr.bf16.gmra.mrb[28].mxu0 %v5190_v44 }
0x156c   :  { %2347 = vmatprep.mubr.bf16.mxu0 %v7145_v4  ;;  %v2022_v24 = vpop.permute.xlu1 %2021 }
0x156d   :  { %v2027_v57 = vpop.permute.xlu0 %2026 }
0x1570   :  { %v6176_v46 = vpop.permute.xlu1 %2111 }
0x1571   :  { %v6178_v8 = vpop.permute.xlu0 %2116 }
0x1573   :  { %2348 = vmatmul.mubr.bf16.gmra.mrb[32].mxu0 %v5191_v49 }
0x1574   :  { %2357 = vmatprep.mubr.bf16.mxu0 %v7145_v4  ;;  %v2032_v11 = vpop.permute.xlu1 %2031 }
0x1575   :  { %v2037_v41 = vpop.permute.xlu0 %2036 }
0x1578   :  { %v6180_v62 = vpop.permute.xlu1 %2121 }
0x1579   :  { %v6182_v30 = vpop.permute.xlu0 %2126 }
0x157b   :  { %2358 = vmatmul.mubr.bf16.gmra.mrb[36].mxu0 %v5192_v5 }
0x157c   :  { %2367 = vmatprep.mubr.bf16.mxu0 %v7145_v4  ;;  %v2042_v13 = vpop.permute.xlu1 %2041 }
0x157d   :  { %v2047_v19 = vpop.permute.xlu0 %2046 }
0x1580   :  { %v6184_v60 = vpop.permute.xlu1 %2131 }
0x1581   :  { %v6186_v58 = vpop.permute.xlu0 %2136 }
0x1583   :  { %2368 = vmatmul.mubr.bf16.gmra.mrb[40].mxu0 %v5193_v10 }
0x1584   :  { %2377 = vmatprep.mubr.bf16.mxu0 %v7145_v4  ;;  %v2052_v36 = vpop.permute.xlu1 %2051 }
0x1585   :  { %v2057_v43 = vpop.permute.xlu0 %2056 }
0x1588   :  { %v6188_v34 = vpop.permute.xlu1 %2141 }
0x1589   :  { %v6190_v44 = vpop.permute.xlu0 %2146 }
0x158b   :  { %2378 = vmatmul.mubr.bf16.gmra.mrb[44].mxu0 %v5194_v35 }
0x158c   :  { %2387 = vmatprep.mubr.bf16.mxu0 %v7145_v4  ;;  %v2062_v10 = vpop.permute.xlu1 %2061 }
0x1593   :  { %2388 = vmatmul.mubr.bf16.gmra.mrb[48].mxu0 %v5195_v45 }
0x1594   :  { %2397 = vmatprep.mubr.bf16.mxu0 %v7145_v4 }
0x159b   :  { %2398 = vmatmul.mubr.bf16.gmra.mrb[52].mxu0 %v5196_v12 }
0x159c   :  { %2407 = vmatprep.mubr.bf16.mxu0 %v7145_v4 }
0x15a3   :  { %2408 = vmatmul.mubr.bf16.gmra.mrb[56].mxu0 %v5197_v17  ;;  %v2067_v17 = vpop.permute.xlu0 %2066 }
0x15a4   :  { %2417 = vmatprep.mubr.bf16.mxu0 %v7145_v4 }
0x15ab   :  { %2418 = vmatmul.mubr.bf16.gmra.mrb[60].mxu0 %v5198_v26 }
0x15ac   :  { %2427 = vmatprep.mubr.bf16.mxu0 %v7145_v4 }
0x15b3   :  { %2428 = vmatmul.mubr.bf16.gmra.mrb[64].mxu0 %v5199_v3 }
0x15b4   :  { %2437 = vmatprep.mubr.bf16.mxu0 %v7145_v4 }
0x15bb   :  { %2438 = vmatmul.mubr.bf16.gmra.mrb[68].mxu0 %v5200_v38 }
0x15bc   :  { %2447 = vmatprep.mubr.bf16.mxu0 %v7145_v4 }
0x15c3   :  { %2448 = vmatmul.mubr.bf16.gmra.mrb[72].mxu0 %v5201_v40 }
0x15c4   :  { %3436 = vmatprep.mubr.bf16.mxu0 %v7145_v4 }
0x161e   :  { %v2299_v51 = vpop.f32.mrb[12].mxu0 }
0x161f   :  { %v2300_v6 = vadd.f32 %v2299_v51, %v2012_v9  ;;  %v2301_v7 = vpop.f32.mrb[13].mxu0 }
0x1620   :  { %v2303_v39 = vpop.f32.mrb[14].mxu0  ;;  %v2302_v63 = vadd.f32 %v2301_v7, %v2012_v9  ;;  %v6192_v9 = vpop.permute.xlu1 %2151 }
0x1621   :  { %v2304_v28 = vadd.f32 %v2303_v39, %v2017_v42  ;;  %v2305_v29 = vpop.f32.mrb[15].mxu0  ;;  %2458 = vmax.xlane.f32.xlu0 %v2300_v6 }
0x1622   :  { %v2306_v2 = vadd.f32 %v2305_v29, %v2017_v42 }
0x1623   :  { %2460 = vmax.xlane.f32.xlu1 %v2304_v28 }
0x1624   :  { %v2072_v39 = vpop.permute.xlu1 %2071 }
0x1625   :  { %2522 = vmax.xlane.f32.xlu0 %v2302_v63 }
0x1626   :  { %v2309_v14 = vpop.f32.mrb[16].mxu0 }
0x1627   :  { %v2310_v15 = vadd.f32 %v2309_v14, %v2022_v24  ;;  %v2311_v16 = vpop.f32.mrb[17].mxu0  ;;  %2524 = vmax.xlane.f32.xlu1 %v2306_v2 }
0x1628   :  { %v2313_v23 = vpop.f32.mrb[18].mxu0  ;;  %v2312_v18 = vadd.f32 %v2311_v16, %v2022_v24  ;;  %v6194_v24 = vpop.permute.xlu0 %2156 }
0x1629   :  { %v2314_v61 = vadd.f32 %v2313_v23, %v2027_v57  ;;  %v2315_v27 = vpop.f32.mrb[19].mxu0  ;;  %2462 = vmax.xlane.f32.xlu0 %v2310_v15  ;;  %v6196_v15 = vpop.permute.xlu1 %2161 }
0x162a   :  { %v2316_v55 = vadd.f32 %v2315_v27, %v2027_v57 }
0x162b   :  { %2464 = vmax.xlane.f32.xlu1 %v2314_v61 }
0x162c   :  { %v2077_v29 = vpop.permute.xlu0 %2076 }
0x162d   :  { %2526 = vmax.xlane.f32.xlu0 %v2312_v18 }
0x162e   :  { %v2319_v59 = vpop.f32.mrb[20].mxu0 }
0x162f   :  { %v2320_v56 = vadd.f32 %v2319_v59, %v2032_v11  ;;  %v2321_v0 = vpop.f32.mrb[21].mxu0  ;;  %2528 = vmax.xlane.f32.xlu1 %v2316_v55  ;;  %v6200_v55 = vpop.permute.xlu1 %2081 }
0x1630   :  { %v2323_v31 = vpop.f32.mrb[22].mxu0  ;;  %v2322_v37 = vadd.f32 %v2321_v0, %v2032_v11  ;;  %v6198_v61 = vpop.permute.xlu0 %2166 }
0x1631   :  { %v2324_v32 = vadd.f32 %v2323_v31, %v2037_v41  ;;  %v2325_v33 = vpop.f32.mrb[23].mxu0  ;;  %2466 = vmax.xlane.f32.xlu0 %v2320_v56 }
0x1632   :  { %v2326_v52 = vadd.f32 %v2325_v33, %v2037_v41 }
0x1633   :  { %2468 = vmax.xlane.f32.xlu1 %v2324_v32 }
0x1634   :  { %v6205_v31 = vpop.permute.xlu0 %2086 }
0x1635   :  { %2530 = vmax.xlane.f32.xlu0 %v2322_v37 }
0x1636   :  { %v2329_v47 = vpop.f32.mrb[24].mxu0 }
0x1637   :  { %v2330_v54 = vadd.f32 %v2329_v47, %v2042_v13  ;;  %v2331_v48 = vpop.f32.mrb[25].mxu0  ;;  %2532 = vmax.xlane.f32.xlu1 %v2326_v52 }
0x1638   :  { %v2333_v1 = vpop.f32.mrb[26].mxu0  ;;  %v2332_v49 = vadd.f32 %v2331_v48, %v2042_v13 }
0x1639   :  { %v2334_v20 = vadd.f32 %v2333_v1, %v2047_v19  ;;  %v2335_v25 = vpop.f32.mrb[27].mxu0  ;;  %2470 = vmax.xlane.f32.xlu0 %v2330_v54 }
0x163a   :  { %v2336_v5 = vadd.f32 %v2335_v25, %v2047_v19 }
0x163b   :  { %2472 = vmax.xlane.f32.xlu1 %v2334_v20 }
0x163d   :  { %2534 = vmax.xlane.f32.xlu0 %v2332_v49 }
0x163e   :  { %v2339_v35 = vpop.f32.mrb[28].mxu0 }
0x163f   :  { %v2340_v45 = vadd.f32 %v2339_v35, %v2052_v36  ;;  %v2341_v12 = vpop.f32.mrb[29].mxu0  ;;  %2536 = vmax.xlane.f32.xlu1 %v2336_v5 }
0x1640   :  { %v2343_v26 = vpop.f32.mrb[30].mxu0  ;;  %v2342_v40 = vadd.f32 %v2341_v12, %v2052_v36 }
0x1641   :  { %v2344_v3 = vadd.f32 %v2343_v26, %v2057_v43  ;;  %v2345_v38 = vpop.f32.mrb[31].mxu0  ;;  %2474 = vmax.xlane.f32.xlu0 %v2340_v45 }
0x1642   :  { %v2346_v42 = vadd.f32 %v2345_v38, %v2057_v43 }
0x1643   :  { %2476 = vmax.xlane.f32.xlu1 %v2344_v3 }
0x1645   :  { %2538 = vmax.xlane.f32.xlu0 %v2342_v40 }
0x1646   :  { %v2349_v57 = vpop.f32.mrb[32].mxu0 }
0x1647   :  { %v2350_v11 = vadd.f32 %v2349_v57, %v2062_v10  ;;  %v2351_v41 = vpop.f32.mrb[33].mxu0  ;;  %2540 = vmax.xlane.f32.xlu1 %v2346_v42 }
0x1648   :  { %v2353_v51 = vpop.f32.mrb[34].mxu0  ;;  %v2352_v28 = vadd.f32 %v2351_v41, %v2062_v10 }
0x1649   :  { %v2354_v6 = vadd.f32 %v2353_v51, %v2067_v17  ;;  %v2355_v7 = vpop.f32.mrb[35].mxu0  ;;  %2478 = vmax.xlane.f32.xlu0 %v2350_v11 }
0x164a   :  { %v2356_v63 = vadd.f32 %v2355_v7, %v2067_v17 }
0x164b   :  { %2480 = vmax.xlane.f32.xlu1 %v2354_v6 }
0x164d   :  { %2542 = vmax.xlane.f32.xlu0 %v2352_v28 }
0x164e   :  { %v2359_v2 = vpop.f32.mrb[36].mxu0 }
0x164f   :  { %v2360_v13 = vadd.f32 %v2359_v2, %v2072_v39  ;;  %v2361_v14 = vpop.f32.mrb[37].mxu0  ;;  %2544 = vmax.xlane.f32.xlu1 %v2356_v63 }
0x1650   :  { %v2363_v16 = vpop.f32.mrb[38].mxu0  ;;  %v2362_v27 = vadd.f32 %v2361_v14, %v2072_v39 }
0x1651   :  { %v2364_v19 = vadd.f32 %v2363_v16, %v2077_v29  ;;  %v2365_v23 = vpop.f32.mrb[39].mxu0  ;;  %2482 = vmax.xlane.f32.xlu0 %v2360_v13 }
0x1652   :  { %v2366_v18 = vadd.f32 %v2365_v23, %v2077_v29 }
0x1653   :  { %2484 = vmax.xlane.f32.xlu1 %v2364_v19 }
0x1655   :  { %2546 = vmax.xlane.f32.xlu0 %v2362_v27 }
0x1656   :  { %v2369_v59 = vpop.f32.mrb[40].mxu0 }
0x1657   :  { %v2370_v56 = vadd.f32 %v2369_v59, %v6200_v55  ;;  %v6203_v0 = vpop.f32.mrb[41].mxu0  ;;  %2548 = vmax.xlane.f32.xlu1 %v2366_v18 }
0x1658   :  { %v2373_v32 = vpop.f32.mrb[42].mxu0 }
0x1659   :  { %v2374_v33 = vadd.f32 %v2373_v32, %v6205_v31  ;;  %v6208_v36 = vpop.f32.mrb[43].mxu0  ;;  %2486 = vmax.xlane.f32.xlu0 %v2370_v56 }
0x165b   :  { %2488 = vmax.xlane.f32.xlu1 %v2374_v33 }
0x165e   :  { %v2379_v37 = vpop.f32.mrb[44].mxu0 }
0x165f   :  { %v2380_v43 = vadd.f32 %v2379_v37, %v6168_v53  ;;  %v2381_v52 = vpop.f32.mrb[45].mxu0 }
0x1660   :  { %v2382_v47 = vadd.f32 %v2381_v52, %v6168_v53  ;;  %v2383_v54 = vpop.f32.mrb[46].mxu0 }
0x1661   :  { %v2385_v48 = vpop.f32.mrb[47].mxu0  ;;  %2490 = vmax.xlane.f32.xlu1 %v2380_v43  ;;  %v2384_v20 = vadd.f32 %v2383_v54, %v6170_v50 }
0x1662   :  { %v2386_v1 = vadd.f32 %v2385_v48, %v6170_v50  ;;  %2554 = vmax.xlane.f32.xlu0 %v2382_v47 }
0x1665   :  { %2556 = vmax.xlane.f32.xlu1 %v2386_v1 }
0x1666   :  { %v2389_v25 = vpop.f32.mrb[48].mxu0  ;;  %2492 = vmax.xlane.f32.xlu0 %v2384_v20 }
0x1667   :  { %v2390_v49 = vadd.f32 %v2389_v25, %v6172_v21  ;;  %v2391_v5 = vpop.f32.mrb[49].mxu0 }
0x1668   :  { %v2393_v10 = vpop.f32.mrb[50].mxu0  ;;  %v2392_v53 = vadd.f32 %v2391_v5, %v6172_v21 }
0x1669   :  { %v2394_v35 = vadd.f32 %v2393_v10, %v6174_v22  ;;  %v2395_v45 = vpop.f32.mrb[51].mxu0 }
0x166a   :  { %2494 = vmax.xlane.f32.xlu0 %v2390_v49  ;;  %v2396_v12 = vadd.f32 %v2395_v45, %v6174_v22 }
0x166b   :  { %2496 = vmax.xlane.f32.xlu1 %v2394_v35  ;;  %v3599_v35 = vld [vmem:[%s7135_s13 + $0x10] sm:$0xff] }
0x166e   :  { %v2399_v17 = vpop.f32.mrb[52].mxu0  ;;  %2558 = vmax.xlane.f32.xlu0 %v2392_v53 }
0x166f   :  { %v2400_v50 = vadd.f32 %v2399_v17, %v6176_v46  ;;  %v2401_v26 = vpop.f32.mrb[53].mxu0  ;;  %2560 = vmax.xlane.f32.xlu1 %v2396_v12  ;;  %v3600_v12 = vld [vmem:[%s7135_s13 + $0x18] sm:$0xff] }
0x1670   :  { %v2403_v3 = vpop.f32.mrb[54].mxu0  ;;  %v2402_v42 = vadd.f32 %v2401_v26, %v6176_v46  ;;  %v3601_v26 = vld [vmem:[%s7135_s13 + $0x20] sm:$0xff] }
0x1671   :  { %v2404_v38 = vadd.f32 %v2403_v3, %v6178_v8  ;;  %v2405_v40 = vpop.f32.mrb[55].mxu0 }
0x1672   :  { %2498 = vmax.xlane.f32.xlu0 %v2400_v50  ;;  %v2406_v57 = vadd.f32 %v2405_v40, %v6178_v8  ;;  %v3602_v40 = vld [vmem:[%s7135_s13 + $0x28] sm:$0xff] }
0x1673   :  { %2500 = vmax.xlane.f32.xlu1 %v2404_v38 }
0x1676   :  { %v2409_v11 = vpop.f32.mrb[56].mxu0  ;;  %2562 = vmax.xlane.f32.xlu0 %v2402_v42 }
0x1677   :  { %v2410_v21 = vadd.f32 %v2409_v11, %v6180_v62  ;;  %v2411_v22 = vpop.f32.mrb[57].mxu0  ;;  %2564 = vmax.xlane.f32.xlu1 %v2406_v57  ;;  %v3603_v11 = vld [vmem:[%s7135_s13 + $0x30] sm:$0xff] }
0x1678   :  { %v2413_v41 = vpop.f32.mrb[58].mxu0  ;;  %v2412_v7 = vadd.f32 %v2411_v22, %v6180_v62 }
0x1679   :  { %v2414_v51 = vadd.f32 %v2413_v41, %v6182_v30  ;;  %v2415_v6 = vpop.f32.mrb[59].mxu0  ;;  %v3604_v41 = vld [vmem:[%s7135_s13 + $0x38] sm:$0xff] }
0x167a   :  { %2502 = vmax.xlane.f32.xlu0 %v2410_v21  ;;  %v2416_v39 = vadd.f32 %v2415_v6, %v6182_v30 }
0x167b   :  { %2504 = vmax.xlane.f32.xlu1 %v2414_v51 }
0x167e   :  { %v2419_v28 = vpop.f32.mrb[60].mxu0  ;;  %2566 = vmax.xlane.f32.xlu0 %v2412_v7  ;;  %v3605_v7 = vld [vmem:[%s7135_s13 + $0x40] sm:$0xff] }
0x167f   :  { %v2420_v46 = vadd.f32 %v2419_v28, %v6184_v60  ;;  %v2421_v8 = vpop.f32.mrb[61].mxu0  ;;  %2568 = vmax.xlane.f32.xlu1 %v2416_v39 }
0x1680   :  { %v2423_v29 = vpop.f32.mrb[62].mxu0  ;;  %v2422_v13 = vadd.f32 %v2421_v8, %v6184_v60 }
0x1681   :  { %v2424_v63 = vadd.f32 %v2423_v29, %v6186_v58  ;;  %v2425_v2 = vpop.f32.mrb[63].mxu0 }
0x1682   :  { %2506 = vmax.xlane.f32.xlu0 %v2420_v46  ;;  %v2426_v14 = vadd.f32 %v2425_v2, %v6186_v58  ;;  %v3606_v46 = vld [vmem:[%s7135_s13 + $0x48] sm:$0xff] }
0x1683   :  { %2508 = vmax.xlane.f32.xlu1 %v2424_v63  ;;  %v3607_v63 = vld [vmem:[%s7135_s13 + $0x50] sm:$0xff] }
0x1686   :  { %v2429_v16 = vpop.f32.mrb[64].mxu0  ;;  %2570 = vmax.xlane.f32.xlu0 %v2422_v13 }
0x1687   :  { %v2430_v62 = vadd.f32 %v2429_v16, %v6188_v34  ;;  %v2431_v30 = vpop.f32.mrb[65].mxu0  ;;  %2572 = vmax.xlane.f32.xlu1 %v2426_v14  ;;  %v3608_v14 = vld [vmem:[%s7135_s13 + $0x58] sm:$0xff] }
0x1688   :  { %v2433_v19 = vpop.f32.mrb[66].mxu0  ;;  %v2432_v18 = vadd.f32 %v2431_v30, %v6188_v34  ;;  %v3609_v30 = vld [vmem:[%s7135_s13 + $0x60] sm:$0xff] }
0x1689   :  { %v2434_v23 = vadd.f32 %v2433_v19, %v6190_v44  ;;  %v2435_v27 = vpop.f32.mrb[67].mxu0 }
0x168a   :  { %2510 = vmax.xlane.f32.xlu0 %v2430_v62  ;;  %v2436_v59 = vadd.f32 %v2435_v27, %v6190_v44  ;;  %v3610_v27 = vld [vmem:[%s7135_s13 + $0x68] sm:$0xff] }
0x168b   :  { %2512 = vmax.xlane.f32.xlu1 %v2434_v23 }
0x168e   :  { %v2439_v56 = vpop.f32.mrb[68].mxu0  ;;  %2574 = vmax.xlane.f32.xlu0 %v2432_v18  ;;  %v3611_v18 = vld [vmem:[%s7135_s13 + $0x70] sm:$0xff] }
0x168f   :  { %v2440_v60 = vadd.f32 %v2439_v56, %v6192_v9  ;;  %v2441_v58 = vpop.f32.mrb[69].mxu0  ;;  %2576 = vmax.xlane.f32.xlu1 %v2436_v59 }
0x1690   :  { %v2443_v32 = vpop.f32.mrb[70].mxu0  ;;  %v2442_v43 = vadd.f32 %v2441_v58, %v6192_v9  ;;  %v2372_v9 = vadd.f32 %v6203_v0, %v6200_v55  ;;  %v5204_v55 = vld [vmem:[%s7133_s11 + $0x4] ss:$8 sps:$4 sm:$0xff]  }
0x1691   :  { %v2444_v33 = vadd.f32 %v2443_v32, %v6194_v24  ;;  %v2445_v37 = vpop.f32.mrb[71].mxu0  ;;  %v3598_v0 = vld [vmem:[%s7135_s13 + $0x8] sm:$0xff]  ;;  %2859 = vmatprep.mubr.bf16.mxu1 %v5204_v55 }
0x1692   :  { %2514 = vmax.xlane.f32.xlu0 %v2440_v60  ;;  %v2446_v52 = vadd.f32 %v2445_v37, %v6194_v24  ;;  %v2376_v24 = vadd.f32 %v6208_v36, %v6205_v31  ;;  %v3612_v60 = vld [vmem:[%s7135_s13 + $0x78] sm:$0xff] }
0x1693   :  { %2516 = vmax.xlane.f32.xlu1 %v2444_v33  ;;  %v3613_v33 = vld [vmem:[%s7135_s13 + $0x80] sm:$0xff] }
0x1696   :  { %v2449_v47 = vpop.f32.mrb[72].mxu0  ;;  %2578 = vmax.xlane.f32.xlu0 %v2442_v43 }
0x1697   :  { %v2450_v34 = vadd.f32 %v2449_v47, %v6196_v15  ;;  %v2451_v44 = vpop.f32.mrb[73].mxu0  ;;  %2580 = vmax.xlane.f32.xlu1 %v2446_v52 }
0x1698   :  { %v2453_v54 = vpop.f32.mrb[74].mxu0  ;;  %v2452_v20 = vadd.f32 %v2451_v44, %v6196_v15  ;;  %v3597_v15 = vld [vmem:[%s7135_s13] sm:$0xff] }
0x1699   :  { %v2454_v48 = vadd.f32 %v2453_v54, %v6198_v61  ;;  %v2455_v1 = vpop.f32.mrb[75].mxu0 }
0x169a   :  { %2518 = vmax.xlane.f32.xlu0 %v2450_v34  ;;  %v2456_v25 = vadd.f32 %v2455_v1, %v6198_v61 }
0x169b   :  { %2520 = vmax.xlane.f32.xlu1 %v2454_v48  ;;  %v3614_v48 = vld [vmem:[%s7135_s13 + $0x88] sm:$0xff] }
0x169e   :  { %2582 = vmax.xlane.f32.xlu0 %v2452_v20 }
0x169f   :  { %2584 = vmax.xlane.f32.xlu1 %v2456_v25 }
0x16a2   :  { %2550 = vmax.xlane.f32.xlu0 %v2372_v9  ;;  %v3615_v9 = vld [vmem:[%s7135_s13 + $0x90] sm:$0xff] }
0x16a3   :  { %2552 = vmax.xlane.f32.xlu1 %v2376_v24 }
0x16ae   :  { %v6246_v49 = vpop.xlane.xlu0 %2458 }
0x16b0   :  { %v6248_v5 = vpop.xlane.xlu1 %2460 }
0x16b2   :  { %v6253_v10 = vpop.xlane.xlu0 %2522 }
0x16b3   :  { %v2587_v44 = vsel %vm2586_vm3, %v6246_v49, %v6253_v10 }
0x16b4   :  { %3631 = vperm.xlu1 %4539, %v3597_v15   ;;  %v6255_v61 = vpop.xlane.xlu1 %2524 }
0x16b5   :  { %v2588_v43 = vsel %vm2586_vm3, %v6248_v5, %v6255_v61  ;;  %v3616_v61 = vld [vmem:[%s7135_s13 + $0x98] sm:$0xff] }
0x16b6   :  { %v6263_v31 = vpop.xlane.xlu0 %2462  ;;  %v2651_v1 = vpack.c.bf16 %v2588_v43, %v2587_v44 }
0x16b8   :  { %3636 = vperm.xlu1 %4539, %v3598_v0   ;;  %v6265_v36 = vpop.xlane.xlu1 %2464 }
0x16ba   :  { %v6270_v45 = vpop.xlane.xlu0 %2526 }
0x16bb   :  { %v2589_v55 = vsel %vm2586_vm3, %v6263_v31, %v6270_v45 }
0x16bc   :  { %3641 = vperm.xlu1 %4539, %v3599_v35   ;;  %v6272_v53 = vpop.xlane.xlu1 %2528 }
0x16bd   :  { %v2590_v49 = vsel %vm2586_vm3, %v6265_v36, %v6272_v53  ;;  %v3617_v53 = vld [vmem:[%s7135_s13 + $0xa0] sm:$0xff] }
0x16be   :  { %v6277_v17 = vpop.xlane.xlu0 %2466  ;;  %v2652_v35 = vpack.c.bf16 %v2590_v49, %v2589_v55 }
0x16c0   :  { %3646 = vperm.xlu1 %4539, %v3600_v12   ;;  %v6279_v50 = vpop.xlane.xlu1 %2468 }
0x16c2   :  { %v6284_v3 = vpop.xlane.xlu0 %2530 }
0x16c4   :  { %3651 = vperm.xlu1 %4539, %v3601_v26   ;;  %v6286_v38 = vpop.xlane.xlu1 %2532 }
0x16c6   :  { %v6291_v42 = vpop.xlane.xlu0 %2470 }
0x16c8   :  { %3656 = vperm.xlu1 %4539, %v3602_v40   ;;  %v6293_v57 = vpop.xlane.xlu1 %2472  ;;  %v2592_v40 = vsel %vm2586_vm3, %v6279_v50, %v6286_v38  ;;  %v3619_v38 = vld [vmem:[%s7135_s13 + $0xb0] sm:$0xff] }
0x16ca   :  { %v6298_v21 = vpop.xlane.xlu0 %2534 }
0x16cc   :  { %3661 = vperm.xlu1 %4539, %v3603_v11   ;;  %v6300_v22 = vpop.xlane.xlu1 %2536 }
0x16ce   :  { %v6305_v51 = vpop.xlane.xlu0 %2474 }
0x16d0   :  { %3666 = vperm.xlu1 %4539, %v3604_v41   ;;  %v6307_v6 = vpop.xlane.xlu1 %2476  ;;  %v3618_v41 = vld [vmem:[%s7135_s13 + $0xa8] sm:$0xff] }
0x16d2   :  { %v6312_v39 = vpop.xlane.xlu0 %2538 }
0x16d3   :  { %v2595_v44 = vsel %vm2586_vm3, %v6305_v51, %v6312_v39 }
0x16d4   :  { %3671 = vperm.xlu1 %4539, %v3605_v7   ;;  %v6314_v28 = vpop.xlane.xlu1 %2540  ;;  %v2591_v7 = vsel %vm2586_vm3, %v6277_v17, %v6284_v3 }
0x16d6   :  { %v6319_v8 = vpop.xlane.xlu0 %2478 }
0x16d8   :  { %3676 = vperm.xlu1 %4539, %v3606_v46   ;;  %v6321_v29 = vpop.xlane.xlu1 %2480 }
0x16da   :  { %v6326_v2 = vpop.xlane.xlu0 %2542 }
0x16db   :  { %v2597_v49 = vsel %vm2586_vm3, %v6319_v8, %v6326_v2 }
0x16dc   :  { %3681 = vperm.xlu1 %4539, %v3607_v63   ;;  %v6328_v13 = vpop.xlane.xlu1 %2544  ;;  %v2653_v63 = vpack.c.bf16 %v2592_v40, %v2591_v7 }
0x16de   :  { %v6333_v16 = vpop.xlane.xlu0 %2482 }
0x16e0   :  { %3686 = vperm.xlu1 %4539, %v3608_v14   ;;  %v6335_v62 = vpop.xlane.xlu1 %2484 }
0x16e2   :  { %v6342_v23 = vpop.xlane.xlu0 %2546 }
0x16e4   :  { %3691 = vperm.xlu1 %4539, %v3609_v30   ;;  %v6340_v19 = vpop.xlane.xlu1 %2548 }
0x16e5   :  { %v2600_v55 = vsel %vm2586_vm3, %v6335_v62, %v6340_v19  ;;  %v5244_v19 = vld [vmem:[%s7134_s12] sm:$0xff]  }
0x16e6   :  { %v6352_v56 = vpop.xlane.xlu0 %2486  ;;  %3437 = vmatmul.mubr.bf16.vlgmr.msra.gmra.mrb[76].mxu0 %v5244_v19 }
0x16e7   :  { %3446 = vmatprep.mubr.bf16.mxu0 %v7145_v4 }
0x16e8   :  { %3696 = vperm.xlu1 %4539, %v3610_v27   ;;  %v6350_v59 = vpop.xlane.xlu1 %2488  ;;  %v2594_v27 = vsel %vm2586_vm3, %v6293_v57, %v6300_v22  ;;  %v3621_v22 = vld [vmem:[%s7135_s13 + $0xc0] sm:$0xff] }
0x16ec   :  { %3701 = vperm.xlu1 %4539, %v3611_v18  }
0x16ee   :  { %v2491_v58 = vpop.xlane.xlu1 %2490 }
0x16ef   :  { %v2555_v32 = vpop.xlane.xlu0 %2554 }
0x16f0   :  { %3706 = vperm.xlu1 %4539, %v3612_v60   ;;  %v2603_v47 = vsel %vm2586_vm3, %v2491_v58, %v2555_v32  ;;  %v3620_v60 = vld [vmem:[%s7135_s13 + $0xb8] sm:$0xff]  ;;  %v2593_v58 = vsel %vm2586_vm3, %v6291_v42, %v6298_v21 }
0x16f2   :  { %v2557_v37 = vpop.xlane.xlu1 %2556 }
0x16f3   :  { %v2493_v52 = vpop.xlane.xlu0 %2492 }
0x16f4   :  { %v2604_v34 = vsel %vm2586_vm3, %v2493_v52, %v2557_v37  ;;  %3711 = vperm.xlu1 %4539, %v3613_v33   ;;  %v2654_v33 = vpack.c.bf16 %v2594_v27, %v2593_v58  ;;  %v2596_v52 = vsel %vm2586_vm3, %v6307_v6, %v6314_v28  ;;  %v3623_v28 = vld [vmem:[%s7135_s13 + $0xd0] sm:$0xff]  ;;  %v5253_v27 = vld [vmem:[%s7134_s12 + $0x18] sm:$0xff]   ;;  %v5214_v58 = vld [vmem:[%s7133_s11 + $0x44] ss:$8 sps:$4 sm:$0xff]  }
0x16f5   :  { %v2659_v54 = vpack.c.bf16 %v2604_v34, %v2603_v47  ;;  %v3622_v34 = vld [vmem:[%s7135_s13 + $0xc8] sm:$0xff] }
0x16f7   :  { %v2495_v20 = vpop.xlane.xlu0 %2494  ;;  %4367 = vmatprep.subr.bf16.mxu1 %v2659_v54 }
0x16f8   :  { %3716 = vperm.xlu1 %4539, %v3614_v48   ;;  %4368 = vmatpush3.bf16.msra.mxu1 %v2651_v1  ;;  %v2497_v25 = vpop.xlane.xlu1 %2496  ;;  %v2655_v48 = vpack.c.bf16 %v2596_v52, %v2595_v44  ;;  %v5257_v52 = vld [vmem:[%s7134_s12 + $0x38] sm:$0xff]   ;;  %v5226_v44 = vld [vmem:[%s7133_s11 + $0x84] ss:$8 sps:$4 sm:$0xff]  }
0x16fb   :  { %v2559_v24 = vpop.xlane.xlu0 %2558 }
0x16fc   :  { %v2605_v5 = vsel %vm2586_vm3, %v2495_v20, %v2559_v24  ;;  %3721 = vperm.xlu1 %4539, %v3615_v9   ;;  %v2561_v15 = vpop.xlane.xlu1 %2560  ;;  %v3624_v24 = vld [vmem:[%s7135_s13 + $0xd8] sm:$0xff] }
0x16fd   :  { %v2606_v10 = vsel %vm2586_vm3, %v2497_v25, %v2561_v15  ;;  %v2598_v25 = vsel %vm2586_vm3, %v6321_v29, %v6328_v13  ;;  %v3625_v13 = vld [vmem:[%s7135_s13 + $0xe0] sm:$0xff] }
0x16fe   :  { %v2660_v0 = vpack.c.bf16 %v2606_v10, %v2605_v5  ;;  %v2656_v15 = vpack.c.bf16 %v2598_v25, %v2597_v49  ;;  %v5237_v25 = vld [vmem:[%s7133_s11 + $0xb0] ss:$8 sps:$4 sm:$0xff]   ;;  %v5241_v49 = vld [vmem:[%s7133_s11 + $0xd4] ss:$8 sps:$4 sm:$0xff]  }
0x16ff   :  { %v2499_v12 = vpop.xlane.xlu0 %2498 }
0x1700   :  { %3726 = vperm.xlu1 %4539, %v3616_v61   ;;  %4369 = vmatprep.subr.bf16.mxu1 %v2660_v0  ;;  %v2501_v36 = vpop.xlane.xlu1 %2500 }
0x1701   :  { %4370 = vmatpush3.bf16.msra.mxu1 %v2652_v35  ;;  %v3626_v35 = vld [vmem:[%s7135_s13 + $0xe8] sm:$0xff] }
0x1703   :  { %v2563_v26 = vpop.xlane.xlu0 %2562 }
0x1704   :  { %v2607_v11 = vsel %vm2586_vm3, %v2499_v12, %v2563_v26  ;;  %3731 = vperm.xlu1 %4539, %v3617_v53   ;;  %v2565_v31 = vpop.xlane.xlu1 %2564  ;;  %v2599_v12 = vsel %vm2586_vm3, %v6333_v16, %v6342_v23 }
0x1705   :  { %v2608_v45 = vsel %vm2586_vm3, %v2501_v36, %v2565_v31  ;;  %v2657_v53 = vpack.c.bf16 %v2600_v55, %v2599_v12  ;;  %v5252_v55 = vld [vmem:[%s7133_s11 + $0xf0] ss:$8 sps:$4 sm:$0xff]  }
0x1706   :  { %v2661_v46 = vpack.c.bf16 %v2608_v45, %v2607_v11 }
0x1707   :  { %v2503_v14 = vpop.xlane.xlu0 %2502 }
0x1708   :  { %3736 = vperm.xlu1 %4539, %v3618_v41   ;;  %4371 = vmatprep.subr.bf16.mxu1 %v2661_v46  ;;  %v2505_v50 = vpop.xlane.xlu1 %2504  ;;  %v5248_v41 = vld [vmem:[%s7134_s12 + $0x8] sm:$0xff]  }
0x1709   :  { %4372 = vmatpush3.bf16.msra.mxu1 %v2653_v63  ;;  %3447 = vmatmul.mubr.bf16.gmra.mrb[80].mxu0 %v5248_v41 }
0x170a   :  { %3456 = vmatprep.mubr.bf16.mxu0 %v7145_v4 }
0x170b   :  { %v2567_v30 = vpop.xlane.xlu0 %2566 }
0x170c   :  { %v2609_v18 = vsel %vm2586_vm3, %v2503_v14, %v2567_v30  ;;  %3741 = vperm.xlu1 %4539, %v3619_v38   ;;  %v2569_v17 = vpop.xlane.xlu1 %2568  ;;  %v5205_v38 = vld [vmem:[%s7133_s11 + $0x14] ss:$8 sps:$4 sm:$0xff]   ;;  %v5208_v30 = vld [vmem:[%s7133_s11 + $0x24] ss:$8 sps:$4 sm:$0xff]  }
0x170d   :  { %v2610_v3 = vsel %vm2586_vm3, %v2505_v50, %v2569_v17  ;;  %v5202_v50 = vld [vmem:[%s7133_s11] ss:$8 sps:$4 sm:$0xff]   ;;  %v5211_v17 = vld [vmem:[%s7133_s11 + $0x34] ss:$8 sps:$4 sm:$0xff]  }
0x170e   :  { %v2662_v32 = vpack.c.bf16 %v2610_v3, %v2609_v18  ;;  %v5210_v18 = vld [vmem:[%s7133_s11 + $0x20] ss:$8 sps:$4 sm:$0xff]  }
0x170f   :  { %v2507_v37 = vpop.xlane.xlu0 %2506  ;;  %v5254_v3 = vld [vmem:[%s7134_s12 + $0x20] sm:$0xff]  }
0x1710   :  { %3746 = vperm.xlu1 %4539, %v3620_v60   ;;  %4373 = vmatprep.subr.bf16.mxu1 %v2662_v32  ;;  %v2509_v57 = vpop.xlane.xlu1 %2508  ;;  %v5213_v60 = vld [vmem:[%s7133_s11 + $0x30] ss:$8 sps:$4 sm:$0xff]   ;;  %v5255_v32 = vld [vmem:[%s7134_s12 + $0x28] sm:$0xff]  }
0x1711   :  { %4374 = vmatpush3.bf16.msra.mxu1 %v2654_v33  ;;  %v5216_v33 = vld [vmem:[%s7133_s11 + $0x40] ss:$8 sps:$4 sm:$0xff]  }
0x1713   :  { %v2571_v43 = vpop.xlane.xlu0 %2570 }
0x1714   :  { %v2611_v47 = vsel %vm2586_vm3, %v2507_v37, %v2571_v43  ;;  %3751 = vperm.xlu1 %4539, %v3621_v22   ;;  %v2573_v42 = vpop.xlane.xlu1 %2572  ;;  %v5217_v37 = vld [vmem:[%s7133_s11 + $0x54] ss:$8 sps:$4 sm:$0xff]   ;;  %v5219_v22 = vld [vmem:[%s7133_s11 + $0x50] ss:$8 sps:$4 sm:$0xff]   ;;  %v5220_v43 = vld [vmem:[%s7133_s11 + $0x64] ss:$8 sps:$4 sm:$0xff]  }
0x1715   :  { %v2612_v21 = vsel %vm2586_vm3, %v2509_v57, %v2573_v42  ;;  %v5256_v57 = vld [vmem:[%s7134_s12 + $0x30] sm:$0xff]  }
0x1716   :  { %v2663_v54 = vpack.c.bf16 %v2612_v21, %v2611_v47  ;;  %v5222_v47 = vld [vmem:[%s7133_s11 + $0x60] ss:$8 sps:$4 sm:$0xff]   ;;  %v5223_v42 = vld [vmem:[%s7133_s11 + $0x74] ss:$8 sps:$4 sm:$0xff]  }
0x1717   :  { %v2511_v1 = vpop.xlane.xlu0 %2510  ;;  %v5258_v21 = vld [vmem:[%s7134_s12 + $0x40] sm:$0xff]  }
0x1718   :  { %3756 = vperm.xlu1 %4539, %v3622_v34   ;;  %4375 = vmatprep.subr.bf16.mxu1 %v2663_v54  ;;  %v2513_v6 = vpop.xlane.xlu1 %2512  ;;  %v5225_v34 = vld [vmem:[%s7133_s11 + $0x70] ss:$8 sps:$4 sm:$0xff]   ;;  %v5228_v54 = vld [vmem:[%s7133_s11 + $0x80] ss:$8 sps:$4 sm:$0xff]  }
0x1719   :  { %4376 = vmatpush3.bf16.msra.mxu1 %v2655_v48  ;;  %v5229_v48 = vld [vmem:[%s7133_s11 + $0x94] ss:$8 sps:$4 sm:$0xff]  }
0x171b   :  { %v2575_v20 = vpop.xlane.xlu0 %2574 }
0x171c   :  { %v2613_v9 = vsel %vm2586_vm3, %v2511_v1, %v2575_v20  ;;  %3761 = vperm.xlu1 %4539, %v3623_v28   ;;  %v2577_v51 = vpop.xlane.xlu1 %2576  ;;  %v5231_v1 = vld [vmem:[%s7133_s11 + $0x90] ss:$8 sps:$4 sm:$0xff]   ;;  %v5234_v28 = vld [vmem:[%s7133_s11 + $0xa0] ss:$8 sps:$4 sm:$0xff]   ;;  %v5235_v20 = vld [vmem:[%s7133_s11 + $0xb4] ss:$8 sps:$4 sm:$0xff]  }
0x171d   :  { %v2614_v39 = vsel %vm2586_vm3, %v2513_v6, %v2577_v51  ;;  %v5232_v6 = vld [vmem:[%s7133_s11 + $0xa4] ss:$8 sps:$4 sm:$0xff]   ;;  %v7148_v51 = vmov 1  }
0x171e   :  { %v2664_v5 = vpack.c.bf16 %v2614_v39, %v2613_v9  ;;  %v5238_v9 = vld [vmem:[%s7133_s11 + $0xc4] ss:$8 sps:$4 sm:$0xff]   ;;  %5100 = vset.pattern.permute.xlu0 %v7148_v51 }
0x171f   :  { %v2515_v10 = vpop.xlane.xlu0 %2514  ;;  %v5259_v39 = vld [vmem:[%s7134_s12 + $0x48] sm:$0xff]  }
0x1720   :  { %3766 = vperm.xlu1 %4539, %v3624_v24   ;;  %4377 = vmatprep.subr.bf16.mxu1 %v2664_v5  ;;  %v2517_v29 = vpop.xlane.xlu1 %2516  ;;  %v5240_v24 = vld [vmem:[%s7133_s11 + $0xc0] ss:$8 sps:$4 sm:$0xff]   ;;  %v5260_v5 = vld [vmem:[%s7134_s12 + $0x50] sm:$0xff]  }
0x1721   :  { %4378 = vmatpush3.bf16.msra.mxu1 %v2656_v15  ;;  %v5243_v15 = vld [vmem:[%s7133_s11 + $0xd0] ss:$8 sps:$4 sm:$0xff]  }
0x1723   :  { %v2579_v61 = vpop.xlane.xlu0 %2578 }
0x1724   :  { %v2615_v0 = vsel %vm2586_vm3, %v2515_v10, %v2579_v61  ;;  %3771 = vperm.xlu1 %4539, %v3625_v13   ;;  %v2581_v8 = vpop.xlane.xlu1 %2580  ;;  %v5245_v10 = vld [vmem:[%s7133_s11 + $0xe4] ss:$8 sps:$4 sm:$0xff]   ;;  %v5247_v13 = vld [vmem:[%s7133_s11 + $0xe0] ss:$8 sps:$4 sm:$0xff]   ;;  %v5250_v61 = vld [vmem:[%s7133_s11 + $0xf4] ss:$8 sps:$4 sm:$0xff]  }
0x1725   :  { %v2616_v2 = vsel %vm2586_vm3, %v2517_v29, %v2581_v8  ;;  %v5261_v29 = vld [vmem:[%s7134_s12 + $0x58] sm:$0xff]   ;;  %v5263_v8 = vld [vmem:[%s7134_s12 + $0x68] sm:$0xff]  }
0x1726   :  { %v2665_v36 = vpack.c.bf16 %v2616_v2, %v2615_v0  ;;  %v5262_v0 = vld [vmem:[%s7134_s12 + $0x60] sm:$0xff]   ;;  %v5264_v2 = vld [vmem:[%s7134_s12 + $0x70] sm:$0xff]  }
0x1727   :  { %v2519_v26 = vpop.xlane.xlu0 %2518 }
0x1728   :  { %3776 = vperm.xlu1 %4539, %v3626_v35   ;;  %4379 = vmatprep.subr.bf16.mxu1 %v2665_v36  ;;  %v2521_v62 = vpop.xlane.xlu1 %2520  ;;  %v5265_v36 = vld [vmem:[%s7134_s12 + $0x78] sm:$0xff]  }
0x1729   :  { %4380 = vmatpush3.bf16.msra.mxu1 %v2657_v53 }
0x172b   :  { %v2583_v40 = vpop.xlane.xlu0 %2582 }
0x172c   :  { %v2617_v11 = vsel %vm2586_vm3, %v2519_v26, %v2583_v40  ;;  %v2585_v31 = vpop.xlane.xlu1 %2584 }
0x172d   :  { %v2618_v16 = vsel %vm2586_vm3, %v2521_v62, %v2585_v31 }
0x172e   :  { %v2666_v23 = vpack.c.bf16 %v2618_v16, %v2617_v11 }
0x172f   :  { %v2551_v45 = vpop.xlane.xlu0 %2550 }
0x1730   :  { %v2601_v7 = vsel %vm2586_vm3, %v6352_v56, %v2551_v45  ;;  %4381 = vmatprep.subr.bf16.mxu1 %v2666_v23  ;;  %v2553_v46 = vpop.xlane.xlu1 %2552  ;;  %v5249_v56 = vld [vmem:[%s7134_s12 + $0x10] sm:$0xff]  }
0x1731   :  { %v2602_v63 = vsel %vm2586_vm3, %v6350_v59, %v2553_v46  ;;  %v5207_v59 = vld [vmem:[%s7133_s11 + $0x10] ss:$8 sps:$4 sm:$0xff]   ;;  %3457 = vmatmul.mubr.bf16.gmra.mrb[84].mxu0 %v5249_v56 }
0x1732   :  { %v2658_v14 = vpack.c.bf16 %v2602_v63, %v2601_v7  ;;  %3466 = vmatprep.mubr.bf16.mxu0 %v7145_v4 }
0x1734   :  { %4382 = vmatpush3.bf16.msra.mxu1 %v2658_v14  ;;  %v6615_v35 = vpop.permute.xlu1 %3631 }
0x1737   :  { %2860 = vmatmul.mubr.bf16.vlgmr.msra.gmra.mrb[20].mxu1 %v5202_v50 }
0x1738   :  { %2867 = vmatprep.mubr.bf16.mxu1 %v5205_v38  ;;  %v6617_v12 = vpop.permute.xlu1 %3636 }
0x1739   :  { %3467 = vmatmul.mubr.bf16.gmra.mrb[88].mxu0 %v5253_v27 }
0x173a   :  { %3476 = vmatprep.mubr.bf16.mxu0 %v7145_v4 }
0x173c   :  { %v6622_v53 = vpop.permute.xlu1 %3641 }
0x173f   :  { %2868 = vmatmul.mubr.bf16.gmra.mrb[24].mxu1 %v5207_v59 }
0x1740   :  { %2875 = vmatprep.mubr.bf16.mxu1 %v5208_v30  ;;  %v6624_v26 = vpop.permute.xlu1 %3646 }
0x1741   :  { %3477 = vmatmul.mubr.bf16.gmra.mrb[92].mxu0 %v5254_v3 }
0x1742   :  { %3486 = vmatprep.mubr.bf16.mxu0 %v7145_v4 }
0x1744   :  { %v6626_v62 = vpop.permute.xlu1 %3651 }
0x1747   :  { %2876 = vmatmul.mubr.bf16.gmra.mrb[28].mxu1 %v5210_v18 }
0x1748   :  { %2883 = vmatprep.mubr.bf16.mxu1 %v5211_v17  ;;  %v6628_v19 = vpop.permute.xlu1 %3656 }
0x1749   :  { %3487 = vmatmul.mubr.bf16.gmra.mrb[96].mxu0 %v5255_v32 }
0x174a   :  { %3496 = vmatprep.mubr.bf16.mxu0 %v7145_v4 }
0x174c   :  { %v6630_v40 = vpop.permute.xlu1 %3661 }
0x174f   :  { %2884 = vmatmul.mubr.bf16.gmra.mrb[32].mxu1 %v5213_v60 }
0x1750   :  { %2891 = vmatprep.mubr.bf16.mxu1 %v5214_v58  ;;  %v6632_v11 = vpop.permute.xlu1 %3666 }
0x1751   :  { %3497 = vmatmul.mubr.bf16.gmra.mrb[100].mxu0 %v5256_v57 }
0x1752   :  { %3506 = vmatprep.mubr.bf16.mxu0 %v7145_v4 }
0x1754   :  { %v6634_v31 = vpop.permute.xlu1 %3671 }
0x1757   :  { %2892 = vmatmul.mubr.bf16.gmra.mrb[36].mxu1 %v5216_v33 }
0x1758   :  { %2899 = vmatprep.mubr.bf16.mxu1 %v5217_v37  ;;  %v6636_v16 = vpop.permute.xlu1 %3676 }
0x1759   :  { %3507 = vmatmul.mubr.bf16.gmra.mrb[104].mxu0 %v5257_v52 }
0x175a   :  { %3516 = vmatprep.mubr.bf16.mxu0 %v7145_v4 }
0x175c   :  { %v6638_v23 = vpop.permute.xlu1 %3681 }
0x175f   :  { %2900 = vmatmul.mubr.bf16.gmra.mrb[40].mxu1 %v5219_v22 }
0x1760   :  { %2907 = vmatprep.mubr.bf16.mxu1 %v5220_v43  ;;  %v6644_v56 = vpop.permute.xlu1 %3686 }
0x1761   :  { %3517 = vmatmul.mubr.bf16.gmra.mrb[108].mxu0 %v5258_v21 }
0x1762   :  { %3526 = vmatprep.mubr.bf16.mxu0 %v7145_v4 }
0x1764   :  { %v6655_v33 = vpop.permute.xlu1 %3691 }
0x1767   :  { %2908 = vmatmul.mubr.bf16.gmra.mrb[44].mxu1 %v5222_v47 }
0x1768   :  { %2915 = vmatprep.mubr.bf16.mxu1 %v5223_v42  ;;  %v6663_v21 = vpop.permute.xlu1 %3696 }
0x1769   :  { %3527 = vmatmul.mubr.bf16.gmra.mrb[112].mxu0 %v5259_v39 }
0x176a   :  { %3536 = vmatprep.mubr.bf16.mxu0 %v7145_v4 }
0x176f   :  { %2916 = vmatmul.mubr.bf16.gmra.mrb[48].mxu1 %v5225_v34 }
0x1770   :  { %2923 = vmatprep.mubr.bf16.mxu1 %v5226_v44 }
0x1771   :  { %3537 = vmatmul.mubr.bf16.gmra.mrb[116].mxu0 %v5260_v5 }
0x1772   :  { %3546 = vmatprep.mubr.bf16.mxu0 %v7145_v4 }
0x1777   :  { %2924 = vmatmul.mubr.bf16.gmra.mrb[52].mxu1 %v5228_v54 }
0x1778   :  { %2931 = vmatprep.mubr.bf16.mxu1 %v5229_v48 }
0x1779   :  { %3547 = vmatmul.mubr.bf16.gmra.mrb[120].mxu0 %v5261_v29 }
0x177a   :  { %3556 = vmatprep.mubr.bf16.mxu0 %v7145_v4 }
0x177f   :  { %2932 = vmatmul.mubr.bf16.gmra.mrb[56].mxu1 %v5231_v1 }
0x1780   :  { %2939 = vmatprep.mubr.bf16.mxu1 %v5232_v6 }
0x1781   :  { %3557 = vmatmul.mubr.bf16.gmra.mrb[124].mxu0 %v5262_v0 }
0x1782   :  { %3566 = vmatprep.mubr.bf16.mxu0 %v7145_v4 }
0x1787   :  { %2940 = vmatmul.mubr.bf16.gmra.mrb[60].mxu1 %v5234_v28  ;;  %v6673_v28 = vpop.permute.xlu1 %3701 }
0x1788   :  { %2947 = vmatprep.mubr.bf16.mxu1 %v5235_v20  ;;  %7171 = vst [vmem:[#allocation6_spill] sm:$0xff] %v6673_v28 }
0x1789   :  { %3567 = vmatmul.mubr.bf16.gmra.mrb[128].mxu0 %v5263_v8 }
0x178a   :  { %3576 = vmatprep.mubr.bf16.mxu0 %v7145_v4 }
0x178f   :  { %2948 = vmatmul.mubr.bf16.gmra.mrb[64].mxu1 %v5237_v25 }
0x1790   :  { %2955 = vmatprep.mubr.bf16.mxu1 %v5238_v9 }
0x1791   :  { %3577 = vmatmul.mubr.bf16.gmra.mrb[132].mxu0 %v5264_v2 }
0x1792   :  { %3586 = vmatprep.mubr.bf16.mxu0 %v7145_v4 }
0x1797   :  { %2956 = vmatmul.mubr.bf16.gmra.mrb[68].mxu1 %v5240_v24 }
0x1798   :  { %2963 = vmatprep.mubr.bf16.mxu1 %v5241_v49 }
0x1799   :  { %3587 = vmatmul.mubr.bf16.gmra.mrb[136].mxu0 %v5265_v36 }
0x179f   :  { %2964 = vmatmul.mubr.bf16.gmra.mrb[72].mxu1 %v5243_v15  ;;  %v6683_v15 = vpop.permute.xlu1 %3706 }
0x17a0   :  { %2971 = vmatprep.mubr.bf16.mxu1 %v5245_v10 }
0x17a3   :  { %v6692_v36 = vpop.permute.xlu1 %3711 }
0x17a4   :  { %7172 = vst [vmem:[#allocation7_spill] sm:$0xff] %v6692_v36 }
0x17a7   :  { %2972 = vmatmul.mubr.bf16.gmra.mrb[76].mxu1 %v5247_v13 }
0x17a8   :  { %2979 = vmatprep.mubr.bf16.mxu1 %v5250_v61 }
0x17af   :  { %2980 = vmatmul.mubr.bf16.gmra.mrb[80].mxu1 %v5252_v55 }
0x17b9   :  { %v6640_v7 = vpop.f32.mrb[76].mxu0 }
0x17ba   :  { %v6642_v14 = vpop.f32.mrb[77].mxu0 }
0x17bb   :  { %v6648_v30 = vpop.f32.mrb[78].mxu0 }
0x17bc   :  { %v6650_v18 = vpop.f32.mrb[79].mxu0 }
0x17dc   :  { %v6653_v32 = vpop.f32.mrb[80].mxu0 }
0x17dd   :  { %v6657_v37 = vpop.f32.mrb[81].mxu0 }
0x17de   :  { %v6659_v57 = vpop.f32.mrb[82].mxu0 }
0x17df   :  { %v6665_v44 = vpop.f32.mrb[83].mxu0 }
0x1804   :  { %v6667_v54 = vpop.f32.mrb[84].mxu0 }
0x1805   :  { %v6670_v48 = vpop.f32.mrb[85].mxu0 }
0x1806   :  { %v6676_v24 = vpop.f32.mrb[86].mxu0 }
0x1807   :  { %v6679_v49 = vpop.f32.mrb[87].mxu0 }
0x180a   :  { %v4383_v45 = vpop.f32.mrb[20].mxu1 }
0x180b   :  { %v4384_v41 = vpop.f32.mrb[21].mxu1 }
0x180c   :  { %v4385_v46 = vadd.f32 %v4384_v41, %v4383_v45  ;;  %v4386_v63 = vpop.f32.mrb[22].mxu1  ;;  %v6681_v5 = vpop.f32.mrb[88].mxu0 }
0x180d   :  { %v4387_v50 = vpop.f32.mrb[23].mxu1  ;;  %v6686_v13 = vpop.f32.mrb[89].mxu0 }
0x180e   :  { %v4388_v38 = vadd.f32 %v4387_v50, %v4386_v63  ;;  %2990 = vperm.xlu1 %4539, %v4385_v46   ;;  %3149 = vperm.xlu0 %5100, %v4385_v46   ;;  %v6690_v2 = vpop.f32.mrb[90].mxu0 }
0x180f   :  { %v6695_v41 = vpop.f32.mrb[91].mxu0 }
0x1812   :  { %v4389_v59 = vpop.f32.mrb[24].mxu1  ;;  %5101 = vset.pattern.permute.xlu1 %v7148_v51  ;;  %5106 = vset.pattern.permute.xlu0 %v7145_v4 }
0x1813   :  { %v4390_v27 = vpop.f32.mrb[25].mxu1  ;;  %3153 = vperm.xlu1 %5101, %v4388_v38  }
0x1814   :  { %v4391_v17 = vadd.f32 %v4390_v27, %v4389_v59  ;;  %v4392_v3 = vpop.f32.mrb[26].mxu1  ;;  %v6697_v63 = vpop.f32.mrb[92].mxu0 }
0x1815   :  { %v4393_v60 = vpop.f32.mrb[27].mxu1  ;;  %v6700_v27 = vpop.f32.mrb[93].mxu0 }
0x1816   :  { %v4394_v58 = vadd.f32 %v4393_v60, %v4392_v3  ;;  %v6703_v3 = vpop.permute.xlu1 %3716 }
0x1817   :  { %5102 = vset.pattern.permute.xlu1 %v7145_v4  ;;  %7173 = vst [vmem:[#allocation8_spill] sm:$0xff] %v6703_v3 }
0x1818   :  { %2995 = vperm.xlu1 %5102, %v4388_v38   ;;  %3005 = vperm.xlu0 %5106, %v4394_v58  }
0x181a   :  { %v4395_v22 = vpop.f32.mrb[28].mxu1 }
0x181b   :  { %v4396_v43 = vpop.f32.mrb[29].mxu1 }
0x181c   :  { %v4397_v52 = vadd.f32 %v4396_v43, %v4395_v22  ;;  %5103 = vset.pattern.permute.xlu1 %v7148_v51  ;;  %5107 = vset.pattern.permute.xlu0 %v7148_v51  ;;  %v4398_v47 = vpop.f32.mrb[30].mxu1 }
0x181d   :  { %3157 = vperm.xlu1 %5103, %v4391_v17   ;;  %v4399_v42 = vpop.f32.mrb[31].mxu1 }
0x181e   :  { %3165 = vperm.xlu0 %5107, %v4397_v52   ;;  %v4400_v34 = vadd.f32 %v4399_v42, %v4398_v47 }
0x1821   :  { %5104 = vset.pattern.permute.xlu1 %v7145_v4 }
0x1822   :  { %3000 = vperm.xlu1 %5104, %v4391_v17   ;;  %5110 = vset.pattern.permute.xlu0 %v7145_v4  ;;  %v4401_v1 = vpop.f32.mrb[32].mxu1 }
0x1823   :  { %3015 = vperm.xlu0 %5110, %v4400_v34   ;;  %v4402_v6 = vpop.f32.mrb[33].mxu1 }
0x1824   :  { %v4403_v20 = vadd.f32 %v4402_v6, %v4401_v1  ;;  %v4404_v25 = vpop.f32.mrb[34].mxu1 }
0x1825   :  { %v4405_v9 = vpop.f32.mrb[35].mxu1 }
0x1826   :  { %5105 = vset.pattern.permute.xlu1 %v7148_v51  ;;  %v4406_v39 = vadd.f32 %v4405_v9, %v4404_v25 }
0x1827   :  { %3161 = vperm.xlu1 %5105, %v4394_v58   ;;  %5111 = vset.pattern.permute.xlu0 %v7148_v51  ;;  %v6706_v58 = vpop.f32.mrb[94].mxu0 }
0x1828   :  { %3173 = vperm.xlu0 %5111, %v4403_v20   ;;  %v6709_v47 = vpop.f32.mrb[95].mxu0 }
0x182a   :  { %v4407_v10 = vpop.f32.mrb[36].mxu1 }
0x182b   :  { %5108 = vset.pattern.permute.xlu1 %v7145_v4  ;;  %v4408_v29 = vpop.f32.mrb[37].mxu1 }
0x182c   :  { %3010 = vperm.xlu1 %5108, %v4397_v52   ;;  %5114 = vset.pattern.permute.xlu0 %v7145_v4  ;;  %v4409_v61 = vadd.f32 %v4408_v29, %v4407_v10  ;;  %v4410_v55 = vpop.f32.mrb[38].mxu1 }
0x182d   :  { %3025 = vperm.xlu0 %5114, %v4406_v39   ;;  %v4411_v0 = vpop.f32.mrb[39].mxu1 }
0x182e   :  { %v4412_v8 = vadd.f32 %v4411_v0, %v4410_v55 }
0x1830   :  { %5109 = vset.pattern.permute.xlu1 %v7148_v51 }
0x1831   :  { %3169 = vperm.xlu1 %5109, %v4400_v34   ;;  %5115 = vset.pattern.permute.xlu0 %v7148_v51  ;;  %v6711_v34 = vpop.f32.mrb[96].mxu0 }
0x1832   :  { %3181 = vperm.xlu0 %5115, %v4409_v61   ;;  %v4413_v45 = vpop.f32.mrb[40].mxu1  ;;  %v6714_v6 = vpop.f32.mrb[97].mxu0 }
0x1833   :  { %v4414_v46 = vpop.f32.mrb[41].mxu1  ;;  %v6720_v29 = vpop.f32.mrb[98].mxu0 }
0x1834   :  { %v4415_v50 = vadd.f32 %v4414_v46, %v4413_v45  ;;  %v4416_v38 = vpop.f32.mrb[42].mxu1 }
0x1835   :  { %5112 = vset.pattern.permute.xlu1 %v7145_v4  ;;  %v4417_v59 = vpop.f32.mrb[43].mxu1 }
0x1836   :  { %3020 = vperm.xlu1 %5112, %v4403_v20   ;;  %5118 = vset.pattern.permute.xlu0 %v7145_v4  ;;  %v4418_v17 = vadd.f32 %v4417_v59, %v4416_v38  ;;  %v6716_v20 = vpop.permute.xlu1 %3721 }
0x1837   :  { %3035 = vperm.xlu0 %5118, %v4412_v8   ;;  %7174 = vst [vmem:[#allocation9_spill] sm:$0xff] %v6716_v20  ;;  %v7181_v20 = vmov 1  }
0x183a   :  { %5113 = vset.pattern.permute.xlu1 %v7148_v51  ;;  %v4419_v60 = vpop.f32.mrb[44].mxu1  ;;  %v6723_v0 = vpop.permute.xlu1 %3726 }
0x183b   :  { %3177 = vperm.xlu1 %5113, %v4406_v39   ;;  %5119 = vset.pattern.permute.xlu0 %v7148_v51  ;;  %v4420_v22 = vpop.f32.mrb[45].mxu1  ;;  %7175 = vst [vmem:[#allocation10_spill] sm:$0xff] %v6723_v0 }
0x183c   :  { %3189 = vperm.xlu0 %5119, %v4415_v50   ;;  %v4421_v43 = vadd.f32 %v4420_v22, %v4419_v60  ;;  %v4422_v52 = vpop.f32.mrb[46].mxu1 }
0x183d   :  { %v4423_v42 = vpop.f32.mrb[47].mxu1 }
0x183e   :  { %v4424_v1 = vadd.f32 %v4423_v42, %v4422_v52  ;;  %v6733_v60 = vpop.permute.xlu1 %3731 }
0x183f   :  { %5116 = vset.pattern.permute.xlu1 %v7145_v4  ;;  %7176 = vst [vmem:[#allocation11_spill] sm:$0xff] %v6733_v60 }
0x1840   :  { %3030 = vperm.xlu1 %5116, %v4409_v61   ;;  %5122 = vset.pattern.permute.xlu0 %v7145_v4  ;;  %v6725_v61 = vpop.f32.mrb[99].mxu0 }
0x1841   :  { %3045 = vperm.xlu0 %5122, %v4418_v17   ;;  %v6727_v46 = vpop.f32.mrb[100].mxu0 }
0x1842   :  { %v4425_v25 = vpop.f32.mrb[48].mxu1  ;;  %v6730_v38 = vpop.f32.mrb[101].mxu0 }
0x1843   :  { %v4426_v9 = vpop.f32.mrb[49].mxu1 }
0x1844   :  { %5117 = vset.pattern.permute.xlu1 %v7148_v51  ;;  %v4427_v39 = vadd.f32 %v4426_v9, %v4425_v25  ;;  %v4428_v10 = vpop.f32.mrb[50].mxu1  ;;  %v6738_v9 = vpop.f32.mrb[102].mxu0 }
0x1845   :  { %3185 = vperm.xlu1 %5117, %v4412_v8   ;;  %5123 = vset.pattern.permute.xlu0 %v7148_v51  ;;  %v4429_v55 = vpop.f32.mrb[51].mxu1 }
0x1846   :  { %3197 = vperm.xlu0 %5123, %v4421_v43   ;;  %v4430_v45 = vadd.f32 %v4429_v55, %v4428_v10  ;;  %v6745_v55 = vpop.permute.xlu1 %3736 }
0x1847   :  { %7178 = vst [vmem:[#allocation13_spill] sm:$0xff] %v6745_v55 }
0x1849   :  { %5120 = vset.pattern.permute.xlu1 %v7145_v4 }
0x184a   :  { %3040 = vperm.xlu1 %5120, %v4415_v50   ;;  %5126 = vset.pattern.permute.xlu0 %v7145_v4  ;;  %v4431_v59 = vpop.f32.mrb[52].mxu1  ;;  %v6741_v50 = vpop.f32.mrb[103].mxu0 }
0x184b   :  { %3055 = vperm.xlu0 %5126, %v4424_v1   ;;  %v4432_v8 = vpop.f32.mrb[53].mxu1  ;;  %v6743_v10 = vpop.f32.mrb[104].mxu0 }
0x184c   :  { %v4433_v22 = vadd.f32 %v4432_v8, %v4431_v59  ;;  %v4434_v52 = vpop.f32.mrb[54].mxu1  ;;  %7177 = vst [vmem:[#allocation12_spill] sm:$0xff] %v6743_v10  ;;  %v7179_v59 = vmov 0   ;;  %v6748_v60 = vpop.f32.mrb[105].mxu0 }
0x184d   :  { %v4435_v42 = vpop.f32.mrb[55].mxu1  ;;  %7180 = vst [vmem:[#allocation14_spill] sm:$0xff] %v6748_v60  ;;  %v6754_v0 = vpop.f32.mrb[106].mxu0 }
0x184e   :  { %5121 = vset.pattern.permute.xlu1 %v7148_v51  ;;  %v6736_v25 = vadd.f32 %v4435_v42, %v4434_v52  ;;  %v6756_v55 = vpop.permute.xlu1 %3741 }
0x184f   :  { %3193 = vperm.xlu1 %5121, %v4418_v17   ;;  %5127 = vset.pattern.permute.xlu0 %v7148_v51  ;;  %7182 = vst [vmem:[#allocation15_spill] sm:$0xff] %v6756_v55 }
0x1850   :  { %3205 = vperm.xlu0 %5127, %v4427_v39  }
0x1852   :  { %v4437_v4 = vpop.f32.mrb[56].mxu1  ;;  %v6772_v55 = vpop.permute.xlu1 %3746 }
0x1853   :  { %5124 = vset.pattern.permute.xlu1 %v7179_v59  ;;  %v4438_v8 = vpop.f32.mrb[57].mxu1  ;;  %7186 = vst [vmem:[#allocation19_spill] sm:$0xff] %v6772_v55 }
0x1854   :  { %3050 = vperm.xlu1 %5124, %v4421_v43   ;;  %5130 = vset.pattern.permute.xlu0 %v7179_v59  ;;  %v4439_v52 = vadd.f32 %v4438_v8, %v4437_v4  ;;  %v4440_v17 = vpop.f32.mrb[58].mxu1  ;;  %v6759_v43 = vpop.f32.mrb[107].mxu0 }
0x1855   :  { %3065 = vperm.xlu0 %5130, %v4430_v45   ;;  %v4441_v42 = vpop.f32.mrb[59].mxu1  ;;  %7183 = vst [vmem:[#allocation16_spill] sm:$0xff] %v6759_v43  ;;  %v6761_v4 = vpop.f32.mrb[108].mxu0 }
0x1856   :  { %v6751_v51 = vadd.f32 %v4441_v42, %v4440_v17  ;;  %7184 = vst [vmem:[#allocation17_spill] sm:$0xff] %v6761_v4  ;;  %v6766_v28 = vpop.f32.mrb[109].mxu0 }
0x1857   :  { %7185 = vst [vmem:[#allocation18_spill] sm:$0xff] %v6766_v28 }
0x1858   :  { %5125 = vset.pattern.permute.xlu1 %v7181_v20 }
0x1859   :  { %3201 = vperm.xlu1 %5125, %v4424_v1   ;;  %5131 = vset.pattern.permute.xlu0 %v7181_v20 }
0x185a   :  { %3213 = vperm.xlu0 %5131, %v4433_v22   ;;  %v4443_v36 = vpop.f32.mrb[60].mxu1 }
0x185b   :  { %v4444_v3 = vpop.f32.mrb[61].mxu1 }
0x185c   :  { %v6763_v8 = vadd.f32 %v4444_v3, %v4443_v36  ;;  %v4446_v17 = vpop.f32.mrb[62].mxu1  ;;  %v6775_v36 = vpop.f32.mrb[110].mxu0 }
0x185d   :  { %5128 = vset.pattern.permute.xlu1 %v7179_v59  ;;  %v4447_v42 = vpop.f32.mrb[63].mxu1  ;;  %7187 = vst [vmem:[#allocation20_spill] sm:$0xff] %v6775_v36  ;;  %v6780_v43 = vpop.f32.mrb[111].mxu0 }
0x185e   :  { %3060 = vperm.xlu1 %5128, %v4427_v39   ;;  %5134 = vset.pattern.permute.xlu0 %v7179_v59  ;;  %v6769_v1 = vadd.f32 %v4447_v42, %v4446_v17  ;;  %7188 = vst [vmem:[#allocation21_spill] sm:$0xff] %v6780_v43  ;;  %v6782_v42 = vpop.f32.mrb[112].mxu0  ;;  %v6789_v36 = vpop.permute.xlu1 %3751 }
0x185f   :  { %3075 = vperm.xlu0 %5134, %v6736_v25   ;;  %7189 = vst [vmem:[#allocation22_spill] sm:$0xff] %v6782_v42  ;;  %v6787_v55 = vpop.f32.mrb[113].mxu0  ;;  %7191 = vst [vmem:[#allocation24_spill] sm:$0xff] %v6789_v36 }
0x1860   :  { %7190 = vst [vmem:[#allocation23_spill] sm:$0xff] %v6787_v55 }
0x1862   :  { %5129 = vset.pattern.permute.xlu1 %v7181_v20  ;;  %v4449_v4 = vpop.f32.mrb[64].mxu1  ;;  %v6800_v36 = vpop.permute.xlu1 %3756 }
0x1863   :  { %3209 = vperm.xlu1 %5129, %v4430_v45   ;;  %5135 = vset.pattern.permute.xlu0 %v7181_v20  ;;  %v4450_v3 = vpop.f32.mrb[65].mxu1  ;;  %7193 = vst [vmem:[#allocation26_spill] sm:$0xff] %v6800_v36 }
0x1864   :  { %3221 = vperm.xlu0 %5135, %v4439_v52   ;;  %v6778_v28 = vadd.f32 %v4450_v3, %v4449_v4  ;;  %v4452_v39 = vpop.f32.mrb[66].mxu1 }
0x1865   :  { %v4453_v17 = vpop.f32.mrb[67].mxu1 }
0x1866   :  { %v6784_v60 = vadd.f32 %v4453_v17, %v4452_v39  ;;  %v6796_v39 = vpop.f32.mrb[114].mxu0  ;;  %v6814_v36 = vpop.permute.xlu1 %3761 }
0x1867   :  { %5132 = vset.pattern.permute.xlu1 %v7179_v59  ;;  %7192 = vst [vmem:[#allocation25_spill] sm:$0xff] %v6796_v39  ;;  %v6805_v55 = vpop.f32.mrb[115].mxu0  ;;  %7197 = vst [vmem:[#allocation30_spill] sm:$0xff] %v6814_v36 }
0x1868   :  { %3070 = vperm.xlu1 %5132, %v4433_v22   ;;  %5138 = vset.pattern.permute.xlu0 %v7179_v59  ;;  %7194 = vst [vmem:[#allocation27_spill] sm:$0xff] %v6805_v55  ;;  %v6807_v43 = vpop.f32.mrb[116].mxu0 }
0x1869   :  { %3085 = vperm.xlu0 %5138, %v6751_v51   ;;  %7195 = vst [vmem:[#allocation28_spill] sm:$0xff] %v6807_v43 }
0x186a   :  { %v4455_v45 = vpop.f32.mrb[68].mxu1 }
0x186b   :  { %v4456_v4 = vpop.f32.mrb[69].mxu1 }
0x186c   :  { %5133 = vset.pattern.permute.xlu1 %v7181_v20  ;;  %v6794_v3 = vadd.f32 %v4456_v4, %v4455_v45  ;;  %v4458_v42 = vpop.f32.mrb[70].mxu1  ;;  %v6810_v45 = vpop.f32.mrb[117].mxu0 }
0x186d   :  { %5139 = vset.pattern.permute.xlu0 %v7181_v20  ;;  %3217 = vperm.xlu1 %5133, %v6736_v25   ;;  %v4459_v17 = vpop.f32.mrb[71].mxu1  ;;  %7196 = vst [vmem:[#allocation29_spill] sm:$0xff] %v6810_v45  ;;  %v6821_v55 = vpop.f32.mrb[118].mxu0 }
0x186e   :  { %3229 = vperm.xlu0 %5139, %v6763_v8   ;;  %v6803_v22 = vadd.f32 %v4459_v17, %v4458_v42  ;;  %7198 = vst [vmem:[#allocation31_spill] sm:$0xff] %v6821_v55 }
0x1871   :  { %5136 = vset.pattern.permute.xlu1 %v7179_v59 }
0x1872   :  { %5142 = vset.pattern.permute.xlu0 %v7179_v59  ;;  %3080 = vperm.xlu1 %5136, %v4439_v52   ;;  %v4461_v4 = vpop.f32.mrb[72].mxu1  ;;  %v6826_v52 = vpop.f32.mrb[119].mxu0 }
0x1873   :  { %3095 = vperm.xlu0 %5142, %v6769_v1   ;;  %v4462_v25 = vpop.f32.mrb[73].mxu1  ;;  %7199 = vst [vmem:[#allocation32_spill] sm:$0xff] %v6826_v52  ;;  %v6828_v45 = vpop.f32.mrb[120].mxu0 }
0x1874   :  { %v6816_v39 = vadd.f32 %v4462_v25, %v4461_v4  ;;  %v4464_v42 = vpop.f32.mrb[74].mxu1  ;;  %7200 = vst [vmem:[#allocation33_spill] sm:$0xff] %v6828_v45  ;;  %v6830_v4 = vpop.permute.xlu1 %3766 }
0x1875   :  { %v4465_v17 = vpop.f32.mrb[75].mxu1  ;;  %7201 = vst [vmem:[#allocation34_spill] sm:$0xff] %v6830_v4 }
0x1876   :  { %5137 = vset.pattern.permute.xlu1 %v7181_v20  ;;  %v6819_v43 = vadd.f32 %v4465_v17, %v4464_v42  ;;  %v6833_v42 = vpop.f32.mrb[121].mxu0 }
0x1877   :  { %5143 = vset.pattern.permute.xlu0 %v7181_v20  ;;  %3225 = vperm.xlu1 %5137, %v6751_v51   ;;  %7202 = vst [vmem:[#allocation35_spill] sm:$0xff] %v6833_v42  ;;  %v6843_v4 = vpop.f32.mrb[122].mxu0 }
0x1878   :  { %3237 = vperm.xlu0 %5143, %v6778_v28   ;;  %7203 = vst [vmem:[#allocation36_spill] sm:$0xff] %v6843_v4  ;;  %v6845_v45 = vpop.permute.xlu1 %3771 }
0x1879   :  { %7204 = vst [vmem:[#allocation37_spill] sm:$0xff] %v6845_v45 }
0x187a   :  { %v4467_v25 = vpop.f32.mrb[76].mxu1 }
0x187b   :  { %5140 = vset.pattern.permute.xlu1 %v7179_v59  ;;  %v4468_v36 = vpop.f32.mrb[77].mxu1 }
0x187c   :  { %5146 = vset.pattern.permute.xlu0 %v7179_v59  ;;  %3090 = vperm.xlu1 %5140, %v6763_v8   ;;  %v6837_v17 = vadd.f32 %v4468_v36, %v4467_v25  ;;  %v4470_v51 = vpop.f32.mrb[78].mxu1  ;;  %v6850_v36 = vpop.f32.mrb[123].mxu0 }
0x187d   :  { %3105 = vperm.xlu0 %5146, %v6784_v60   ;;  %v4471_v52 = vpop.f32.mrb[79].mxu1  ;;  %v6852_v42 = vpop.f32.mrb[124].mxu0 }
0x187e   :  { %v6840_v55 = vadd.f32 %v4471_v52, %v4470_v51  ;;  %7205 = vst [vmem:[#allocation38_spill] sm:$0xff] %v6852_v42  ;;  %v6857_v10 = vpop.f32.mrb[125].mxu0  ;;  %v6864_v45 = vpop.permute.xlu1 %3776 }
0x187f   :  { %7206 = vst [vmem:[#allocation39_spill] sm:$0xff] %v6857_v10  ;;  %7207 = vst [vmem:[#allocation40_spill] sm:$0xff] %v6864_v45 }
0x1880   :  { %5141 = vset.pattern.permute.xlu1 %v7181_v20 }
0x1881   :  { %5147 = vset.pattern.permute.xlu0 %v7181_v20  ;;  %3233 = vperm.xlu1 %5141, %v6769_v1  }
0x1882   :  { %3245 = vperm.xlu0 %5147, %v6794_v3   ;;  %v4473_v8 = vpop.f32.mrb[80].mxu1 }
0x1883   :  { %v4474_v25 = vpop.f32.mrb[81].mxu1 }
0x1884   :  { %v6854_v52 = vadd.f32 %v4474_v25, %v4473_v8  ;;  %v4476_v51 = vpop.f32.mrb[82].mxu1  ;;  %v6867_v8 = vpop.f32.mrb[126].mxu0 }
0x1885   :  { %5144 = vset.pattern.permute.xlu1 %v7179_v59  ;;  %v4477_v4 = vpop.f32.mrb[83].mxu1  ;;  %7208 = vst [vmem:[#allocation41_spill] sm:$0xff] %v6867_v8  ;;  %v6872_v25 = vpop.f32.mrb[127].mxu0 }
0x1886   :  { %5150 = vset.pattern.permute.xlu0 %v7179_v59  ;;  %3100 = vperm.xlu1 %5144, %v6778_v28   ;;  %v6861_v1 = vadd.f32 %v4477_v4, %v4476_v51  ;;  %7209 = vst [vmem:[#allocation42_spill] sm:$0xff] %v6872_v25  ;;  %v6874_v4 = vpop.f32.mrb[128].mxu0 }
0x1887   :  { %3115 = vperm.xlu0 %5150, %v6803_v22   ;;  %7210 = vst [vmem:[#allocation43_spill] sm:$0xff] %v6874_v4  ;;  %v6878_v45 = vpop.f32.mrb[129].mxu0 }
0x1888   :  { %7211 = vst [vmem:[#allocation44_spill] sm:$0xff] %v6878_v45 }
0x188a   :  { %5145 = vset.pattern.permute.xlu1 %v7181_v20 }
0x188b   :  { %5151 = vset.pattern.permute.xlu0 %v7181_v20  ;;  %3241 = vperm.xlu1 %5145, %v6784_v60  }
0x188c   :  { %3253 = vperm.xlu0 %5151, %v6816_v39  }
0x188d   :  { %v3150_v10 = vpop.permute.xlu0 %3149  ;;  %v2991_v28 = vpop.permute.xlu1 %2990 }
0x188e   :  { %v3441_v51 = vadd.f32 %v6642_v14, %v3150_v10  ;;  %v3439_v8 = vadd.f32 %v6640_v7, %v2991_v28  ;;  %v6887_v14 = vpop.f32.mrb[130].mxu0 }
0x188f   :  { %5148 = vset.pattern.permute.xlu1 %v7179_v59  ;;  %7212 = vst [vmem:[#allocation45_spill] sm:$0xff] %v6887_v14 }
0x1890   :  { %5154 = vset.pattern.permute.xlu0 %v7179_v59  ;;  %3110 = vperm.xlu1 %5148, %v6794_v3   ;;  %v3790_v42 = vadd.f32 %v6615_v35, %v3441_v51  ;;  %v6893_v3 = vpop.f32.mrb[131].mxu0 }
0x1891   :  { %3125 = vperm.xlu0 %5154, %v6819_v43   ;;  %v6897_v28 = vpop.f32.mrb[132].mxu0 }
0x1892   :  { %v3154_v60 = vpop.permute.xlu1 %3153  ;;  %v3854_v45 = vmax.f32 %v3790_v42, 0.0  ;;  %v6900_v14 = vpop.f32.mrb[133].mxu0 }
0x1893   :  { %v3445_v25 = vadd.f32 %v6650_v18, %v3154_v60  ;;  %v3789_v18 = vadd.f32 %v6615_v35, %v3439_v8 }
0x1894   :  { %5149 = vset.pattern.permute.xlu1 %v7181_v20 }
0x1895   :  { %v3792_v10 = vadd.f32 %v6617_v12, %v3445_v25  ;;  %5155 = vset.pattern.permute.xlu0 %v7181_v20  ;;  %3249 = vperm.xlu1 %5149, %v6803_v22   ;;  %v3853_v35 = vmax.f32 %v3789_v18, 0.0 }
0x1896   :  { %3261 = vperm.xlu0 %5155, %v6837_v17  }
0x1897   :  { %v3856_v51 = vmax.f32 %v3792_v10, 0.0  ;;  %v2996_v4 = vpop.permute.xlu1 %2995  ;;  %v3006_v60 = vpop.permute.xlu0 %3005 }
0x1898   :  { %v3443_v7 = vadd.f32 %v6648_v30, %v2996_v4  ;;  %v3453_v4 = vadd.f32 %v6659_v57, %v3006_v60 }
0x1899   :  { %5152 = vset.pattern.permute.xlu1 %v7179_v59  ;;  %v3926_v25 = vpack.c.bf16 %v3856_v51, %v3854_v45  ;;  %v6908_v45 = vpop.f32.mrb[134].mxu0 }
0x189a   :  { %v3791_v22 = vadd.f32 %v6617_v12, %v3443_v7  ;;  %5158 = vset.pattern.permute.xlu0 %v7179_v59  ;;  %3120 = vperm.xlu1 %5152, %v6816_v39   ;;  %v3795_v39 = vadd.f32 %v6624_v26, %v3453_v4  ;;  %v3959_v4 = vld [vmem:[%s7137_s15 + $0x10] sm:$0xff] }
0x189b   :  { %3135 = vperm.xlu0 %5158, %v6840_v55   ;;  %4045 = vmatprep.subr.bf16.mxu1 %v3926_v25 }
0x189c   :  { %v3855_v42 = vmax.f32 %v3791_v22, 0.0  ;;  %v3158_v30 = vpop.permute.xlu1 %3157 }
0x189d   :  { %v3166_v8 = vpop.permute.xlu0 %3165  ;;  %v3451_v57 = vadd.f32 %v6657_v37, %v3158_v30 }
0x189e   :  { %v3925_v10 = vpack.c.bf16 %v3855_v42, %v3853_v35  ;;  %5153 = vset.pattern.permute.xlu1 %v7181_v20 }
0x189f   :  { %3257 = vperm.xlu1 %5153, %v6819_v43   ;;  %5159 = vset.pattern.permute.xlu0 %v7181_v20  ;;  %v3859_v43 = vmax.f32 %v3795_v39, 0.0  ;;  %v3794_v22 = vadd.f32 %v6622_v53, %v3451_v57 }
0x18a0   :  { %4046 = vmatpush1.bf16.msra.mxu1 %v3925_v10  ;;  %3269 = vperm.xlu0 %5159, %v6854_v52   ;;  %v6933_v10 = vpop.f32.mrb[135].mxu0 }
0x18a1   :  { %v3001_v12 = vpop.permute.xlu1 %3000 }
0x18a2   :  { %v3449_v51 = vadd.f32 %v6653_v32, %v3001_v12  ;;  %v3016_v18 = vpop.permute.xlu0 %3015  ;;  %v3957_v32 = vld [vmem:[%s7137_s15] sm:$0xff] }
0x18a3   :  { %5156 = vset.pattern.permute.xlu1 %v7179_v59  ;;  %v3463_v30 = vadd.f32 %v6676_v24, %v3016_v18  ;;  %v3461_v18 = vadd.f32 %v6670_v48, %v3166_v8 }
0x18a4   :  { %v3793_v7 = vadd.f32 %v6622_v53, %v3449_v51  ;;  %3130 = vperm.xlu1 %5156, %v6837_v17   ;;  %5162 = vset.pattern.permute.xlu0 %v7179_v59  ;;  %v3858_v53 = vmax.f32 %v3794_v22, 0.0 }
0x18a5   :  { %3145 = vperm.xlu0 %5162, %v6861_v1   ;;  %v3799_v39 = vadd.f32 %v6628_v19, %v3463_v30 }
0x18a6   :  { %v3857_v60 = vmax.f32 %v3793_v7, 0.0  ;;  %v3162_v25 = vpop.permute.xlu1 %3161  ;;  %v3961_v7 = vld [vmem:[%s7137_s15 + $0x20] sm:$0xff] }
0x18a7   :  { %v3455_v37 = vadd.f32 %v6665_v44, %v3162_v25  ;;  %v3174_v35 = vpop.permute.xlu0 %3173  ;;  %v3863_v48 = vmax.f32 %v3799_v39, 0.0  ;;  %v3798_v25 = vadd.f32 %v6626_v62, %v3461_v18 }
0x18a8   :  { %v3927_v42 = vpack.c.bf16 %v3859_v43, %v3857_v60  ;;  %5157 = vset.pattern.permute.xlu1 %v7181_v20 }
0x18a9   :  { %v3796_v17 = vadd.f32 %v6624_v26, %v3455_v37  ;;  %3265 = vperm.xlu1 %5157, %v6840_v55   ;;  %3967 = vperm.xlu0 %5162, %v3957_v32   ;;  %v6939_v55 = vpop.f32.mrb[136].mxu0 }
0x18aa   :  { %v6946_v43 = vpop.f32.mrb[137].mxu0 }
0x18ab   :  { %v3860_v12 = vmax.f32 %v3796_v17, 0.0  ;;  %v3011_v44 = vpop.permute.xlu1 %3010  ;;  %v3963_v17 = vld [vmem:[%s7137_s15 + $0x30] sm:$0xff] }
0x18ac   :  { %v3459_v24 = vadd.f32 %v6667_v54, %v3011_v44  ;;  %v3026_v51 = vpop.permute.xlu0 %3025  ;;  %v6948_v54 = vpop.f32.mrb[138].mxu0  ;;  %v4143_v44 = vld [vmem:[%s7139_s17] sm:$0x3] }
0x18ad   :  { %5160 = vset.pattern.permute.xlu1 %v7179_v59  ;;  %3977 = vperm.xlu0 %5162, %v3959_v4   ;;  %v3928_v26 = vpack.c.bf16 %v3860_v12, %v3858_v53  ;;  %v3473_v30 = vadd.f32 %v6690_v2, %v3026_v51  ;;  %v3627_v53 = vld [vmem:[%s7135_s13 + $0xf0] sm:$0xff] }
0x18ae   :  { %v3797_v57 = vadd.f32 %v6626_v62, %v3459_v24  ;;  %3140 = vperm.xlu1 %5160, %v6854_v52   ;;  %v6952_v52 = vpop.f32.mrb[139].mxu0  ;;  %v3862_v62 = vmax.f32 %v3798_v25, 0.0  ;;  %v3628_v24 = vld [vmem:[%s7135_s13 + $0xf8] sm:$0xff] }
0x18af   :  { %4047 = vmatprep.subr.bf16.mxu1 %v3928_v26  ;;  %v3803_v2 = vadd.f32 %v6632_v11, %v3473_v30 }
0x18b0   :  { %v3861_v8 = vmax.f32 %v3797_v57, 0.0  ;;  %4048 = vmatpush1.bf16.msra.mxu1 %v3927_v42  ;;  %v3170_v60 = vpop.permute.xlu1 %3169 }
0x18b1   :  { %v3465_v32 = vadd.f32 %v6679_v49, %v3170_v60  ;;  %v3182_v22 = vpop.permute.xlu0 %3181  ;;  %3987 = vperm.xlu0 %5162, %v3961_v7  }
0x18b2   :  { %v3929_v37 = vpack.c.bf16 %v3863_v48, %v3861_v8  ;;  %5161 = vset.pattern.permute.xlu1 %v7181_v20  ;;  %v3958_v8 = vld [vmem:[%s7137_s15 + $0x8] sm:$0xff] }
0x18b3   :  { %v3800_v42 = vadd.f32 %v6628_v19, %v3465_v32  ;;  %3273 = vperm.xlu1 %5161, %v6861_v1   ;;  %v3471_v19 = vadd.f32 %v6686_v13, %v3174_v35 }
0x18b5   :  { %v3864_v4 = vmax.f32 %v3800_v42, 0.0  ;;  %v3021_v49 = vpop.permute.xlu1 %3020  ;;  %3997 = vperm.xlu0 %5162, %v3963_v17   ;;  %v3802_v26 = vadd.f32 %v6630_v40, %v3471_v19  ;;  %v5268_v42 = vld [vmem:[%s7136_s14 + $0x4] ss:$8 sps:$4 sm:$0xff]  }
0x18b6   :  { %v3469_v20 = vadd.f32 %v6681_v5, %v3021_v49  ;;  %v3036_v12 = vpop.permute.xlu0 %3035  ;;  %v3867_v5 = vmax.f32 %v3803_v2, 0.0  ;;  %4077 = vmatprep.mubr.bf16.mxu1 %v5268_v42 }
0x18b7   :  { %5163 = vset.pattern.permute.xlu1 %v7179_v59  ;;  %v3930_v1 = vpack.c.bf16 %v3864_v4, %v3862_v62  ;;  %v3483_v7 = vadd.f32 %v6706_v58, %v3036_v12  ;;  %v3866_v60 = vmax.f32 %v3802_v26, 0.0 }
0x18b8   :  { %v3801_v39 = vadd.f32 %v6630_v40, %v3469_v20  ;;  %3781 = vperm.xlu1 %5163, %v3627_v53   ;;  %v3962_v53 = vld [vmem:[%s7137_s15 + $0x28] sm:$0xff] }
0x18b9   :  { %4049 = vmatprep.subr.bf16.mxu1 %v3930_v1  ;;  %4146 = vperm.xlu0 %5162, %v4143_v44  }
0x18ba   :  { %v3865_v51 = vmax.f32 %v3801_v39, 0.0  ;;  %4050 = vmatpush1.bf16.msra.mxu1 %v3929_v37  ;;  %v3178_v18 = vpop.permute.xlu1 %3177  ;;  %v3807_v37 = vadd.f32 %v6636_v16, %v3483_v7 }
0x18bb   :  { %v3475_v13 = vadd.f32 %v6695_v41, %v3178_v18  ;;  %v3190_v35 = vpop.permute.xlu0 %3189  ;;  %v3481_v41 = vadd.f32 %v6700_v27, %v3182_v22 }
0x18bc   :  { %v3931_v57 = vpack.c.bf16 %v3867_v5, %v3865_v51  ;;  %3786 = vperm.xlu1 %5163, %v3628_v24   ;;  %v3871_v62 = vmax.f32 %v3807_v37, 0.0  ;;  %v3491_v5 = vadd.f32 %v6714_v6, %v3190_v35 }
0x18bd   :  { %v3804_v48 = vadd.f32 %v6632_v11, %v3475_v13  ;;  %v3960_v11 = vld [vmem:[%s7137_s15 + $0x18] sm:$0xff]  ;;  %v3806_v49 = vadd.f32 %v6634_v31, %v3481_v41 }
0x18be   :  { %v3810_v13 = vadd.f32 %v6638_v23, %v3491_v5 }
0x18bf   :  { %v3868_v25 = vmax.f32 %v3804_v48, 0.0  ;;  %v3031_v32 = vpop.permute.xlu1 %3030  ;;  %v3870_v44 = vmax.f32 %v3806_v49, 0.0  ;;  %v7213_v49 = vld [vmem:[#allocation12_spill] sm:$0xff] }
0x18c0   :  { %v3479_v40 = vadd.f32 %v6697_v63, %v3031_v32  ;;  %v3046_v30 = vpop.permute.xlu0 %3045  ;;  %3972 = vperm.xlu1 %5163, %v3958_v8   ;;  %v3874_v6 = vmax.f32 %v3810_v13, 0.0  ;;  %v7219_v13 = vld [vmem:[#allocation17_spill] sm:$0xff] }
0x18c1   :  { %v3932_v17 = vpack.c.bf16 %v3868_v25, %v3866_v60  ;;  %v3493_v20 = vadd.f32 %v6720_v29, %v3046_v30 }
0x18c2   :  { %v3805_v58 = vadd.f32 %v6634_v31, %v3479_v40  ;;  %v3964_v31 = vld [vmem:[%s7137_s15 + $0x38] sm:$0xff] }
0x18c3   :  { %4051 = vmatprep.subr.bf16.mxu1 %v3932_v17 }
0x18c4   :  { %v3869_v4 = vmax.f32 %v3805_v58, 0.0  ;;  %3982 = vperm.xlu1 %5163, %v3960_v11   ;;  %4052 = vmatpush1.bf16.msra.mxu1 %v3931_v57  ;;  %v3186_v63 = vpop.permute.xlu1 %3185 }
0x18c5   :  { %v3485_v27 = vadd.f32 %v6709_v47, %v3186_v63  ;;  %v3198_v22 = vpop.permute.xlu0 %3197  ;;  %v3811_v47 = vadd.f32 %v6644_v56, %v3493_v20 }
0x18c6   :  { %v3933_v2 = vpack.c.bf16 %v3871_v62, %v3869_v4  ;;  %v3501_v40 = vadd.f32 %v6730_v38, %v3198_v22 }
0x18c7   :  { %v3808_v12 = vadd.f32 %v6636_v16, %v3485_v27  ;;  %v3875_v16 = vmax.f32 %v3811_v47, 0.0 }
0x18c8   :  { %3992 = vperm.xlu1 %5163, %v3962_v53   ;;  %v7214_v53 = vld [vmem:[#allocation14_spill] sm:$0xff] }
0x18c9   :  { %v3872_v19 = vmax.f32 %v3808_v12, 0.0  ;;  %v3041_v1 = vpop.permute.xlu1 %3040 }
0x18ca   :  { %v3489_v39 = vadd.f32 %v6711_v34, %v3041_v1  ;;  %v3056_v24 = vpop.permute.xlu0 %3055 }
0x18cb   :  { %v3934_v51 = vpack.c.bf16 %v3872_v19, %v3870_v44  ;;  %v3503_v34 = vadd.f32 %v6738_v9, %v3056_v24  ;;  %v7216_v19 = vld [vmem:[#allocation16_spill] sm:$0xff] }
0x18cc   :  { %v3809_v29 = vadd.f32 %v6638_v23, %v3489_v39  ;;  %4002 = vperm.xlu1 %5163, %v3964_v31   ;;  %v7217_v39 = vld [vmem:[#allocation20_spill] sm:$0xff] }
0x18cd   :  { %4053 = vmatprep.subr.bf16.mxu1 %v3934_v51  ;;  %v3815_v25 = vadd.f32 %v6663_v21, %v3503_v34 }
0x18ce   :  { %v3873_v18 = vmax.f32 %v3809_v29, 0.0  ;;  %4054 = vmatpush1.bf16.msra.mxu1 %v3933_v2  ;;  %v3194_v26 = vpop.permute.xlu1 %3193 }
0x18cf   :  { %v3495_v57 = vadd.f32 %v6725_v61, %v3194_v26  ;;  %v3206_v7 = vpop.permute.xlu0 %3205  ;;  %v3879_v61 = vmax.f32 %v3815_v25, 0.0 }
0x18d0   :  { %v3935_v48 = vpack.c.bf16 %v3875_v16, %v3873_v18  ;;  %v3511_v2 = vadd.f32 %v7214_v53, %v3206_v7  ;;  %v7218_v18 = vld [vmem:[#allocation8_spill] sm:$0xff] }
0x18d1   :  { %v3812_v8 = vadd.f32 %v6644_v56, %v3495_v57  ;;  %v3814_v56 = vadd.f32 %v6655_v33, %v3501_v40 }
0x18d3   :  { %v3876_v35 = vmax.f32 %v3812_v8, 0.0  ;;  %v3051_v60 = vpop.permute.xlu1 %3050  ;;  %v3878_v62 = vmax.f32 %v3814_v56, 0.0 }
0x18d4   :  { %v3499_v32 = vadd.f32 %v6727_v46, %v3051_v60  ;;  %v3066_v37 = vpop.permute.xlu0 %3065 }
0x18d5   :  { %v3936_v30 = vpack.c.bf16 %v3876_v35, %v3874_v6  ;;  %v3513_v42 = vadd.f32 %v6754_v0, %v3066_v37  ;;  %v7221_v6 = vld [vmem:[#allocation7_spill] sm:$0xff]  ;;  %v7222_v37 = vld [vmem:[#allocation21_spill] sm:$0xff] }
0x18d6   :  { %v3813_v23 = vadd.f32 %v6655_v33, %v3499_v32  ;;  %v7215_v33 = vld [vmem:[#allocation6_spill] sm:$0xff] }
0x18d7   :  { %4055 = vmatprep.subr.bf16.mxu1 %v3936_v30  ;;  %v3819_v63 = vadd.f32 %v6683_v15, %v3513_v42 }
0x18d8   :  { %v3877_v41 = vmax.f32 %v3813_v23, 0.0  ;;  %4056 = vmatpush1.bf16.msra.mxu1 %v3935_v48  ;;  %v3202_v9 = vpop.permute.xlu1 %3201  ;;  %v7220_v48 = vld [vmem:[#allocation18_spill] sm:$0xff] }
0x18d9   :  { %v3505_v17 = vadd.f32 %v6741_v50, %v3202_v9  ;;  %v3214_v11 = vpop.permute.xlu0 %3213  ;;  %v3883_v50 = vmax.f32 %v3819_v63, 0.0 }
0x18da   :  { %v3937_v58 = vpack.c.bf16 %v3879_v61, %v3877_v41  ;;  %v3521_v34 = vadd.f32 %v7220_v48, %v3214_v11  ;;  %v7223_v61 = vld [vmem:[#allocation25_spill] sm:$0xff] }
0x18db   :  { %v3816_v46 = vadd.f32 %v6663_v21, %v3505_v17  ;;  %v3818_v21 = vadd.f32 %v7215_v33, %v3511_v2 }
0x18dd   :  { %v3880_v38 = vmax.f32 %v3816_v46, 0.0  ;;  %v3061_v4 = vpop.permute.xlu1 %3060  ;;  %v3882_v51 = vmax.f32 %v3818_v21, 0.0  ;;  %v7225_v46 = vld [vmem:[#allocation22_spill] sm:$0xff]  ;;  %v7229_v21 = vld [vmem:[#allocation31_spill] sm:$0xff] }
0x18de   :  { %v3509_v27 = vadd.f32 %v7213_v49, %v3061_v4  ;;  %v3076_v22 = vpop.permute.xlu0 %3075  ;;  %v7226_v4 = vld [vmem:[#allocation23_spill] sm:$0xff] }
0x18df   :  { %v3938_v20 = vpack.c.bf16 %v3880_v38, %v3878_v62  ;;  %v3523_v24 = vadd.f32 %v7217_v39, %v3076_v22 }
0x18e0   :  { %v3817_v12 = vadd.f32 %v7215_v33, %v3509_v27  ;;  %v7227_v27 = vld [vmem:[#allocation9_spill] sm:$0xff] }
0x18e1   :  { %4057 = vmatprep.subr.bf16.mxu1 %v3938_v20  ;;  %v3823_v26 = vadd.f32 %v7218_v18, %v3523_v24  ;;  %v7230_v24 = vld [vmem:[#allocation13_spill] sm:$0xff] }
0x18e2   :  { %v3881_v44 = vmax.f32 %v3817_v12, 0.0  ;;  %4058 = vmatpush1.bf16.msra.mxu1 %v3937_v58  ;;  %v3210_v0 = vpop.permute.xlu1 %3209  ;;  %v7224_v58 = vld [vmem:[#allocation10_spill] sm:$0xff]  ;;  %v7228_v12 = vld [vmem:[#allocation27_spill] sm:$0xff] }
0x18e3   :  { %v3515_v1 = vadd.f32 %v7216_v19, %v3210_v0  ;;  %v3222_v31 = vpop.permute.xlu0 %3221  ;;  %v3887_v60 = vmax.f32 %v3823_v26, 0.0 }
0x18e4   :  { %v3939_v47 = vpack.c.bf16 %v3883_v50, %v3881_v44  ;;  %v3531_v63 = vadd.f32 %v7226_v4, %v3222_v31 }
0x18e5   :  { %v3820_v5 = vadd.f32 %v6683_v15, %v3515_v1  ;;  %v3822_v15 = vadd.f32 %v7221_v6, %v3521_v34 }
0x18e6   :  { %v3826_v33 = vadd.f32 %v7227_v27, %v3531_v63 }
0x18e7   :  { %v3884_v29 = vmax.f32 %v3820_v5, 0.0  ;;  %v3071_v16 = vpop.permute.xlu1 %3070  ;;  %v3886_v56 = vmax.f32 %v3822_v15, 0.0  ;;  %v7235_v15 = vld [vmem:[#allocation36_spill] sm:$0xff] }
0x18e8   :  { %v3519_v57 = vadd.f32 %v7219_v13, %v3071_v16  ;;  %v3086_v7 = vpop.permute.xlu0 %3085 }
0x18e9   :  { %v3940_v8 = vpack.c.bf16 %v3884_v29, %v3882_v51  ;;  %v3533_v41 = vadd.f32 %v7223_v61, %v3086_v7  ;;  %v7231_v51 = vld [vmem:[#allocation28_spill] sm:$0xff] }
0x18ea   :  { %v3821_v35 = vadd.f32 %v7221_v6, %v3519_v57  ;;  %v7233_v57 = vld [vmem:[#allocation11_spill] sm:$0xff] }
0x18eb   :  { %4059 = vmatprep.subr.bf16.mxu1 %v3940_v8  ;;  %v3827_v42 = vadd.f32 %v7224_v58, %v3533_v41  ;;  %v7236_v41 = vld [vmem:[#allocation19_spill] sm:$0xff] }
0x18ec   :  { %v3885_v25 = vmax.f32 %v3821_v35, 0.0  ;;  %4060 = vmatpush1.bf16.msra.mxu1 %v3939_v47  ;;  %v3218_v32 = vpop.permute.xlu1 %3217  ;;  %v3890_v47 = vmax.f32 %v3826_v33, 0.0  ;;  %v7234_v35 = vld [vmem:[#allocation32_spill] sm:$0xff] }
0x18ed   :  { %v3525_v40 = vadd.f32 %v7222_v37, %v3218_v32  ;;  %v3230_v30 = vpop.permute.xlu0 %3229  ;;  %v3891_v53 = vmax.f32 %v3827_v42, 0.0 }
0x18ee   :  { %v3941_v23 = vpack.c.bf16 %v3887_v60, %v3885_v25 }
0x18ef   :  { %v3824_v9 = vadd.f32 %v7218_v18, %v3525_v40  ;;  %v7232_v18 = vld [vmem:[#allocation29_spill] sm:$0xff] }
0x18f0   :  { %v3541_v26 = vadd.f32 %v7232_v18, %v3230_v30 }
0x18f1   :  { %v3888_v17 = vmax.f32 %v3824_v9, 0.0  ;;  %v3081_v11 = vpop.permute.xlu1 %3080 }
0x18f2   :  { %v3529_v62 = vadd.f32 %v7225_v46, %v3081_v11  ;;  %v3096_v38 = vpop.permute.xlu0 %3095  ;;  %v3830_v6 = vadd.f32 %v7233_v57, %v3541_v26 }
0x18f3   :  { %v3942_v49 = vpack.c.bf16 %v3888_v17, %v3886_v56  ;;  %v3543_v19 = vadd.f32 %v7229_v21, %v3096_v38  ;;  %v7237_v56 = vld [vmem:[#allocation33_spill] sm:$0xff]  ;;  %v7241_v21 = vld [vmem:[#allocation26_spill] sm:$0xff] }
0x18f4   :  { %v3825_v22 = vadd.f32 %v7227_v27, %v3529_v62  ;;  %v7239_v62 = vld [vmem:[#allocation15_spill] sm:$0xff] }
0x18f5   :  { %4061 = vmatprep.subr.bf16.mxu1 %v3942_v49  ;;  %v3831_v5 = vadd.f32 %v7230_v24, %v3543_v19 }
0x18f6   :  { %v3889_v2 = vmax.f32 %v3825_v22, 0.0  ;;  %4062 = vmatpush1.bf16.msra.mxu1 %v3941_v23  ;;  %v3226_v20 = vpop.permute.xlu1 %3225  ;;  %v3894_v23 = vmax.f32 %v3830_v6, 0.0 }
0x18f7   :  { %v3535_v50 = vadd.f32 %v7228_v12, %v3226_v20  ;;  %v3238_v44 = vpop.permute.xlu0 %3237  ;;  %v3895_v48 = vmax.f32 %v3831_v5, 0.0  ;;  %v7240_v20 = vld [vmem:[#allocation41_spill] sm:$0xff] }
0x18f8   :  { %v3943_v0 = vpack.c.bf16 %v3891_v53, %v3889_v2 }
0x18f9   :  { %v3828_v1 = vadd.f32 %v7224_v58, %v3535_v50  ;;  %v7238_v58 = vld [vmem:[#allocation35_spill] sm:$0xff] }
0x18fa   :  { %v3551_v42 = vadd.f32 %v7238_v58, %v3238_v44 }
0x18fb   :  { %v3892_v31 = vmax.f32 %v3828_v1, 0.0  ;;  %v3091_v39 = vpop.permute.xlu1 %3090  ;;  %v7242_v1 = vld [vmem:[#allocation38_spill] sm:$0xff] }
0x18fc   :  { %v3539_v29 = vadd.f32 %v7231_v51, %v3091_v39  ;;  %v3106_v16 = vpop.permute.xlu0 %3105  ;;  %v3834_v27 = vadd.f32 %v7239_v62, %v3551_v42  ;;  %v7244_v51 = vld [vmem:[#allocation24_spill] sm:$0xff] }
0x18fd   :  { %v3944_v13 = vpack.c.bf16 %v3892_v31, %v3890_v47  ;;  %v3553_v37 = vadd.f32 %v7235_v15, %v3106_v16  ;;  %v7243_v31 = vld [vmem:[#allocation39_spill] sm:$0xff] }
0x18fe   :  { %v3829_v7 = vadd.f32 %v7233_v57, %v3539_v29  ;;  %v3898_v50 = vmax.f32 %v3834_v27, 0.0 }
0x18ff   :  { %4063 = vmatprep.subr.bf16.mxu1 %v3944_v13  ;;  %v3835_v9 = vadd.f32 %v7236_v41, %v3553_v37  ;;  %v7245_v13 = vld [vmem:[#allocation42_spill] sm:$0xff]  ;;  %v7248_v37 = vld [vmem:[#allocation43_spill] sm:$0xff] }
0x1900   :  { %v3893_v34 = vmax.f32 %v3829_v7, 0.0  ;;  %4064 = vmatpush1.bf16.msra.mxu1 %v3943_v0  ;;  %v3234_v8 = vpop.permute.xlu1 %3233 }
0x1901   :  { %v3545_v60 = vadd.f32 %v7234_v35, %v3234_v8  ;;  %v3246_v25 = vpop.permute.xlu0 %3245  ;;  %v3899_v4 = vmax.f32 %v3835_v9, 0.0 }
0x1902   :  { %v3945_v32 = vpack.c.bf16 %v3895_v48, %v3893_v34  ;;  %v3561_v39 = vadd.f32 %v7243_v31, %v3246_v25  ;;  %v7246_v48 = vld [vmem:[#allocation45_spill] sm:$0xff] }
0x1903   :  { %v3832_v40 = vadd.f32 %v7230_v24, %v3545_v60 }
0x1904   :  { %v3838_v26 = vadd.f32 %v7244_v51, %v3561_v39 }
0x1905   :  { %v3896_v30 = vmax.f32 %v3832_v40, 0.0  ;;  %v3101_v61 = vpop.permute.xlu1 %3100 }
0x1906   :  { %v3549_v17 = vadd.f32 %v7237_v56, %v3101_v61  ;;  %v3116_v11 = vpop.permute.xlu0 %3115  ;;  %v3902_v35 = vmax.f32 %v3838_v26, 0.0 }
0x1907   :  { %v3946_v46 = vpack.c.bf16 %v3896_v30, %v3894_v23  ;;  %v3563_v33 = vadd.f32 %v7240_v20, %v3116_v11  ;;  %v7249_v23 = vld [vmem:[#allocation44_spill] sm:$0xff] }
0x1908   :  { %v3833_v38 = vadd.f32 %v7239_v62, %v3549_v17 }
0x1909   :  { %4065 = vmatprep.subr.bf16.mxu1 %v3946_v46  ;;  %v3839_v19 = vadd.f32 %v7241_v21, %v3563_v33 }
0x190a   :  { %v3897_v63 = vmax.f32 %v3833_v38, 0.0  ;;  %4066 = vmatpush1.bf16.msra.mxu1 %v3945_v32  ;;  %v3242_v49 = vpop.permute.xlu1 %3241  ;;  %v7247_v32 = vld [vmem:[#allocation34_spill] sm:$0xff] }
0x190b   :  { %v3555_v22 = vadd.f32 %v6850_v36, %v3242_v49  ;;  %v3254_v53 = vpop.permute.xlu0 %3253  ;;  %v3903_v36 = vmax.f32 %v3839_v19, 0.0 }
0x190c   :  { %v3947_v2 = vpack.c.bf16 %v3899_v4, %v3897_v63  ;;  %v3571_v30 = vadd.f32 %v7249_v23, %v3254_v53 }
0x190d   :  { %v3836_v12 = vadd.f32 %v7236_v41, %v3555_v22  ;;  %v7250_v41 = vld [vmem:[#allocation30_spill] sm:$0xff]  ;;  %v7251_v22 = vld [vmem:[#allocation40_spill] sm:$0xff] }
0x190e   :  { %v3842_v42 = vadd.f32 %v7250_v41, %v3571_v30 }
0x190f   :  { %v3900_v44 = vmax.f32 %v3836_v12, 0.0  ;;  %v3111_v0 = vpop.permute.xlu1 %3110  ;;  %v7252_v12 = vld [vmem:[#allocation37_spill] sm:$0xff] }
0x1910   :  { %v3559_v47 = vadd.f32 %v7242_v1, %v3111_v0  ;;  %v3126_v24 = vpop.permute.xlu0 %3125  ;;  %v3906_v63 = vmax.f32 %v3842_v42, 0.0 }
0x1911   :  { %v3948_v5 = vpack.c.bf16 %v3900_v44, %v3898_v50  ;;  %v3573_v34 = vadd.f32 %v7246_v48, %v3126_v24 }
0x1912   :  { %v3837_v29 = vadd.f32 %v7244_v51, %v3559_v47 }
0x1913   :  { %4067 = vmatprep.subr.bf16.mxu1 %v3948_v5  ;;  %v3843_v15 = vadd.f32 %v7247_v32, %v3573_v34 }
0x1914   :  { %v3901_v16 = vmax.f32 %v3837_v29, 0.0  ;;  %4068 = vmatpush1.bf16.msra.mxu1 %v3947_v2  ;;  %v3250_v18 = vpop.permute.xlu1 %3249 }
0x1915   :  { %v3565_v57 = vadd.f32 %v7245_v13, %v3250_v18  ;;  %v3262_v6 = vpop.permute.xlu0 %3261  ;;  %v3907_v17 = vmax.f32 %v3843_v15, 0.0  ;;  %v5277_v15 = vld [vmem:[%s7136_s14 + $0x30] ss:$8 sps:$4 sm:$0xff]  }
0x1916   :  { %v3949_v7 = vpack.c.bf16 %v3903_v36, %v3901_v16  ;;  %v3581_v20 = vadd.f32 %v6900_v14, %v3262_v6 }
0x1917   :  { %v3840_v8 = vadd.f32 %v7241_v21, %v3565_v57 }
0x1919   :  { %v3904_v60 = vmax.f32 %v3840_v8, 0.0  ;;  %v3121_v25 = vpop.permute.xlu1 %3120 }
0x191a   :  { %v3569_v40 = vadd.f32 %v7248_v37, %v3121_v25  ;;  %v3136_v56 = vpop.permute.xlu0 %3135  ;;  %v5274_v25 = vld [vmem:[%s7136_s14 + $0x20] ss:$8 sps:$4 sm:$0xff]  }
0x191b   :  { %v3950_v61 = vpack.c.bf16 %v3904_v60, %v3902_v35  ;;  %v3583_v38 = vadd.f32 %v6908_v45, %v3136_v56  ;;  %v3846_v45 = vadd.f32 %v7252_v12, %v3581_v20 }
0x191c   :  { %v3841_v9 = vadd.f32 %v7250_v41, %v3569_v40 }
0x191d   :  { %4069 = vmatprep.subr.bf16.mxu1 %v3950_v61  ;;  %v3847_v53 = vadd.f32 %v7251_v22, %v3583_v38  ;;  %v3910_v47 = vmax.f32 %v3846_v45, 0.0 }
0x191e   :  { %v3905_v11 = vmax.f32 %v3841_v9, 0.0  ;;  %4070 = vmatpush1.bf16.msra.mxu1 %v3949_v7  ;;  %v3258_v58 = vpop.permute.xlu1 %3257 }
0x191f   :  { %v3575_v46 = vadd.f32 %v6893_v3, %v3258_v58  ;;  %v3911_v44 = vmax.f32 %v3847_v53, 0.0  ;;  %v3270_v24 = vpop.permute.xlu0 %3269 }
0x1920   :  { %v3951_v62 = vpack.c.bf16 %v3907_v17, %v3905_v11  ;;  %v3591_v51 = vadd.f32 %v6946_v43, %v3270_v24  ;;  %v5269_v43 = vld [vmem:[%s7136_s14 + $0x14] ss:$8 sps:$4 sm:$0xff]  }
0x1921   :  { %v3844_v4 = vadd.f32 %v7247_v32, %v3575_v46  ;;  %v5275_v32 = vld [vmem:[%s7136_s14 + $0x34] ss:$8 sps:$4 sm:$0xff]  }
0x1923   :  { %v3908_v49 = vmax.f32 %v3844_v4, 0.0  ;;  %v3131_v27 = vpop.permute.xlu1 %3130 }
0x1924   :  { %v3579_v2 = vadd.f32 %v6897_v28, %v3131_v27  ;;  %v3146_v36 = vpop.permute.xlu0 %3145 }
0x1925   :  { %v3952_v33 = vpack.c.bf16 %v3908_v49, %v3906_v63  ;;  %v3593_v16 = vadd.f32 %v6948_v54, %v3146_v36  ;;  %v5271_v54 = vld [vmem:[%s7136_s14 + $0x10] ss:$8 sps:$4 sm:$0xff]  }
0x1926   :  { %v3845_v50 = vadd.f32 %v7252_v12, %v3579_v2 }
0x1927   :  { %4071 = vmatprep.subr.bf16.mxu1 %v3952_v33 }
0x1928   :  { %v3909_v3 = vmax.f32 %v3845_v50, 0.0  ;;  %4072 = vmatpush1.bf16.msra.mxu1 %v3951_v62  ;;  %v3266_v0 = vpop.permute.xlu1 %3265  ;;  %v3968_v37 = vpop.permute.xlu0 %3967 }
0x1929   :  { %v3585_v21 = vadd.f32 %v6933_v10, %v3266_v0 }
0x192a   :  { %v3953_v19 = vpack.c.bf16 %v3911_v44, %v3909_v3 }
0x192b   :  { %v3848_v1 = vadd.f32 %v7251_v22, %v3585_v21 }
0x192c   :  { %v3978_v4 = vpop.permute.xlu0 %3977 }
0x192d   :  { %v3912_v31 = vmax.f32 %v3848_v1, 0.0  ;;  %v3141_v28 = vpop.permute.xlu1 %3140 }
0x192e   :  { %v3589_v29 = vadd.f32 %v6939_v55, %v3141_v28  ;;  %v5266_v55 = vld [vmem:[%s7136_s14] ss:$8 sps:$4 sm:$0xff]  }
0x192f   :  { %v3954_v39 = vpack.c.bf16 %v3912_v31, %v3910_v47 }
0x1930   :  { %v3988_v21 = vpop.permute.xlu0 %3987 }
0x1931   :  { %4073 = vmatprep.subr.bf16.mxu1 %v3954_v39 }
0x1932   :  { %4074 = vmatpush1.bf16.msra.mxu1 %v3953_v19  ;;  %v3274_v14 = vpop.permute.xlu1 %3273 }
0x1933   :  { %v3595_v10 = vadd.f32 %v6952_v52, %v3274_v14  ;;  %v5272_v52 = vld [vmem:[%s7136_s14 + $0x24] ss:$8 sps:$4 sm:$0xff]  }
0x1937   :  { %v3782_v5 = vpop.permute.xlu1 %3781 }
0x1938   :  { %v3849_v18 = vadd.f32 %v3782_v5, %v3589_v29  ;;  %v3850_v26 = vadd.f32 %v3782_v5, %v3591_v51 }
0x193a   :  { %v3913_v48 = vmax.f32 %v3849_v18, 0.0  ;;  %v3914_v34 = vmax.f32 %v3850_v26, 0.0  ;;  %v3998_v26 = vpop.permute.xlu0 %3997 }
0x193b   :  { %v3787_v13 = vpop.permute.xlu1 %3786 }
0x193c   :  { %v3851_v57 = vadd.f32 %v3787_v13, %v3593_v16  ;;  %v3852_v7 = vadd.f32 %v3787_v13, %v3595_v10 }
0x193e   :  { %v3915_v8 = vmax.f32 %v3851_v57, 0.0  ;;  %v3916_v6 = vmax.f32 %v3852_v7, 0.0 }
0x193f   :  { %v3973_v61 = vpop.permute.xlu1 %3972 }
0x1940   :  { %v3955_v35 = vpack.c.bf16 %v3915_v8, %v3913_v48  ;;  %v3956_v60 = vpack.c.bf16 %v3916_v6, %v3914_v34 }
0x1942   :  { %4075 = vmatprep.subr.bf16.mxu1 %v3956_v60 }
0x1943   :  { %4076 = vmatpush1.bf16.msra.mxu1 %v3955_v35  ;;  %v3983_v22 = vpop.permute.xlu1 %3982 }
0x1946   :  { %4078 = vmatmul.mubr.bf16.vlgmr.msra.gmra.mrb[84].mxu1 %v5266_v55 }
0x1947   :  { %4087 = vmatprep.mubr.bf16.mxu1 %v5269_v43  ;;  %v3993_v28 = vpop.permute.xlu1 %3992 }
0x194b   :  { %v4003_v34 = vpop.permute.xlu1 %4002 }
0x194e   :  { %4088 = vmatmul.mubr.bf16.gmra.mrb[88].mxu1 %v5271_v54 }
0x194f   :  { %4097 = vmatprep.mubr.bf16.mxu1 %v5272_v52 }
0x1956   :  { %4098 = vmatmul.mubr.bf16.gmra.mrb[92].mxu1 %v5274_v25 }
0x1957   :  { %4107 = vmatprep.mubr.bf16.mxu1 %v5275_v32 }
0x195e   :  { %4108 = vmatmul.mubr.bf16.gmra.mrb[96].mxu1 %v5277_v15 }
0x195f   :  { %4185 = vmatprep.mubr.bf16.mxu1 %v7179_v59 }
0x1a19   :  { %v4079_v40 = vpop.f32.mrb[84].mxu1 }
0x1a1a   :  { %v4080_v23 = vadd.f32 %v4079_v40, %v3968_v37  ;;  %v4081_v30 = vpop.f32.mrb[85].mxu1  ;;  %v4147_v40 = vpop.permute.xlu0 %4146 }
0x1a1b   :  { %v4082_v41 = vadd.f32 %v4081_v30, %v3968_v37  ;;  %v4083_v9 = vpop.f32.mrb[86].mxu1  ;;  %v4134_v37 = vld [vmem:[%s7138_s16] sm:$0x1] }
0x1a1c   :  { %v4084_v56 = vadd.f32 %v4083_v9, %v3973_v61  ;;  %v4085_v17 = vpop.f32.mrb[87].mxu1  ;;  %v4118_v58 = vmax.f32 %v4080_v23, 0.0 }
0x1a1d   :  { %v4086_v11 = vadd.f32 %v4085_v17, %v3973_v61  ;;  %v4119_v46 = vmax.f32 %v4082_v41, 0.0 }
0x1a1e   :  { %v4120_v42 = vmax.f32 %v4084_v56, 0.0 }
0x1a1f   :  { %v4121_v62 = vmax.f32 %v4086_v11, 0.0 }
0x1a20   :  { %v4135_v38 = vpack.c.bf16 %v4120_v42, %v4118_v58 }
0x1a21   :  { %v4136_v63 = vpack.c.bf16 %v4121_v62, %v4119_v46  ;;  %v4089_v49 = vpop.f32.mrb[88].mxu1 }
0x1a22   :  { %v4090_v27 = vadd.f32 %v4089_v49, %v3978_v4  ;;  %v4091_v59 = vpop.f32.mrb[89].mxu1 }
0x1a23   :  { %v4092_v53 = vadd.f32 %v4091_v59, %v3978_v4  ;;  %v4093_v2 = vpop.f32.mrb[90].mxu1  ;;  %4153 = vmatprep.subr.bf16.mxu1 %v4136_v63 }
0x1a24   :  { %v4094_v20 = vadd.f32 %v4093_v2, %v3983_v22  ;;  %v4095_v33 = vpop.f32.mrb[91].mxu1  ;;  %4154 = vmatpush1.bf16.msra.mxu1 %v4135_v38  ;;  %v4122_v50 = vmax.f32 %v4090_v27, 0.0 }
0x1a25   :  { %v4096_v12 = vadd.f32 %v4095_v33, %v3983_v22  ;;  %v4123_v3 = vmax.f32 %v4092_v53, 0.0 }
0x1a26   :  { %v4124_v44 = vmax.f32 %v4094_v20, 0.0 }
0x1a27   :  { %v4125_v0 = vmax.f32 %v4096_v12, 0.0 }
0x1a28   :  { %v4137_v45 = vpack.c.bf16 %v4124_v44, %v4122_v50 }
0x1a29   :  { %v4138_v19 = vpack.c.bf16 %v4125_v0, %v4123_v3  ;;  %v4099_v1 = vpop.f32.mrb[92].mxu1 }
0x1a2a   :  { %v4100_v47 = vadd.f32 %v4099_v1, %v3988_v21  ;;  %v4101_v31 = vpop.f32.mrb[93].mxu1 }
0x1a2b   :  { %v4102_v39 = vadd.f32 %v4101_v31, %v3988_v21  ;;  %v4103_v14 = vpop.f32.mrb[94].mxu1  ;;  %4155 = vmatprep.subr.bf16.mxu1 %v4138_v19 }
0x1a2c   :  { %v4104_v24 = vadd.f32 %v4103_v14, %v3993_v28  ;;  %v4105_v5 = vpop.f32.mrb[95].mxu1  ;;  %4156 = vmatpush1.bf16.msra.mxu1 %v4137_v45  ;;  %v4126_v29 = vmax.f32 %v4100_v47, 0.0 }
0x1a2d   :  { %v4106_v51 = vadd.f32 %v4105_v5, %v3993_v28  ;;  %v4127_v16 = vmax.f32 %v4102_v39, 0.0 }
0x1a2e   :  { %v4128_v36 = vmax.f32 %v4104_v24, 0.0 }
0x1a2f   :  { %v4129_v10 = vmax.f32 %v4106_v51, 0.0 }
0x1a30   :  { %v4139_v18 = vpack.c.bf16 %v4128_v36, %v4126_v29 }
0x1a31   :  { %v4140_v13 = vpack.c.bf16 %v4129_v10, %v4127_v16  ;;  %v4109_v57 = vpop.f32.mrb[96].mxu1 }
0x1a32   :  { %v4110_v7 = vadd.f32 %v4109_v57, %v3998_v26  ;;  %v4111_v48 = vpop.f32.mrb[97].mxu1 }
0x1a33   :  { %v4112_v8 = vadd.f32 %v4111_v48, %v3998_v26  ;;  %v4113_v6 = vpop.f32.mrb[98].mxu1  ;;  %4157 = vmatprep.subr.bf16.mxu1 %v4140_v13 }
0x1a34   :  { %v4114_v35 = vadd.f32 %v4113_v6, %v4003_v34  ;;  %v4115_v60 = vpop.f32.mrb[99].mxu1  ;;  %4158 = vmatpush1.bf16.msra.mxu1 %v4139_v18  ;;  %v4130_v43 = vmax.f32 %v4110_v7, 0.0 }
0x1a35   :  { %v4116_v55 = vadd.f32 %v4115_v60, %v4003_v34  ;;  %v4131_v52 = vmax.f32 %v4112_v8, 0.0 }
0x1a36   :  { %v4132_v54 = vmax.f32 %v4114_v35, 0.0 }
0x1a37   :  { %v4133_v25 = vmax.f32 %v4116_v55, 0.0 }
0x1a38   :  { %v4141_v32 = vpack.c.bf16 %v4132_v54, %v4130_v43 }
0x1a39   :  { %v4142_v15 = vpack.c.bf16 %v4133_v25, %v4131_v52 }
0x1a3b   :  { %4159 = vmatprep.subr.bf16.mxu1 %v4142_v15 }
0x1a3c   :  { %4160 = vmatpush1.bf16.msra.mxu1 %v4141_v32 }
0x1a3f   :  { %4365 = vmatmul.mubr.msk.bf16.vlgmr.msra.gmra.mrb[100].mxu1 %vm4149_vm4, %v4134_v37 }
0x1b12   :  { %v4187_v23 = vpop.f32.mrb[100].mxu1 }
0x1b13   :  { %v4188_v30 = vadd.f32 %v4187_v23, %v4147_v40  ;;  %v4189_v61 = vpop.f32.mrb[101].mxu1 }
0x1b14   :  { %v4190_v41 = vadd.f32 %v4189_v61, %v4147_v40  ;;  %v4191_v9 = vpop.f32.mrb[102].mxu1 }
0x1b15   :  { %v4192_v56 = vpop.f32.mrb[103].mxu1 }
0x1b16   :  { %v4196_v17 = vcombine.low %v4188_v30, %v4190_v41 }
0x1b18   :  { %4366 = vst.sshfl [vmem:[#allocation3] sm:$0x33 pattern:$0x76325410] %v4196_v17 }
0x1b19   :  { %5321 = shalt.err (!%p5318_p4)
}
0x1b1a   :  { %s5322_s19 = scalar_lea.hbm %s7140_s18, 64 }
0x1b1b   :  { %p5323_p5 = scmp.ne.s32.totalorder %s7140_s18, %s5322_s19  ;;  %p5326_p6 = scmp.lt.u32.totalorder %s5322_s19, %s7140_s18 }
0x1b1d   :  { %p5328_p7 = pnand %p5326_p6, %p5323_p5 }
0x1b1f   :  { %5331 = shalt.err (!%p5328_p7)
}
0x1b20   :  { %4215 = dma.vmem_to_hbm [thread:$0]  %s4213_s4, 64, %s7140_s18, [#allocation4]  }
0x1b21   :  { %5332 = dma.done.wait [#allocation4], 64  }
0x1b22   :  { %5333 = vsyncadd [#allocation4], 4294967232 }
0x1b23   :  { %4219 = vsyncpa [#allocation4], 1 }

</bundles_post_ra>
